<compile_context>
chip_gen: v5e
topology: v5e:2x2
jax: 0.10.0
libtpu: 0.0.40
codegen_flags: <defaults>
</compile_context>

<pallas_src>
import jax
import jax.numpy as jnp
from jax import lax
from jax.experimental import pallas as pl
from jax.experimental.pallas import tpu as pltpu


def _cru_chunk_kernel(in_ref, init_ref, params_ref, out_ref,
                      mu_s, ml_s, cu_s, cl_s, cs_s):
    """One grid step = one (TS, BBo) chunk of the sequence.

    in_ref:     (TS, BBo, 4*W)   fused [obs | var | dt | valid] (lane packed)
    init_ref:   (BBo, 5*W)       packed initial state
    params_ref: (6, W)           transition parameters (tiled over lane groups)
    out_ref:    (TS, BBo, 12*W)  packed outputs
    *_s:        (BBo, W)         carried Kalman state (VMEM scratch)
    """
    TS, BB, four_w = in_ref.shape
    W = four_w // 4
    t = pl.program_id(1)

    @pl.when(t == 0)
    def _():
        st = init_ref[...]                       # (BB, 5*W)
        mu_s[...] = st[:, 0 * W:1 * W]
        ml_s[...] = st[:, 1 * W:2 * W]
        cu_s[...] = st[:, 2 * W:3 * W]
        cl_s[...] = st[:, 3 * W:4 * W]
        cs_s[...] = st[:, 4 * W:5 * W]

    # Loop-invariant parameter broadcasts hoisted out of the time loop.
    p = params_ref[...]                          # (6, W)
    td = jnp.broadcast_to(p[0:1, :], (BB, W))
    tb = jnp.broadcast_to(p[1:2, :], (BB, W))
    tc = jnp.broadcast_to(p[2:3, :], (BB, W))
    te = jnp.broadcast_to(p[3:4, :], (BB, W))
    qu = jnp.broadcast_to(p[4:5, :], (BB, W))
    ql = jnp.broadcast_to(p[5:6, :], (BB, W))

    def body(i, carry):
        pmu, pml, cu, cl, cs = carry
        step = in_ref[i]                          # (BB, 4*W), one lane-dense load
        obs = step[:, 0 * W:1 * W]
        var = step[:, 1 * W:2 * W]
        dt = step[:, 2 * W:3 * W]
        valid = step[:, 3 * W:4 * W] > 0.5

        # ---- factorized Kalman observation update ----
        inv_denom = pl.reciprocal(cu + var, approx=False)   # exact; EUP has slack
        q_u = cu * inv_denom                      # Kalman gain (upper)
        q_l = cs * inv_denom                      # Kalman gain (lower)
        residual = obs - pmu
        post_mu = jnp.where(valid, pmu + q_u * residual, pmu)
        post_ml = jnp.where(valid, pml + q_l * residual, pml)
        ncu = jnp.where(valid, (1.0 - q_u) * cu, cu)
        ncl = jnp.where(valid, cl - q_l * cs, cl)
        ncs = jnp.where(valid, (1.0 - q_u) * cs, cs)

        # ---- prediction step (diagonal-block transition, delta_t scaled) ----
        d_ = 1.0 - dt * td
        b_ = dt * tb
        c_ = -dt * tc
        e_ = 1.0 - dt * te
        npmu = d_ * post_mu + b_ * post_ml
        npml = c_ * post_mu + e_ * post_ml
        npcu = d_ * d_ * ncu + 2.0 * d_ * b_ * ncs + b_ * b_ * ncl + dt * qu
        npcl = c_ * c_ * ncu + 2.0 * c_ * e_ * ncs + e_ * e_ * ncl + dt * ql
        npcs = d_ * c_ * ncu + (d_ * e_ + b_ * c_) * ncs + b_ * e_ * ncl

        # 12 lane-aligned slice stores (W is a multiple of 128 when lane packed)
        out_ref[i, :, 0 * W:1 * W] = post_mu
        out_ref[i, :, 1 * W:2 * W] = post_ml
        out_ref[i, :, 2 * W:3 * W] = npmu
        out_ref[i, :, 3 * W:4 * W] = npml
        out_ref[i, :, 4 * W:5 * W] = ncu
        out_ref[i, :, 5 * W:6 * W] = ncl
        out_ref[i, :, 6 * W:7 * W] = ncs
        out_ref[i, :, 7 * W:8 * W] = npcu
        out_ref[i, :, 8 * W:9 * W] = npcl
        out_ref[i, :, 9 * W:10 * W] = npcs
        out_ref[i, :, 10 * W:11 * W] = q_u
        out_ref[i, :, 11 * W:12 * W] = q_l

        return (npmu, npml, npcu, npcl, npcs)

    carry0 = (mu_s[...], ml_s[...], cu_s[...], cl_s[...], cs_s[...])
    pmu, pml, cu, cl, cs = lax.fori_loop(0, TS, body, carry0, unroll=8)
    mu_s[...] = pmu
    ml_s[...] = pml
    cu_s[...] = cu
    cl_s[...] = cl
    cs_s[...] = cs


def cru_layer_forward(latent_obs, obs_vars, initial_mean, initial_cov, params,
                      obs_valid=None, time_points=None):
    """CRULayer.forward.

    latent_obs:   [B, T, lod]
    obs_vars:     [B, T, lod]
    initial_mean: [B, 2*lod]
    initial_cov:  list of 3 arrays [B, lod] (upper, lower, side)
    obs_valid:    optional [B, T] bool
    time_points:  optional [B, T] float
    """
    B, T, lod = latent_obs.shape
    f32 = jnp.float32

    # ---- lane packing: fold G batch rows into the 128-lane axis ----
    G = 128 // lod if (lod <= 128 and 128 % lod == 0) else 1
    Bp = ((B + G - 1) // G) * G           # batch padded to a multiple of G
    Bo = Bp // G                          # outer (packed) batch
    W = G * lod                           # lanes per quantity slab

    # ---- batch-parallel split: only on multi-TensorCore chips (v7x) ----
    try:
        split = "v7" in jax.devices()[0].device_kind.lower()
    except Exception:
        split = False
    nb = 2 if (split and Bo % 16 == 0) else 1   # keep sublane dim 8-aligned
    BBo = Bo // nb

    # ---- time-chunk size: amortize grid-step overhead, cap VMEM footprint ----
    T8 = ((T + 7) // 8) * 8
    budget = 24 * 1024 * 1024             # double-buffered block budget (bytes)
    per_step = 2 * BBo * 16 * W * 4       # in (4W) + out (12W), double-buffered
    ts_cap = max(8, budget // max(per_step, 1))
    TS = 8
    for cand in (512, 256, 128, 64, 32, 16, 8):
        if cand <= ts_cap and cand <= T8:
            TS = cand
            break
    T_pad = ((T + TS - 1) // TS) * TS
    nt = T_pad // TS

    # ---- fuse the 4 per-timestep inputs into one [T_pad, Bo, 4W] slab ----
    obs = latent_obs.astype(f32)
    var = obs_vars.astype(f32)
    valid = (obs_valid.astype(f32) if obs_valid is not None
             else jnp.ones((B, T), f32))
    if time_points is not None:
        dts = (time_points[:, 1:] - time_points[:, :-1]).astype(f32)
        dts = jnp.concatenate([dts, jnp.ones((B, 1), f32)], axis=1)
    else:
        dts = jnp.ones((B, T), f32)
    dt_b = jnp.broadcast_to(dts[:, :, None], (B, T, lod))
    valid_b = jnp.broadcast_to(valid[:, :, None], (B, T, lod))

    def pad_bt(x, b_val, t_val):          # [B, T, lod] -> [Bp, T_pad, lod]
        if T_pad != T:
            x = jnp.pad(x, ((0, 0), (0, T_pad - T), (0, 0)),
                        constant_values=t_val)
        if Bp != B:
            x = jnp.pad(x, ((0, Bp - B), (0, 0), (0, 0)),
                        constant_values=b_val)
        return x

    def pack_tm(x):                        # [Bp, T_pad, lod] -> [T_pad, Bo, W]
        return (x.reshape(Bo, G, T_pad, lod)
                 .transpose(2, 0, 1, 3)
                 .reshape(T_pad, Bo, W))

    fused = jnp.concatenate(
        [pack_tm(pad_bt(obs, 0.0, 0.0)),
         pack_tm(pad_bt(var, 1.0, 1.0)),
         pack_tm(pad_bt(dt_b, 1.0, 1.0)),
         pack_tm(pad_bt(valid_b, 0.0, 0.0))], axis=-1)       # [T_pad, Bo, 4W]

    # ---- initial state packed into one lane-dense (Bo, 5W) resident input ----
    def pad_b2(x, val):                    # [B, lod] -> [Bp, lod]
        if Bp != B:
            x = jnp.pad(x, ((0, Bp - B), (0, 0)), constant_values=val)
        return x

    mu0 = initial_mean[:, :lod].astype(f32)
    ml0 = initial_mean[:, lod:].astype(f32)
    cu0, cl0, cs0 = [c.astype(f32) for c in initial_cov]
    init = jnp.concatenate(
        [pad_b2(mu0, 0.0).reshape(Bo, W),
         pad_b2(ml0, 0.0).reshape(Bo, W),
         pad_b2(cu0, 1.0).reshape(Bo, W),
         pad_b2(cl0, 1.0).reshape(Bo, W),
         pad_b2(cs0, 0.0).reshape(Bo, W)], axis=-1)          # (Bo, 5W)

    pstack = jnp.concatenate(
        [params["td"], params["tb"], params["tc"],
         params["te"], params["q_u"], params["q_l"]], axis=0).astype(f32)
    pstack = jnp.tile(pstack, (1, G))                         # (6, W)

    packed = pl.pallas_call(
        _cru_chunk_kernel,
        out_shape=jax.ShapeDtypeStruct((T_pad, Bo, 12 * W), f32),
        grid_spec=pltpu.PrefetchScalarGridSpec(
            num_scalar_prefetch=0,
            grid=(nb, nt),
            in_specs=[
                pl.BlockSpec((TS, BBo, 4 * W), lambda b, t: (t, b, 0)),  # fused
                pl.BlockSpec((BBo, 5 * W), lambda b, t: (b, 0)),         # init
                pl.BlockSpec((6, W), lambda b, t: (0, 0)),               # params
            ],
            out_specs=pl.BlockSpec((TS, BBo, 12 * W), lambda b, t: (t, b, 0)),
            scratch_shapes=[pltpu.VMEM((BBo, W), f32)] * 5,
        ),
        compiler_params=pltpu.CompilerParams(
            dimension_semantics=("parallel", "arbitrary"),
            vmem_limit_bytes=48 * 1024 * 1024),
    )(fused, init, pstack)

    def unpack(q):                         # -> [B, T, lod]
        s = packed[:, :, q * W:(q + 1) * W]                    # [T_pad, Bo, W]
        s = (s.reshape(T_pad, Bo, G, lod)
              .transpose(1, 2, 0, 3)
              .reshape(Bp, T_pad, lod))
        return s[:B, :T]

    post_means = jnp.concatenate([unpack(0), unpack(1)], axis=-1)
    prior_means = jnp.concatenate([unpack(2), unpack(3)], axis=-1)
    post_covs = [unpack(4), unpack(5), unpack(6)]
    prior_covs = [unpack(7), unpack(8), unpack(9)]
    kalman_gains = [unpack(10), unpack(11)]
    return post_means, post_covs, prior_means, prior_covs, kalman_gains


def make_params(lod):
    """Deterministic transition parameters (shape (1, lod) each)."""
    i = jnp.arange(lod, dtype=jnp.float32) / float(lod)
    return {
        "td": (0.05 + 0.02 * i)[None, :],
        "tb": (0.10 + 0.01 * i)[None, :],
        "tc": (0.10 + 0.01 * i)[None, :],
        "te": (0.05 + 0.02 * i)[None, :],
        "q_u": (0.02 + 0.01 * i)[None, :],
        "q_l": (0.02 + 0.01 * i)[None, :],
    }


if __name__ == "__main__":
    B, T, LOD = 2, 8, 32
    key = jax.random.PRNGKey(0)
    k1, k2, k3, k4, k5, k6 = jax.random.split(key, 6)

    latent_obs = jax.random.normal(k1, (B, T, LOD), jnp.float32)
    obs_vars = jax.nn.softplus(jax.random.normal(k2, (B, T, LOD), jnp.float32)) + 1e-3
    initial_mean = jax.random.normal(k3, (B, 2 * LOD), jnp.float32)
    initial_cov = [
        jax.nn.softplus(jax.random.normal(k4, (B, LOD), jnp.float32)) + 1e-3,  # upper
        jax.nn.softplus(jax.random.normal(k5, (B, LOD), jnp.float32)) + 1e-3,  # lower
        jnp.zeros((B, LOD), jnp.float32),                                      # side
    ]
    obs_valid = jax.random.bernoulli(k6, 0.8, (B, T))
    time_points = jnp.cumsum(
        jnp.abs(jax.random.normal(key, (B, T), jnp.float32)) + 0.1, axis=1)

    params = make_params(LOD)

    out = cru_layer_forward(latent_obs, obs_vars, initial_mean, initial_cov,
                            params, obs_valid=obs_valid, time_points=time_points)
    jax.block_until_ready(out)

    post_means, post_covs, prior_means, prior_covs, kalman_gains = out
    assert post_means.shape == (B, T, 2 * LOD)
    assert prior_means.shape == (B, T, 2 * LOD)
    assert all(c.shape == (B, T, LOD) for c in post_covs)
    assert all(c.shape == (B, T, LOD) for c in prior_covs)
    assert all(g.shape == (B, T, LOD) for g in kalman_gains)
    assert all(bool(jnp.all(jnp.isfinite(x))) for x in
               [post_means, prior_means] + post_covs + prior_covs + kalman_gains)
    print("KERNEL_OK")
</pallas_src>

<mosaic_0001>
module attributes {stable_mosaic.version = 11 : i64} {
  func.func @_cru_chunk_kernel(%arg0: i32, %arg1: i32, %arg2: memref<8x1x512xf32, #tpu.memory_space<vmem>>, %arg3: memref<1x640xf32, #tpu.memory_space<vmem>>, %arg4: memref<6x128xf32, #tpu.memory_space<vmem>>, %arg5: memref<8x1x1536xf32, #tpu.memory_space<vmem>>, %arg6: memref<1x128xf32, #tpu.memory_space<vmem>>, %arg7: memref<1x128xf32, #tpu.memory_space<vmem>>, %arg8: memref<1x128xf32, #tpu.memory_space<vmem>>, %arg9: memref<1x128xf32, #tpu.memory_space<vmem>>, %arg10: memref<1x128xf32, #tpu.memory_space<vmem>>) attributes {dimension_semantics = [#tpu.dimension_semantics<parallel>, #tpu.dimension_semantics<arbitrary>], iteration_bounds = array<i64: 1, 1>, scalar_prefetch = 0 : i64, scratch_operands = 5 : i64, tpu.core_type = #tpu.core_type<tc>, window_params = [{transform_indices = @transform_0, window_bounds = array<i64: 8, 1, 512>}, {transform_indices = @transform_1, window_bounds = array<i64: 1, 640>}, {pipeline_mode = #tpu.pipeline_mode<synchronous>, transform_indices = @transform_2, window_bounds = array<i64: 6, 128>}, {transform_indices = @transform_3, window_bounds = array<i64: 8, 1, 1536>}]} {
    %c0_i32 = arith.constant 0 : i32
    %0 = arith.cmpi eq, %arg1, %c0_i32 : i32
    %1 = arith.extui %0 : i1 to i32
    %c0_i32_0 = arith.constant 0 : i32
    %2 = arith.cmpi ne, %1, %c0_i32_0 : i32
    scf.if %2 {
      %c0_283 = arith.constant 0 : index
      %c0_284 = arith.constant 0 : index
      %1052 = vector.load %arg3[%c0_283, %c0_284] : memref<1x640xf32, #tpu.memory_space<vmem>>, vector<1x640xf32>
      %1053 = vector.extract_strided_slice %1052 {offsets = [0, 0], sizes = [1, 128], strides = [1, 1]} : vector<1x640xf32> to vector<1x128xf32>
      %c0_285 = arith.constant 0 : index
      %c0_286 = arith.constant 0 : index
      %1054 = vector.load %arg6[%c0_285, %c0_286] : memref<1x128xf32, #tpu.memory_space<vmem>>, vector<1x128xf32>
      tpu.vector_store %arg6[%c0_285, %c0_286], %1053 {strides = array<i32>} : memref<1x128xf32, #tpu.memory_space<vmem>>, vector<1x128xf32>,
      %1055 = vector.extract_strided_slice %1052 {offsets = [0, 128], sizes = [1, 128], strides = [1, 1]} : vector<1x640xf32> to vector<1x128xf32>
      %c0_287 = arith.constant 0 : index
      %c0_288 = arith.constant 0 : index
      %1056 = vector.load %arg7[%c0_287, %c0_288] : memref<1x128xf32, #tpu.memory_space<vmem>>, vector<1x128xf32>
      tpu.vector_store %arg7[%c0_287, %c0_288], %1055 {strides = array<i32>} : memref<1x128xf32, #tpu.memory_space<vmem>>, vector<1x128xf32>,
      %1057 = vector.extract_strided_slice %1052 {offsets = [0, 256], sizes = [1, 128], strides = [1, 1]} : vector<1x640xf32> to vector<1x128xf32>
      %c0_289 = arith.constant 0 : index
      %c0_290 = arith.constant 0 : index
      %1058 = vector.load %arg8[%c0_289, %c0_290] : memref<1x128xf32, #tpu.memory_space<vmem>>, vector<1x128xf32>
      tpu.vector_store %arg8[%c0_289, %c0_290], %1057 {strides = array<i32>} : memref<1x128xf32, #tpu.memory_space<vmem>>, vector<1x128xf32>,
      %1059 = vector.extract_strided_slice %1052 {offsets = [0, 384], sizes = [1, 128], strides = [1, 1]} : vector<1x640xf32> to vector<1x128xf32>
      %c0_291 = arith.constant 0 : index
      %c0_292 = arith.constant 0 : index
      %1060 = vector.load %arg9[%c0_291, %c0_292] : memref<1x128xf32, #tpu.memory_space<vmem>>, vector<1x128xf32>
      tpu.vector_store %arg9[%c0_291, %c0_292], %1059 {strides = array<i32>} : memref<1x128xf32, #tpu.memory_space<vmem>>, vector<1x128xf32>,
      %1061 = vector.extract_strided_slice %1052 {offsets = [0, 512], sizes = [1, 128], strides = [1, 1]} : vector<1x640xf32> to vector<1x128xf32>
      %c0_293 = arith.constant 0 : index
      %c0_294 = arith.constant 0 : index
      %1062 = vector.load %arg10[%c0_293, %c0_294] : memref<1x128xf32, #tpu.memory_space<vmem>>, vector<1x128xf32>
      tpu.vector_store %arg10[%c0_293, %c0_294], %1061 {strides = array<i32>} : memref<1x128xf32, #tpu.memory_space<vmem>>, vector<1x128xf32>,
    } else {
    }
    %c0 = arith.constant 0 : index
    %c0_1 = arith.constant 0 : index
    %3 = vector.load %arg4[%c0, %c0_1] : memref<6x128xf32, #tpu.memory_space<vmem>>, vector<6x128xf32>
    %4 = vector.extract_strided_slice %3 {offsets = [0, 0], sizes = [1, 128], strides = [1, 1]} : vector<6x128xf32> to vector<1x128xf32>
    %5 = vector.extract_strided_slice %3 {offsets = [1, 0], sizes = [1, 128], strides = [1, 1]} : vector<6x128xf32> to vector<1x128xf32>
    %6 = vector.extract_strided_slice %3 {offsets = [2, 0], sizes = [1, 128], strides = [1, 1]} : vector<6x128xf32> to vector<1x128xf32>
    %7 = vector.extract_strided_slice %3 {offsets = [3, 0], sizes = [1, 128], strides = [1, 1]} : vector<6x128xf32> to vector<1x128xf32>
    %8 = vector.extract_strided_slice %3 {offsets = [4, 0], sizes = [1, 128], strides = [1, 1]} : vector<6x128xf32> to vector<1x128xf32>
    %9 = vector.extract_strided_slice %3 {offsets = [5, 0], sizes = [1, 128], strides = [1, 1]} : vector<6x128xf32> to vector<1x128xf32>
    %c0_2 = arith.constant 0 : index
    %c0_3 = arith.constant 0 : index
    %10 = vector.load %arg6[%c0_2, %c0_3] : memref<1x128xf32, #tpu.memory_space<vmem>>, vector<1x128xf32>
    %c0_4 = arith.constant 0 : index
    %c0_5 = arith.constant 0 : index
    %11 = vector.load %arg7[%c0_4, %c0_5] : memref<1x128xf32, #tpu.memory_space<vmem>>, vector<1x128xf32>
    %c0_6 = arith.constant 0 : index
    %c0_7 = arith.constant 0 : index
    %12 = vector.load %arg8[%c0_6, %c0_7] : memref<1x128xf32, #tpu.memory_space<vmem>>, vector<1x128xf32>
    %c0_8 = arith.constant 0 : index
    %c0_9 = arith.constant 0 : index
    %13 = vector.load %arg9[%c0_8, %c0_9] : memref<1x128xf32, #tpu.memory_space<vmem>>, vector<1x128xf32>
    %c0_10 = arith.constant 0 : index
    %c0_11 = arith.constant 0 : index
    %14 = vector.load %arg10[%c0_10, %c0_11] : memref<1x128xf32, #tpu.memory_space<vmem>>, vector<1x128xf32>
    %c0_i32_12 = arith.constant 0 : i32
    %15 = arith.index_cast %c0_i32_12 : i32 to index
    %c0_13 = arith.constant 0 : index
    %c0_14 = arith.constant 0 : index
    %16 = vector.load %arg2[%15, %c0_13, %c0_14] : memref<8x1x512xf32, #tpu.memory_space<vmem>>, vector<1x1x512xf32>
    %17 = vector.shape_cast %16 : vector<1x1x512xf32> to vector<1x512xf32>
    %18 = vector.extract_strided_slice %17 {offsets = [0, 0], sizes = [1, 128], strides = [1, 1]} : vector<1x512xf32> to vector<1x128xf32>
    %19 = vector.extract_strided_slice %17 {offsets = [0, 128], sizes = [1, 128], strides = [1, 1]} : vector<1x512xf32> to vector<1x128xf32>
    %20 = vector.extract_strided_slice %17 {offsets = [0, 256], sizes = [1, 128], strides = [1, 1]} : vector<1x512xf32> to vector<1x128xf32>
    %21 = vector.extract_strided_slice %17 {offsets = [0, 384], sizes = [1, 128], strides = [1, 1]} : vector<1x512xf32> to vector<1x128xf32>
    %cst = arith.constant 5.000000e-01 : f32
    %22 = vector.broadcast %cst : f32 to vector<1x128xf32>
    %23 = arith.cmpf ogt, %21, %22 : vector<1x128xf32>
    %24 = arith.addf %12, %19 : vector<1x128xf32>
    %25 = tpu.reciprocal %24 : vector<1x128xf32> -> vector<1x128xf32>
    %26 = arith.mulf %12, %25 : vector<1x128xf32>
    %27 = arith.mulf %14, %25 : vector<1x128xf32>
    %28 = arith.subf %18, %10 : vector<1x128xf32>
    %29 = arith.mulf %26, %28 : vector<1x128xf32>
    %30 = arith.addf %10, %29 : vector<1x128xf32>
    %31 = arith.select %23, %30, %10 : vector<1x128xi1>, vector<1x128xf32>
    %32 = arith.mulf %27, %28 : vector<1x128xf32>
    %33 = arith.addf %11, %32 : vector<1x128xf32>
    %34 = arith.select %23, %33, %11 : vector<1x128xi1>, vector<1x128xf32>
    %cst_15 = arith.constant 1.000000e+00 : f32
    %35 = vector.broadcast %cst_15 : f32 to vector<1x128xf32>
    %36 = arith.subf %35, %26 : vector<1x128xf32>
    %37 = arith.mulf %36, %12 : vector<1x128xf32>
    %38 = arith.select %23, %37, %12 : vector<1x128xi1>, vector<1x128xf32>
    %39 = arith.mulf %27, %14 : vector<1x128xf32>
    %40 = arith.subf %13, %39 : vector<1x128xf32>
    %41 = arith.select %23, %40, %13 : vector<1x128xi1>, vector<1x128xf32>
    %cst_16 = arith.constant 1.000000e+00 : f32
    %42 = vector.broadcast %cst_16 : f32 to vector<1x128xf32>
    %43 = arith.subf %42, %26 : vector<1x128xf32>
    %44 = arith.mulf %43, %14 : vector<1x128xf32>
    %45 = arith.select %23, %44, %14 : vector<1x128xi1>, vector<1x128xf32>
    %46 = arith.mulf %20, %4 : vector<1x128xf32>
    %cst_17 = arith.constant 1.000000e+00 : f32
    %47 = vector.broadcast %cst_17 : f32 to vector<1x128xf32>
    %48 = arith.subf %47, %46 : vector<1x128xf32>
    %49 = arith.mulf %20, %5 : vector<1x128xf32>
    %cst_18 = arith.constant 0.000000e+00 : f32
    %50 = vector.broadcast %cst_18 : f32 to vector<1x128xf32>
    %51 = arith.subf %50, %20 : vector<1x128xf32>
    %52 = arith.mulf %51, %6 : vector<1x128xf32>
    %53 = arith.mulf %20, %7 : vector<1x128xf32>
    %cst_19 = arith.constant 1.000000e+00 : f32
    %54 = vector.broadcast %cst_19 : f32 to vector<1x128xf32>
    %55 = arith.subf %54, %53 : vector<1x128xf32>
    %56 = arith.mulf %48, %31 : vector<1x128xf32>
    %57 = arith.mulf %49, %34 : vector<1x128xf32>
    %58 = arith.addf %56, %57 : vector<1x128xf32>
    %59 = arith.mulf %52, %31 : vector<1x128xf32>
    %60 = arith.mulf %55, %34 : vector<1x128xf32>
    %61 = arith.addf %59, %60 : vector<1x128xf32>
    %62 = arith.mulf %48, %48 : vector<1x128xf32>
    %63 = arith.mulf %62, %38 : vector<1x128xf32>
    %cst_20 = arith.constant 2.000000e+00 : f32
    %64 = vector.broadcast %cst_20 : f32 to vector<1x128xf32>
    %65 = arith.mulf %64, %48 : vector<1x128xf32>
    %66 = arith.mulf %65, %49 : vector<1x128xf32>
    %67 = arith.mulf %66, %45 : vector<1x128xf32>
    %68 = arith.addf %63, %67 : vector<1x128xf32>
    %69 = arith.mulf %49, %49 : vector<1x128xf32>
    %70 = arith.mulf %69, %41 : vector<1x128xf32>
    %71 = arith.addf %68, %70 : vector<1x128xf32>
    %72 = arith.mulf %20, %8 : vector<1x128xf32>
    %73 = arith.addf %71, %72 : vector<1x128xf32>
    %74 = arith.mulf %52, %52 : vector<1x128xf32>
    %75 = arith.mulf %74, %38 : vector<1x128xf32>
    %cst_21 = arith.constant 2.000000e+00 : f32
    %76 = vector.broadcast %cst_21 : f32 to vector<1x128xf32>
    %77 = arith.mulf %76, %52 : vector<1x128xf32>
    %78 = arith.mulf %77, %55 : vector<1x128xf32>
    %79 = arith.mulf %78, %45 : vector<1x128xf32>
    %80 = arith.addf %75, %79 : vector<1x128xf32>
    %81 = arith.mulf %55, %55 : vector<1x128xf32>
    %82 = arith.mulf %81, %41 : vector<1x128xf32>
    %83 = arith.addf %80, %82 : vector<1x128xf32>
    %84 = arith.mulf %20, %9 : vector<1x128xf32>
    %85 = arith.addf %83, %84 : vector<1x128xf32>
    %86 = arith.mulf %48, %52 : vector<1x128xf32>
    %87 = arith.mulf %86, %38 : vector<1x128xf32>
    %88 = arith.mulf %48, %55 : vector<1x128xf32>
    %89 = arith.mulf %49, %52 : vector<1x128xf32>
    %90 = arith.addf %88, %89 : vector<1x128xf32>
    %91 = arith.mulf %90, %45 : vector<1x128xf32>
    %92 = arith.addf %87, %91 : vector<1x128xf32>
    %93 = arith.mulf %49, %55 : vector<1x128xf32>
    %94 = arith.mulf %93, %41 : vector<1x128xf32>
    %95 = arith.addf %92, %94 : vector<1x128xf32>
    %96 = arith.index_cast %c0_i32_12 : i32 to index
    %c0_22 = arith.constant 0 : index
    %c0_23 = arith.constant 0 : index
    %97 = vector.load %arg5[%96, %c0_22, %c0_23] : memref<8x1x1536xf32, #tpu.memory_space<vmem>>, vector<1x1x128xf32>
    %98 = vector.shape_cast %97 : vector<1x1x128xf32> to vector<1x128xf32>
    %99 = vector.shape_cast %31 : vector<1x128xf32> to vector<1x1x128xf32>
    tpu.vector_store %arg5[%96, %c0_22, %c0_23], %99 {strides = array<i32>} : memref<8x1x1536xf32, #tpu.memory_space<vmem>>, vector<1x1x128xf32>,
    %100 = arith.index_cast %c0_i32_12 : i32 to index
    %c0_24 = arith.constant 0 : index
    %c128 = arith.constant 128 : index
    %101 = vector.load %arg5[%100, %c0_24, %c128] : memref<8x1x1536xf32, #tpu.memory_space<vmem>>, vector<1x1x128xf32>
    %102 = vector.shape_cast %101 : vector<1x1x128xf32> to vector<1x128xf32>
    %103 = vector.shape_cast %34 : vector<1x128xf32> to vector<1x1x128xf32>
    tpu.vector_store %arg5[%100, %c0_24, %c128], %103 {strides = array<i32>} : memref<8x1x1536xf32, #tpu.memory_space<vmem>>, vector<1x1x128xf32>,
    %104 = arith.index_cast %c0_i32_12 : i32 to index
    %c0_25 = arith.constant 0 : index
    %c256 = arith.constant 256 : index
    %105 = vector.load %arg5[%104, %c0_25, %c256] : memref<8x1x1536xf32, #tpu.memory_space<vmem>>, vector<1x1x128xf32>
    %106 = vector.shape_cast %105 : vector<1x1x128xf32> to vector<1x128xf32>
    %107 = vector.shape_cast %58 : vector<1x128xf32> to vector<1x1x128xf32>
    tpu.vector_store %arg5[%104, %c0_25, %c256], %107 {strides = array<i32>} : memref<8x1x1536xf32, #tpu.memory_space<vmem>>, vector<1x1x128xf32>,
    %108 = arith.index_cast %c0_i32_12 : i32 to index
    %c0_26 = arith.constant 0 : index
    %c384 = arith.constant 384 : index
    %109 = vector.load %arg5[%108, %c0_26, %c384] : memref<8x1x1536xf32, #tpu.memory_space<vmem>>, vector<1x1x128xf32>
    %110 = vector.shape_cast %109 : vector<1x1x128xf32> to vector<1x128xf32>
    %111 = vector.shape_cast %61 : vector<1x128xf32> to vector<1x1x128xf32>
    tpu.vector_store %arg5[%108, %c0_26, %c384], %111 {strides = array<i32>} : memref<8x1x1536xf32, #tpu.memory_space<vmem>>, vector<1x1x128xf32>,
    %112 = arith.index_cast %c0_i32_12 : i32 to index
    %c0_27 = arith.constant 0 : index
    %c512 = arith.constant 512 : index
    %113 = vector.load %arg5[%112, %c0_27, %c512] : memref<8x1x1536xf32, #tpu.memory_space<vmem>>, vector<1x1x128xf32>
    %114 = vector.shape_cast %113 : vector<1x1x128xf32> to vector<1x128xf32>
    %115 = vector.shape_cast %38 : vector<1x128xf32> to vector<1x1x128xf32>
    tpu.vector_store %arg5[%112, %c0_27, %c512], %115 {strides = array<i32>} : memref<8x1x1536xf32, #tpu.memory_space<vmem>>, vector<1x1x128xf32>,
    %116 = arith.index_cast %c0_i32_12 : i32 to index
    %c0_28 = arith.constant 0 : index
    %c640 = arith.constant 640 : index
    %117 = vector.load %arg5[%116, %c0_28, %c640] : memref<8x1x1536xf32, #tpu.memory_space<vmem>>, vector<1x1x128xf32>
    %118 = vector.shape_cast %117 : vector<1x1x128xf32> to vector<1x128xf32>
    %119 = vector.shape_cast %41 : vector<1x128xf32> to vector<1x1x128xf32>
    tpu.vector_store %arg5[%116, %c0_28, %c640], %119 {strides = array<i32>} : memref<8x1x1536xf32, #tpu.memory_space<vmem>>, vector<1x1x128xf32>,
    %120 = arith.index_cast %c0_i32_12 : i32 to index
    %c0_29 = arith.constant 0 : index
    %c768 = arith.constant 768 : index
    %121 = vector.load %arg5[%120, %c0_29, %c768] : memref<8x1x1536xf32, #tpu.memory_space<vmem>>, vector<1x1x128xf32>
    %122 = vector.shape_cast %121 : vector<1x1x128xf32> to vector<1x128xf32>
    %123 = vector.shape_cast %45 : vector<1x128xf32> to vector<1x1x128xf32>
    tpu.vector_store %arg5[%120, %c0_29, %c768], %123 {strides = array<i32>} : memref<8x1x1536xf32, #tpu.memory_space<vmem>>, vector<1x1x128xf32>,
    %124 = arith.index_cast %c0_i32_12 : i32 to index
    %c0_30 = arith.constant 0 : index
    %c896 = arith.constant 896 : index
    %125 = vector.load %arg5[%124, %c0_30, %c896] : memref<8x1x1536xf32, #tpu.memory_space<vmem>>, vector<1x1x128xf32>
    %126 = vector.shape_cast %125 : vector<1x1x128xf32> to vector<1x128xf32>
    %127 = vector.shape_cast %73 : vector<1x128xf32> to vector<1x1x128xf32>
    tpu.vector_store %arg5[%124, %c0_30, %c896], %127 {strides = array<i32>} : memref<8x1x1536xf32, #tpu.memory_space<vmem>>, vector<1x1x128xf32>,
    %128 = arith.index_cast %c0_i32_12 : i32 to index
    %c0_31 = arith.constant 0 : index
    %c1024 = arith.constant 1024 : index
    %129 = vector.load %arg5[%128, %c0_31, %c1024] : memref<8x1x1536xf32, #tpu.memory_space<vmem>>, vector<1x1x128xf32>
    %130 = vector.shape_cast %129 : vector<1x1x128xf32> to vector<1x128xf32>
    %131 = vector.shape_cast %85 : vector<1x128xf32> to vector<1x1x128xf32>
    tpu.vector_store %arg5[%128, %c0_31, %c1024], %131 {strides = array<i32>} : memref<8x1x1536xf32, #tpu.memory_space<vmem>>, vector<1x1x128xf32>,
    %132 = arith.index_cast %c0_i32_12 : i32 to index
    %c0_32 = arith.constant 0 : index
    %c1152 = arith.constant 1152 : index
    %133 = vector.load %arg5[%132, %c0_32, %c1152] : memref<8x1x1536xf32, #tpu.memory_space<vmem>>, vector<1x1x128xf32>
    %134 = vector.shape_cast %133 : vector<1x1x128xf32> to vector<1x128xf32>
    %135 = vector.shape_cast %95 : vector<1x128xf32> to vector<1x1x128xf32>
    tpu.vector_store %arg5[%132, %c0_32, %c1152], %135 {strides = array<i32>} : memref<8x1x1536xf32, #tpu.memory_space<vmem>>, vector<1x1x128xf32>,
    %136 = arith.index_cast %c0_i32_12 : i32 to index
    %c0_33 = arith.constant 0 : index
    %c1280 = arith.constant 1280 : index
    %137 = vector.load %arg5[%136, %c0_33, %c1280] : memref<8x1x1536xf32, #tpu.memory_space<vmem>>, vector<1x1x128xf32>
    %138 = vector.shape_cast %137 : vector<1x1x128xf32> to vector<1x128xf32>
    %139 = vector.shape_cast %26 : vector<1x128xf32> to vector<1x1x128xf32>
    tpu.vector_store %arg5[%136, %c0_33, %c1280], %139 {strides = array<i32>} : memref<8x1x1536xf32, #tpu.memory_space<vmem>>, vector<1x1x128xf32>,
    %140 = arith.index_cast %c0_i32_12 : i32 to index
    %c0_34 = arith.constant 0 : index
    %c1408 = arith.constant 1408 : index
    %141 = vector.load %arg5[%140, %c0_34, %c1408] : memref<8x1x1536xf32, #tpu.memory_space<vmem>>, vector<1x1x128xf32>
    %142 = vector.shape_cast %141 : vector<1x1x128xf32> to vector<1x128xf32>
    %143 = vector.shape_cast %27 : vector<1x128xf32> to vector<1x1x128xf32>
    tpu.vector_store %arg5[%140, %c0_34, %c1408], %143 {strides = array<i32>} : memref<8x1x1536xf32, #tpu.memory_space<vmem>>, vector<1x1x128xf32>,
    %c1_i32 = arith.constant 1 : i32
    %144 = arith.index_cast %c1_i32 : i32 to index
    %c0_35 = arith.constant 0 : index
    %c0_36 = arith.constant 0 : index
    %145 = vector.load %arg2[%144, %c0_35, %c0_36] : memref<8x1x512xf32, #tpu.memory_space<vmem>>, vector<1x1x512xf32>
    %146 = vector.shape_cast %145 : vector<1x1x512xf32> to vector<1x512xf32>
    %147 = vector.extract_strided_slice %146 {offsets = [0, 0], sizes = [1, 128], strides = [1, 1]} : vector<1x512xf32> to vector<1x128xf32>
    %148 = vector.extract_strided_slice %146 {offsets = [0, 128], sizes = [1, 128], strides = [1, 1]} : vector<1x512xf32> to vector<1x128xf32>
    %149 = vector.extract_strided_slice %146 {offsets = [0, 256], sizes = [1, 128], strides = [1, 1]} : vector<1x512xf32> to vector<1x128xf32>
    %150 = vector.extract_strided_slice %146 {offsets = [0, 384], sizes = [1, 128], strides = [1, 1]} : vector<1x512xf32> to vector<1x128xf32>
    %cst_37 = arith.constant 5.000000e-01 : f32
    %151 = vector.broadcast %cst_37 : f32 to vector<1x128xf32>
    %152 = arith.cmpf ogt, %150, %151 : vector<1x128xf32>
    %153 = arith.addf %73, %148 : vector<1x128xf32>
    %154 = tpu.reciprocal %153 : vector<1x128xf32> -> vector<1x128xf32>
    %155 = arith.mulf %73, %154 : vector<1x128xf32>
    %156 = arith.mulf %95, %154 : vector<1x128xf32>
    %157 = arith.subf %147, %58 : vector<1x128xf32>
    %158 = arith.mulf %155, %157 : vector<1x128xf32>
    %159 = arith.addf %58, %158 : vector<1x128xf32>
    %160 = arith.select %152, %159, %58 : vector<1x128xi1>, vector<1x128xf32>
    %161 = arith.mulf %156, %157 : vector<1x128xf32>
    %162 = arith.addf %61, %161 : vector<1x128xf32>
    %163 = arith.select %152, %162, %61 : vector<1x128xi1>, vector<1x128xf32>
    %cst_38 = arith.constant 1.000000e+00 : f32
    %164 = vector.broadcast %cst_38 : f32 to vector<1x128xf32>
    %165 = arith.subf %164, %155 : vector<1x128xf32>
    %166 = arith.mulf %165, %73 : vector<1x128xf32>
    %167 = arith.select %152, %166, %73 : vector<1x128xi1>, vector<1x128xf32>
    %168 = arith.mulf %156, %95 : vector<1x128xf32>
    %169 = arith.subf %85, %168 : vector<1x128xf32>
    %170 = arith.select %152, %169, %85 : vector<1x128xi1>, vector<1x128xf32>
    %cst_39 = arith.constant 1.000000e+00 : f32
    %171 = vector.broadcast %cst_39 : f32 to vector<1x128xf32>
    %172 = arith.subf %171, %155 : vector<1x128xf32>
    %173 = arith.mulf %172, %95 : vector<1x128xf32>
    %174 = arith.select %152, %173, %95 : vector<1x128xi1>, vector<1x128xf32>
    %175 = arith.mulf %149, %4 : vector<1x128xf32>
    %cst_40 = arith.constant 1.000000e+00 : f32
    %176 = vector.broadcast %cst_40 : f32 to vector<1x128xf32>
    %177 = arith.subf %176, %175 : vector<1x128xf32>
    %178 = arith.mulf %149, %5 : vector<1x128xf32>
    %cst_41 = arith.constant 0.000000e+00 : f32
    %179 = vector.broadcast %cst_41 : f32 to vector<1x128xf32>
    %180 = arith.subf %179, %149 : vector<1x128xf32>
    %181 = arith.mulf %180, %6 : vector<1x128xf32>
    %182 = arith.mulf %149, %7 : vector<1x128xf32>
    %cst_42 = arith.constant 1.000000e+00 : f32
    %183 = vector.broadcast %cst_42 : f32 to vector<1x128xf32>
    %184 = arith.subf %183, %182 : vector<1x128xf32>
    %185 = arith.mulf %177, %160 : vector<1x128xf32>
    %186 = arith.mulf %178, %163 : vector<1x128xf32>
    %187 = arith.addf %185, %186 : vector<1x128xf32>
    %188 = arith.mulf %181, %160 : vector<1x128xf32>
    %189 = arith.mulf %184, %163 : vector<1x128xf32>
    %190 = arith.addf %188, %189 : vector<1x128xf32>
    %191 = arith.mulf %177, %177 : vector<1x128xf32>
    %192 = arith.mulf %191, %167 : vector<1x128xf32>
    %cst_43 = arith.constant 2.000000e+00 : f32
    %193 = vector.broadcast %cst_43 : f32 to vector<1x128xf32>
    %194 = arith.mulf %193, %177 : vector<1x128xf32>
    %195 = arith.mulf %194, %178 : vector<1x128xf32>
    %196 = arith.mulf %195, %174 : vector<1x128xf32>
    %197 = arith.addf %192, %196 : vector<1x128xf32>
    %198 = arith.mulf %178, %178 : vector<1x128xf32>
    %199 = arith.mulf %198, %170 : vector<1x128xf32>
    %200 = arith.addf %197, %199 : vector<1x128xf32>
    %201 = arith.mulf %149, %8 : vector<1x128xf32>
    %202 = arith.addf %200, %201 : vector<1x128xf32>
    %203 = arith.mulf %181, %181 : vector<1x128xf32>
    %204 = arith.mulf %203, %167 : vector<1x128xf32>
    %cst_44 = arith.constant 2.000000e+00 : f32
    %205 = vector.broadcast %cst_44 : f32 to vector<1x128xf32>
    %206 = arith.mulf %205, %181 : vector<1x128xf32>
    %207 = arith.mulf %206, %184 : vector<1x128xf32>
    %208 = arith.mulf %207, %174 : vector<1x128xf32>
    %209 = arith.addf %204, %208 : vector<1x128xf32>
    %210 = arith.mulf %184, %184 : vector<1x128xf32>
    %211 = arith.mulf %210, %170 : vector<1x128xf32>
    %212 = arith.addf %209, %211 : vector<1x128xf32>
    %213 = arith.mulf %149, %9 : vector<1x128xf32>
    %214 = arith.addf %212, %213 : vector<1x128xf32>
    %215 = arith.mulf %177, %181 : vector<1x128xf32>
    %216 = arith.mulf %215, %167 : vector<1x128xf32>
    %217 = arith.mulf %177, %184 : vector<1x128xf32>
    %218 = arith.mulf %178, %181 : vector<1x128xf32>
    %219 = arith.addf %217, %218 : vector<1x128xf32>
    %220 = arith.mulf %219, %174 : vector<1x128xf32>
    %221 = arith.addf %216, %220 : vector<1x128xf32>
    %222 = arith.mulf %178, %184 : vector<1x128xf32>
    %223 = arith.mulf %222, %170 : vector<1x128xf32>
    %224 = arith.addf %221, %223 : vector<1x128xf32>
    %225 = arith.index_cast %c1_i32 : i32 to index
    %c0_45 = arith.constant 0 : index
    %c0_46 = arith.constant 0 : index
    %226 = vector.load %arg5[%225, %c0_45, %c0_46] : memref<8x1x1536xf32, #tpu.memory_space<vmem>>, vector<1x1x128xf32>
    %227 = vector.shape_cast %226 : vector<1x1x128xf32> to vector<1x128xf32>
    %228 = vector.shape_cast %160 : vector<1x128xf32> to vector<1x1x128xf32>
    tpu.vector_store %arg5[%225, %c0_45, %c0_46], %228 {strides = array<i32>} : memref<8x1x1536xf32, #tpu.memory_space<vmem>>, vector<1x1x128xf32>,
    %229 = arith.index_cast %c1_i32 : i32 to index
    %c0_47 = arith.constant 0 : index
    %c128_48 = arith.constant 128 : index
    %230 = vector.load %arg5[%229, %c0_47, %c128_48] : memref<8x1x1536xf32, #tpu.memory_space<vmem>>, vector<1x1x128xf32>
    %231 = vector.shape_cast %230 : vector<1x1x128xf32> to vector<1x128xf32>
    %232 = vector.shape_cast %163 : vector<1x128xf32> to vector<1x1x128xf32>
    tpu.vector_store %arg5[%229, %c0_47, %c128_48], %232 {strides = array<i32>} : memref<8x1x1536xf32, #tpu.memory_space<vmem>>, vector<1x1x128xf32>,
    %233 = arith.index_cast %c1_i32 : i32 to index
    %c0_49 = arith.constant 0 : index
    %c256_50 = arith.constant 256 : index
    %234 = vector.load %arg5[%233, %c0_49, %c256_50] : memref<8x1x1536xf32, #tpu.memory_space<vmem>>, vector<1x1x128xf32>
    %235 = vector.shape_cast %234 : vector<1x1x128xf32> to vector<1x128xf32>
    %236 = vector.shape_cast %187 : vector<1x128xf32> to vector<1x1x128xf32>
    tpu.vector_store %arg5[%233, %c0_49, %c256_50], %236 {strides = array<i32>} : memref<8x1x1536xf32, #tpu.memory_space<vmem>>, vector<1x1x128xf32>,
    %237 = arith.index_cast %c1_i32 : i32 to index
    %c0_51 = arith.constant 0 : index
    %c384_52 = arith.constant 384 : index
    %238 = vector.load %arg5[%237, %c0_51, %c384_52] : memref<8x1x1536xf32, #tpu.memory_space<vmem>>, vector<1x1x128xf32>
    %239 = vector.shape_cast %238 : vector<1x1x128xf32> to vector<1x128xf32>
    %240 = vector.shape_cast %190 : vector<1x128xf32> to vector<1x1x128xf32>
    tpu.vector_store %arg5[%237, %c0_51, %c384_52], %240 {strides = array<i32>} : memref<8x1x1536xf32, #tpu.memory_space<vmem>>, vector<1x1x128xf32>,
    %241 = arith.index_cast %c1_i32 : i32 to index
    %c0_53 = arith.constant 0 : index
    %c512_54 = arith.constant 512 : index
    %242 = vector.load %arg5[%241, %c0_53, %c512_54] : memref<8x1x1536xf32, #tpu.memory_space<vmem>>, vector<1x1x128xf32>
    %243 = vector.shape_cast %242 : vector<1x1x128xf32> to vector<1x128xf32>
    %244 = vector.shape_cast %167 : vector<1x128xf32> to vector<1x1x128xf32>
    tpu.vector_store %arg5[%241, %c0_53, %c512_54], %244 {strides = array<i32>} : memref<8x1x1536xf32, #tpu.memory_space<vmem>>, vector<1x1x128xf32>,
    %245 = arith.index_cast %c1_i32 : i32 to index
    %c0_55 = arith.constant 0 : index
    %c640_56 = arith.constant 640 : index
    %246 = vector.load %arg5[%245, %c0_55, %c640_56] : memref<8x1x1536xf32, #tpu.memory_space<vmem>>, vector<1x1x128xf32>
    %247 = vector.shape_cast %246 : vector<1x1x128xf32> to vector<1x128xf32>
    %248 = vector.shape_cast %170 : vector<1x128xf32> to vector<1x1x128xf32>
    tpu.vector_store %arg5[%245, %c0_55, %c640_56], %248 {strides = array<i32>} : memref<8x1x1536xf32, #tpu.memory_space<vmem>>, vector<1x1x128xf32>,
    %249 = arith.index_cast %c1_i32 : i32 to index
    %c0_57 = arith.constant 0 : index
    %c768_58 = arith.constant 768 : index
    %250 = vector.load %arg5[%249, %c0_57, %c768_58] : memref<8x1x1536xf32, #tpu.memory_space<vmem>>, vector<1x1x128xf32>
    %251 = vector.shape_cast %250 : vector<1x1x128xf32> to vector<1x128xf32>
    %252 = vector.shape_cast %174 : vector<1x128xf32> to vector<1x1x128xf32>
    tpu.vector_store %arg5[%249, %c0_57, %c768_58], %252 {strides = array<i32>} : memref<8x1x1536xf32, #tpu.memory_space<vmem>>, vector<1x1x128xf32>,
    %253 = arith.index_cast %c1_i32 : i32 to index
    %c0_59 = arith.constant 0 : index
    %c896_60 = arith.constant 896 : index
    %254 = vector.load %arg5[%253, %c0_59, %c896_60] : memref<8x1x1536xf32, #tpu.memory_space<vmem>>, vector<1x1x128xf32>
    %255 = vector.shape_cast %254 : vector<1x1x128xf32> to vector<1x128xf32>
    %256 = vector.shape_cast %202 : vector<1x128xf32> to vector<1x1x128xf32>
    tpu.vector_store %arg5[%253, %c0_59, %c896_60], %256 {strides = array<i32>} : memref<8x1x1536xf32, #tpu.memory_space<vmem>>, vector<1x1x128xf32>,
    %257 = arith.index_cast %c1_i32 : i32 to index
    %c0_61 = arith.constant 0 : index
    %c1024_62 = arith.constant 1024 : index
    %258 = vector.load %arg5[%257, %c0_61, %c1024_62] : memref<8x1x1536xf32, #tpu.memory_space<vmem>>, vector<1x1x128xf32>
    %259 = vector.shape_cast %258 : vector<1x1x128xf32> to vector<1x128xf32>
    %260 = vector.shape_cast %214 : vector<1x128xf32> to vector<1x1x128xf32>
    tpu.vector_store %arg5[%257, %c0_61, %c1024_62], %260 {strides = array<i32>} : memref<8x1x1536xf32, #tpu.memory_space<vmem>>, vector<1x1x128xf32>,
    %261 = arith.index_cast %c1_i32 : i32 to index
    %c0_63 = arith.constant 0 : index
    %c1152_64 = arith.constant 1152 : index
    %262 = vector.load %arg5[%261, %c0_63, %c1152_64] : memref<8x1x1536xf32, #tpu.memory_space<vmem>>, vector<1x1x128xf32>
    %263 = vector.shape_cast %262 : vector<1x1x128xf32> to vector<1x128xf32>
    %264 = vector.shape_cast %224 : vector<1x128xf32> to vector<1x1x128xf32>
    tpu.vector_store %arg5[%261, %c0_63, %c1152_64], %264 {strides = array<i32>} : memref<8x1x1536xf32, #tpu.memory_space<vmem>>, vector<1x1x128xf32>,
    %265 = arith.index_cast %c1_i32 : i32 to index
    %c0_65 = arith.constant 0 : index
    %c1280_66 = arith.constant 1280 : index
    %266 = vector.load %arg5[%265, %c0_65, %c1280_66] : memref<8x1x1536xf32, #tpu.memory_space<vmem>>, vector<1x1x128xf32>
    %267 = vector.shape_cast %266 : vector<1x1x128xf32> to vector<1x128xf32>
    %268 = vector.shape_cast %155 : vector<1x128xf32> to vector<1x1x128xf32>
    tpu.vector_store %arg5[%265, %c0_65, %c1280_66], %268 {strides = array<i32>} : memref<8x1x1536xf32, #tpu.memory_space<vmem>>, vector<1x1x128xf32>,
    %269 = arith.index_cast %c1_i32 : i32 to index
    %c0_67 = arith.constant 0 : index
    %c1408_68 = arith.constant 1408 : index
    %270 = vector.load %arg5[%269, %c0_67, %c1408_68] : memref<8x1x1536xf32, #tpu.memory_space<vmem>>, vector<1x1x128xf32>
    %271 = vector.shape_cast %270 : vector<1x1x128xf32> to vector<1x128xf32>
    %272 = vector.shape_cast %156 : vector<1x128xf32> to vector<1x1x128xf32>
    tpu.vector_store %arg5[%269, %c0_67, %c1408_68], %272 {strides = array<i32>} : memref<8x1x1536xf32, #tpu.memory_space<vmem>>, vector<1x1x128xf32>,
    %c2_i32 = arith.constant 2 : i32
    %273 = arith.index_cast %c2_i32 : i32 to index
    %c0_69 = arith.constant 0 : index
    %c0_70 = arith.constant 0 : index
    %274 = vector.load %arg2[%273, %c0_69, %c0_70] : memref<8x1x512xf32, #tpu.memory_space<vmem>>, vector<1x1x512xf32>
    %275 = vector.shape_cast %274 : vector<1x1x512xf32> to vector<1x512xf32>
    %276 = vector.extract_strided_slice %275 {offsets = [0, 0], sizes = [1, 128], strides = [1, 1]} : vector<1x512xf32> to vector<1x128xf32>
    %277 = vector.extract_strided_slice %275 {offsets = [0, 128], sizes = [1, 128], strides = [1, 1]} : vector<1x512xf32> to vector<1x128xf32>
    %278 = vector.extract_strided_slice %275 {offsets = [0, 256], sizes = [1, 128], strides = [1, 1]} : vector<1x512xf32> to vector<1x128xf32>
    %279 = vector.extract_strided_slice %275 {offsets = [0, 384], sizes = [1, 128], strides = [1, 1]} : vector<1x512xf32> to vector<1x128xf32>
    %cst_71 = arith.constant 5.000000e-01 : f32
    %280 = vector.broadcast %cst_71 : f32 to vector<1x128xf32>
    %281 = arith.cmpf ogt, %279, %280 : vector<1x128xf32>
    %282 = arith.addf %202, %277 : vector<1x128xf32>
    %283 = tpu.reciprocal %282 : vector<1x128xf32> -> vector<1x128xf32>
    %284 = arith.mulf %202, %283 : vector<1x128xf32>
    %285 = arith.mulf %224, %283 : vector<1x128xf32>
    %286 = arith.subf %276, %187 : vector<1x128xf32>
    %287 = arith.mulf %284, %286 : vector<1x128xf32>
    %288 = arith.addf %187, %287 : vector<1x128xf32>
    %289 = arith.select %281, %288, %187 : vector<1x128xi1>, vector<1x128xf32>
    %290 = arith.mulf %285, %286 : vector<1x128xf32>
    %291 = arith.addf %190, %290 : vector<1x128xf32>
    %292 = arith.select %281, %291, %190 : vector<1x128xi1>, vector<1x128xf32>
    %cst_72 = arith.constant 1.000000e+00 : f32
    %293 = vector.broadcast %cst_72 : f32 to vector<1x128xf32>
    %294 = arith.subf %293, %284 : vector<1x128xf32>
    %295 = arith.mulf %294, %202 : vector<1x128xf32>
    %296 = arith.select %281, %295, %202 : vector<1x128xi1>, vector<1x128xf32>
    %297 = arith.mulf %285, %224 : vector<1x128xf32>
    %298 = arith.subf %214, %297 : vector<1x128xf32>
    %299 = arith.select %281, %298, %214 : vector<1x128xi1>, vector<1x128xf32>
    %cst_73 = arith.constant 1.000000e+00 : f32
    %300 = vector.broadcast %cst_73 : f32 to vector<1x128xf32>
    %301 = arith.subf %300, %284 : vector<1x128xf32>
    %302 = arith.mulf %301, %224 : vector<1x128xf32>
    %303 = arith.select %281, %302, %224 : vector<1x128xi1>, vector<1x128xf32>
    %304 = arith.mulf %278, %4 : vector<1x128xf32>
    %cst_74 = arith.constant 1.000000e+00 : f32
    %305 = vector.broadcast %cst_74 : f32 to vector<1x128xf32>
    %306 = arith.subf %305, %304 : vector<1x128xf32>
    %307 = arith.mulf %278, %5 : vector<1x128xf32>
    %cst_75 = arith.constant 0.000000e+00 : f32
    %308 = vector.broadcast %cst_75 : f32 to vector<1x128xf32>
    %309 = arith.subf %308, %278 : vector<1x128xf32>
    %310 = arith.mulf %309, %6 : vector<1x128xf32>
    %311 = arith.mulf %278, %7 : vector<1x128xf32>
    %cst_76 = arith.constant 1.000000e+00 : f32
    %312 = vector.broadcast %cst_76 : f32 to vector<1x128xf32>
    %313 = arith.subf %312, %311 : vector<1x128xf32>
    %314 = arith.mulf %306, %289 : vector<1x128xf32>
    %315 = arith.mulf %307, %292 : vector<1x128xf32>
    %316 = arith.addf %314, %315 : vector<1x128xf32>
    %317 = arith.mulf %310, %289 : vector<1x128xf32>
    %318 = arith.mulf %313, %292 : vector<1x128xf32>
    %319 = arith.addf %317, %318 : vector<1x128xf32>
    %320 = arith.mulf %306, %306 : vector<1x128xf32>
    %321 = arith.mulf %320, %296 : vector<1x128xf32>
    %cst_77 = arith.constant 2.000000e+00 : f32
    %322 = vector.broadcast %cst_77 : f32 to vector<1x128xf32>
    %323 = arith.mulf %322, %306 : vector<1x128xf32>
    %324 = arith.mulf %323, %307 : vector<1x128xf32>
    %325 = arith.mulf %324, %303 : vector<1x128xf32>
    %326 = arith.addf %321, %325 : vector<1x128xf32>
    %327 = arith.mulf %307, %307 : vector<1x128xf32>
    %328 = arith.mulf %327, %299 : vector<1x128xf32>
    %329 = arith.addf %326, %328 : vector<1x128xf32>
    %330 = arith.mulf %278, %8 : vector<1x128xf32>
    %331 = arith.addf %329, %330 : vector<1x128xf32>
    %332 = arith.mulf %310, %310 : vector<1x128xf32>
    %333 = arith.mulf %332, %296 : vector<1x128xf32>
    %cst_78 = arith.constant 2.000000e+00 : f32
    %334 = vector.broadcast %cst_78 : f32 to vector<1x128xf32>
    %335 = arith.mulf %334, %310 : vector<1x128xf32>
    %336 = arith.mulf %335, %313 : vector<1x128xf32>
    %337 = arith.mulf %336, %303 : vector<1x128xf32>
    %338 = arith.addf %333, %337 : vector<1x128xf32>
    %339 = arith.mulf %313, %313 : vector<1x128xf32>
    %340 = arith.mulf %339, %299 : vector<1x128xf32>
    %341 = arith.addf %338, %340 : vector<1x128xf32>
    %342 = arith.mulf %278, %9 : vector<1x128xf32>
    %343 = arith.addf %341, %342 : vector<1x128xf32>
    %344 = arith.mulf %306, %310 : vector<1x128xf32>
    %345 = arith.mulf %344, %296 : vector<1x128xf32>
    %346 = arith.mulf %306, %313 : vector<1x128xf32>
    %347 = arith.mulf %307, %310 : vector<1x128xf32>
    %348 = arith.addf %346, %347 : vector<1x128xf32>
    %349 = arith.mulf %348, %303 : vector<1x128xf32>
    %350 = arith.addf %345, %349 : vector<1x128xf32>
    %351 = arith.mulf %307, %313 : vector<1x128xf32>
    %352 = arith.mulf %351, %299 : vector<1x128xf32>
    %353 = arith.addf %350, %352 : vector<1x128xf32>
    %354 = arith.index_cast %c2_i32 : i32 to index
    %c0_79 = arith.constant 0 : index
    %c0_80 = arith.constant 0 : index
    %355 = vector.load %arg5[%354, %c0_79, %c0_80] : memref<8x1x1536xf32, #tpu.memory_space<vmem>>, vector<1x1x128xf32>
    %356 = vector.shape_cast %355 : vector<1x1x128xf32> to vector<1x128xf32>
    %357 = vector.shape_cast %289 : vector<1x128xf32> to vector<1x1x128xf32>
    tpu.vector_store %arg5[%354, %c0_79, %c0_80], %357 {strides = array<i32>} : memref<8x1x1536xf32, #tpu.memory_space<vmem>>, vector<1x1x128xf32>,
    %358 = arith.index_cast %c2_i32 : i32 to index
    %c0_81 = arith.constant 0 : index
    %c128_82 = arith.constant 128 : index
    %359 = vector.load %arg5[%358, %c0_81, %c128_82] : memref<8x1x1536xf32, #tpu.memory_space<vmem>>, vector<1x1x128xf32>
    %360 = vector.shape_cast %359 : vector<1x1x128xf32> to vector<1x128xf32>
    %361 = vector.shape_cast %292 : vector<1x128xf32> to vector<1x1x128xf32>
    tpu.vector_store %arg5[%358, %c0_81, %c128_82], %361 {strides = array<i32>} : memref<8x1x1536xf32, #tpu.memory_space<vmem>>, vector<1x1x128xf32>,
    %362 = arith.index_cast %c2_i32 : i32 to index
    %c0_83 = arith.constant 0 : index
    %c256_84 = arith.constant 256 : index
    %363 = vector.load %arg5[%362, %c0_83, %c256_84] : memref<8x1x1536xf32, #tpu.memory_space<vmem>>, vector<1x1x128xf32>
    %364 = vector.shape_cast %363 : vector<1x1x128xf32> to vector<1x128xf32>
    %365 = vector.shape_cast %316 : vector<1x128xf32> to vector<1x1x128xf32>
    tpu.vector_store %arg5[%362, %c0_83, %c256_84], %365 {strides = array<i32>} : memref<8x1x1536xf32, #tpu.memory_space<vmem>>, vector<1x1x128xf32>,
    %366 = arith.index_cast %c2_i32 : i32 to index
    %c0_85 = arith.constant 0 : index
    %c384_86 = arith.constant 384 : index
    %367 = vector.load %arg5[%366, %c0_85, %c384_86] : memref<8x1x1536xf32, #tpu.memory_space<vmem>>, vector<1x1x128xf32>
    %368 = vector.shape_cast %367 : vector<1x1x128xf32> to vector<1x128xf32>
    %369 = vector.shape_cast %319 : vector<1x128xf32> to vector<1x1x128xf32>
    tpu.vector_store %arg5[%366, %c0_85, %c384_86], %369 {strides = array<i32>} : memref<8x1x1536xf32, #tpu.memory_space<vmem>>, vector<1x1x128xf32>,
    %370 = arith.index_cast %c2_i32 : i32 to index
    %c0_87 = arith.constant 0 : index
    %c512_88 = arith.constant 512 : index
    %371 = vector.load %arg5[%370, %c0_87, %c512_88] : memref<8x1x1536xf32, #tpu.memory_space<vmem>>, vector<1x1x128xf32>
    %372 = vector.shape_cast %371 : vector<1x1x128xf32> to vector<1x128xf32>
    %373 = vector.shape_cast %296 : vector<1x128xf32> to vector<1x1x128xf32>
    tpu.vector_store %arg5[%370, %c0_87, %c512_88], %373 {strides = array<i32>} : memref<8x1x1536xf32, #tpu.memory_space<vmem>>, vector<1x1x128xf32>,
    %374 = arith.index_cast %c2_i32 : i32 to index
    %c0_89 = arith.constant 0 : index
    %c640_90 = arith.constant 640 : index
    %375 = vector.load %arg5[%374, %c0_89, %c640_90] : memref<8x1x1536xf32, #tpu.memory_space<vmem>>, vector<1x1x128xf32>
    %376 = vector.shape_cast %375 : vector<1x1x128xf32> to vector<1x128xf32>
    %377 = vector.shape_cast %299 : vector<1x128xf32> to vector<1x1x128xf32>
    tpu.vector_store %arg5[%374, %c0_89, %c640_90], %377 {strides = array<i32>} : memref<8x1x1536xf32, #tpu.memory_space<vmem>>, vector<1x1x128xf32>,
    %378 = arith.index_cast %c2_i32 : i32 to index
    %c0_91 = arith.constant 0 : index
    %c768_92 = arith.constant 768 : index
    %379 = vector.load %arg5[%378, %c0_91, %c768_92] : memref<8x1x1536xf32, #tpu.memory_space<vmem>>, vector<1x1x128xf32>
    %380 = vector.shape_cast %379 : vector<1x1x128xf32> to vector<1x128xf32>
    %381 = vector.shape_cast %303 : vector<1x128xf32> to vector<1x1x128xf32>
    tpu.vector_store %arg5[%378, %c0_91, %c768_92], %381 {strides = array<i32>} : memref<8x1x1536xf32, #tpu.memory_space<vmem>>, vector<1x1x128xf32>,
    %382 = arith.index_cast %c2_i32 : i32 to index
    %c0_93 = arith.constant 0 : index
    %c896_94 = arith.constant 896 : index
    %383 = vector.load %arg5[%382, %c0_93, %c896_94] : memref<8x1x1536xf32, #tpu.memory_space<vmem>>, vector<1x1x128xf32>
    %384 = vector.shape_cast %383 : vector<1x1x128xf32> to vector<1x128xf32>
    %385 = vector.shape_cast %331 : vector<1x128xf32> to vector<1x1x128xf32>
    tpu.vector_store %arg5[%382, %c0_93, %c896_94], %385 {strides = array<i32>} : memref<8x1x1536xf32, #tpu.memory_space<vmem>>, vector<1x1x128xf32>,
    %386 = arith.index_cast %c2_i32 : i32 to index
    %c0_95 = arith.constant 0 : index
    %c1024_96 = arith.constant 1024 : index
    %387 = vector.load %arg5[%386, %c0_95, %c1024_96] : memref<8x1x1536xf32, #tpu.memory_space<vmem>>, vector<1x1x128xf32>
    %388 = vector.shape_cast %387 : vector<1x1x128xf32> to vector<1x128xf32>
    %389 = vector.shape_cast %343 : vector<1x128xf32> to vector<1x1x128xf32>
    tpu.vector_store %arg5[%386, %c0_95, %c1024_96], %389 {strides = array<i32>} : memref<8x1x1536xf32, #tpu.memory_space<vmem>>, vector<1x1x128xf32>,
    %390 = arith.index_cast %c2_i32 : i32 to index
    %c0_97 = arith.constant 0 : index
    %c1152_98 = arith.constant 1152 : index
    %391 = vector.load %arg5[%390, %c0_97, %c1152_98] : memref<8x1x1536xf32, #tpu.memory_space<vmem>>, vector<1x1x128xf32>
    %392 = vector.shape_cast %391 : vector<1x1x128xf32> to vector<1x128xf32>
    %393 = vector.shape_cast %353 : vector<1x128xf32> to vector<1x1x128xf32>
    tpu.vector_store %arg5[%390, %c0_97, %c1152_98], %393 {strides = array<i32>} : memref<8x1x1536xf32, #tpu.memory_space<vmem>>, vector<1x1x128xf32>,
    %394 = arith.index_cast %c2_i32 : i32 to index
    %c0_99 = arith.constant 0 : index
    %c1280_100 = arith.constant 1280 : index
    %395 = vector.load %arg5[%394, %c0_99, %c1280_100] : memref<8x1x1536xf32, #tpu.memory_space<vmem>>, vector<1x1x128xf32>
    %396 = vector.shape_cast %395 : vector<1x1x128xf32> to vector<1x128xf32>
    %397 = vector.shape_cast %284 : vector<1x128xf32> to vector<1x1x128xf32>
    tpu.vector_store %arg5[%394, %c0_99, %c1280_100], %397 {strides = array<i32>} : memref<8x1x1536xf32, #tpu.memory_space<vmem>>, vector<1x1x128xf32>,
    %398 = arith.index_cast %c2_i32 : i32 to index
    %c0_101 = arith.constant 0 : index
    %c1408_102 = arith.constant 1408 : index
    %399 = vector.load %arg5[%398, %c0_101, %c1408_102] : memref<8x1x1536xf32, #tpu.memory_space<vmem>>, vector<1x1x128xf32>
    %400 = vector.shape_cast %399 : vector<1x1x128xf32> to vector<1x128xf32>
    %401 = vector.shape_cast %285 : vector<1x128xf32> to vector<1x1x128xf32>
    tpu.vector_store %arg5[%398, %c0_101, %c1408_102], %401 {strides = array<i32>} : memref<8x1x1536xf32, #tpu.memory_space<vmem>>, vector<1x1x128xf32>,
    %c3_i32 = arith.constant 3 : i32
    %402 = arith.index_cast %c3_i32 : i32 to index
    %c0_103 = arith.constant 0 : index
    %c0_104 = arith.constant 0 : index
    %403 = vector.load %arg2[%402, %c0_103, %c0_104] : memref<8x1x512xf32, #tpu.memory_space<vmem>>, vector<1x1x512xf32>
    %404 = vector.shape_cast %403 : vector<1x1x512xf32> to vector<1x512xf32>
    %405 = vector.extract_strided_slice %404 {offsets = [0, 0], sizes = [1, 128], strides = [1, 1]} : vector<1x512xf32> to vector<1x128xf32>
    %406 = vector.extract_strided_slice %404 {offsets = [0, 128], sizes = [1, 128], strides = [1, 1]} : vector<1x512xf32> to vector<1x128xf32>
    %407 = vector.extract_strided_slice %404 {offsets = [0, 256], sizes = [1, 128], strides = [1, 1]} : vector<1x512xf32> to vector<1x128xf32>
    %408 = vector.extract_strided_slice %404 {offsets = [0, 384], sizes = [1, 128], strides = [1, 1]} : vector<1x512xf32> to vector<1x128xf32>
    %cst_105 = arith.constant 5.000000e-01 : f32
    %409 = vector.broadcast %cst_105 : f32 to vector<1x128xf32>
    %410 = arith.cmpf ogt, %408, %409 : vector<1x128xf32>
    %411 = arith.addf %331, %406 : vector<1x128xf32>
    %412 = tpu.reciprocal %411 : vector<1x128xf32> -> vector<1x128xf32>
    %413 = arith.mulf %331, %412 : vector<1x128xf32>
    %414 = arith.mulf %353, %412 : vector<1x128xf32>
    %415 = arith.subf %405, %316 : vector<1x128xf32>
    %416 = arith.mulf %413, %415 : vector<1x128xf32>
    %417 = arith.addf %316, %416 : vector<1x128xf32>
    %418 = arith.select %410, %417, %316 : vector<1x128xi1>, vector<1x128xf32>
    %419 = arith.mulf %414, %415 : vector<1x128xf32>
    %420 = arith.addf %319, %419 : vector<1x128xf32>
    %421 = arith.select %410, %420, %319 : vector<1x128xi1>, vector<1x128xf32>
    %cst_106 = arith.constant 1.000000e+00 : f32
    %422 = vector.broadcast %cst_106 : f32 to vector<1x128xf32>
    %423 = arith.subf %422, %413 : vector<1x128xf32>
    %424 = arith.mulf %423, %331 : vector<1x128xf32>
    %425 = arith.select %410, %424, %331 : vector<1x128xi1>, vector<1x128xf32>
    %426 = arith.mulf %414, %353 : vector<1x128xf32>
    %427 = arith.subf %343, %426 : vector<1x128xf32>
    %428 = arith.select %410, %427, %343 : vector<1x128xi1>, vector<1x128xf32>
    %cst_107 = arith.constant 1.000000e+00 : f32
    %429 = vector.broadcast %cst_107 : f32 to vector<1x128xf32>
    %430 = arith.subf %429, %413 : vector<1x128xf32>
    %431 = arith.mulf %430, %353 : vector<1x128xf32>
    %432 = arith.select %410, %431, %353 : vector<1x128xi1>, vector<1x128xf32>
    %433 = arith.mulf %407, %4 : vector<1x128xf32>
    %cst_108 = arith.constant 1.000000e+00 : f32
    %434 = vector.broadcast %cst_108 : f32 to vector<1x128xf32>
    %435 = arith.subf %434, %433 : vector<1x128xf32>
    %436 = arith.mulf %407, %5 : vector<1x128xf32>
    %cst_109 = arith.constant 0.000000e+00 : f32
    %437 = vector.broadcast %cst_109 : f32 to vector<1x128xf32>
    %438 = arith.subf %437, %407 : vector<1x128xf32>
    %439 = arith.mulf %438, %6 : vector<1x128xf32>
    %440 = arith.mulf %407, %7 : vector<1x128xf32>
    %cst_110 = arith.constant 1.000000e+00 : f32
    %441 = vector.broadcast %cst_110 : f32 to vector<1x128xf32>
    %442 = arith.subf %441, %440 : vector<1x128xf32>
    %443 = arith.mulf %435, %418 : vector<1x128xf32>
    %444 = arith.mulf %436, %421 : vector<1x128xf32>
    %445 = arith.addf %443, %444 : vector<1x128xf32>
    %446 = arith.mulf %439, %418 : vector<1x128xf32>
    %447 = arith.mulf %442, %421 : vector<1x128xf32>
    %448 = arith.addf %446, %447 : vector<1x128xf32>
    %449 = arith.mulf %435, %435 : vector<1x128xf32>
    %450 = arith.mulf %449, %425 : vector<1x128xf32>
    %cst_111 = arith.constant 2.000000e+00 : f32
    %451 = vector.broadcast %cst_111 : f32 to vector<1x128xf32>
    %452 = arith.mulf %451, %435 : vector<1x128xf32>
    %453 = arith.mulf %452, %436 : vector<1x128xf32>
    %454 = arith.mulf %453, %432 : vector<1x128xf32>
    %455 = arith.addf %450, %454 : vector<1x128xf32>
    %456 = arith.mulf %436, %436 : vector<1x128xf32>
    %457 = arith.mulf %456, %428 : vector<1x128xf32>
    %458 = arith.addf %455, %457 : vector<1x128xf32>
    %459 = arith.mulf %407, %8 : vector<1x128xf32>
    %460 = arith.addf %458, %459 : vector<1x128xf32>
    %461 = arith.mulf %439, %439 : vector<1x128xf32>
    %462 = arith.mulf %461, %425 : vector<1x128xf32>
    %cst_112 = arith.constant 2.000000e+00 : f32
    %463 = vector.broadcast %cst_112 : f32 to vector<1x128xf32>
    %464 = arith.mulf %463, %439 : vector<1x128xf32>
    %465 = arith.mulf %464, %442 : vector<1x128xf32>
    %466 = arith.mulf %465, %432 : vector<1x128xf32>
    %467 = arith.addf %462, %466 : vector<1x128xf32>
    %468 = arith.mulf %442, %442 : vector<1x128xf32>
    %469 = arith.mulf %468, %428 : vector<1x128xf32>
    %470 = arith.addf %467, %469 : vector<1x128xf32>
    %471 = arith.mulf %407, %9 : vector<1x128xf32>
    %472 = arith.addf %470, %471 : vector<1x128xf32>
    %473 = arith.mulf %435, %439 : vector<1x128xf32>
    %474 = arith.mulf %473, %425 : vector<1x128xf32>
    %475 = arith.mulf %435, %442 : vector<1x128xf32>
    %476 = arith.mulf %436, %439 : vector<1x128xf32>
    %477 = arith.addf %475, %476 : vector<1x128xf32>
    %478 = arith.mulf %477, %432 : vector<1x128xf32>
    %479 = arith.addf %474, %478 : vector<1x128xf32>
    %480 = arith.mulf %436, %442 : vector<1x128xf32>
    %481 = arith.mulf %480, %428 : vector<1x128xf32>
    %482 = arith.addf %479, %481 : vector<1x128xf32>
    %483 = arith.index_cast %c3_i32 : i32 to index
    %c0_113 = arith.constant 0 : index
    %c0_114 = arith.constant 0 : index
    %484 = vector.load %arg5[%483, %c0_113, %c0_114] : memref<8x1x1536xf32, #tpu.memory_space<vmem>>, vector<1x1x128xf32>
    %485 = vector.shape_cast %484 : vector<1x1x128xf32> to vector<1x128xf32>
    %486 = vector.shape_cast %418 : vector<1x128xf32> to vector<1x1x128xf32>
    tpu.vector_store %arg5[%483, %c0_113, %c0_114], %486 {strides = array<i32>} : memref<8x1x1536xf32, #tpu.memory_space<vmem>>, vector<1x1x128xf32>,
    %487 = arith.index_cast %c3_i32 : i32 to index
    %c0_115 = arith.constant 0 : index
    %c128_116 = arith.constant 128 : index
    %488 = vector.load %arg5[%487, %c0_115, %c128_116] : memref<8x1x1536xf32, #tpu.memory_space<vmem>>, vector<1x1x128xf32>
    %489 = vector.shape_cast %488 : vector<1x1x128xf32> to vector<1x128xf32>
    %490 = vector.shape_cast %421 : vector<1x128xf32> to vector<1x1x128xf32>
    tpu.vector_store %arg5[%487, %c0_115, %c128_116], %490 {strides = array<i32>} : memref<8x1x1536xf32, #tpu.memory_space<vmem>>, vector<1x1x128xf32>,
    %491 = arith.index_cast %c3_i32 : i32 to index
    %c0_117 = arith.constant 0 : index
    %c256_118 = arith.constant 256 : index
    %492 = vector.load %arg5[%491, %c0_117, %c256_118] : memref<8x1x1536xf32, #tpu.memory_space<vmem>>, vector<1x1x128xf32>
    %493 = vector.shape_cast %492 : vector<1x1x128xf32> to vector<1x128xf32>
    %494 = vector.shape_cast %445 : vector<1x128xf32> to vector<1x1x128xf32>
    tpu.vector_store %arg5[%491, %c0_117, %c256_118], %494 {strides = array<i32>} : memref<8x1x1536xf32, #tpu.memory_space<vmem>>, vector<1x1x128xf32>,
    %495 = arith.index_cast %c3_i32 : i32 to index
    %c0_119 = arith.constant 0 : index
    %c384_120 = arith.constant 384 : index
    %496 = vector.load %arg5[%495, %c0_119, %c384_120] : memref<8x1x1536xf32, #tpu.memory_space<vmem>>, vector<1x1x128xf32>
    %497 = vector.shape_cast %496 : vector<1x1x128xf32> to vector<1x128xf32>
    %498 = vector.shape_cast %448 : vector<1x128xf32> to vector<1x1x128xf32>
    tpu.vector_store %arg5[%495, %c0_119, %c384_120], %498 {strides = array<i32>} : memref<8x1x1536xf32, #tpu.memory_space<vmem>>, vector<1x1x128xf32>,
    %499 = arith.index_cast %c3_i32 : i32 to index
    %c0_121 = arith.constant 0 : index
    %c512_122 = arith.constant 512 : index
    %500 = vector.load %arg5[%499, %c0_121, %c512_122] : memref<8x1x1536xf32, #tpu.memory_space<vmem>>, vector<1x1x128xf32>
    %501 = vector.shape_cast %500 : vector<1x1x128xf32> to vector<1x128xf32>
    %502 = vector.shape_cast %425 : vector<1x128xf32> to vector<1x1x128xf32>
    tpu.vector_store %arg5[%499, %c0_121, %c512_122], %502 {strides = array<i32>} : memref<8x1x1536xf32, #tpu.memory_space<vmem>>, vector<1x1x128xf32>,
    %503 = arith.index_cast %c3_i32 : i32 to index
    %c0_123 = arith.constant 0 : index
    %c640_124 = arith.constant 640 : index
    %504 = vector.load %arg5[%503, %c0_123, %c640_124] : memref<8x1x1536xf32, #tpu.memory_space<vmem>>, vector<1x1x128xf32>
    %505 = vector.shape_cast %504 : vector<1x1x128xf32> to vector<1x128xf32>
    %506 = vector.shape_cast %428 : vector<1x128xf32> to vector<1x1x128xf32>
    tpu.vector_store %arg5[%503, %c0_123, %c640_124], %506 {strides = array<i32>} : memref<8x1x1536xf32, #tpu.memory_space<vmem>>, vector<1x1x128xf32>,
    %507 = arith.index_cast %c3_i32 : i32 to index
    %c0_125 = arith.constant 0 : index
    %c768_126 = arith.constant 768 : index
    %508 = vector.load %arg5[%507, %c0_125, %c768_126] : memref<8x1x1536xf32, #tpu.memory_space<vmem>>, vector<1x1x128xf32>
    %509 = vector.shape_cast %508 : vector<1x1x128xf32> to vector<1x128xf32>
    %510 = vector.shape_cast %432 : vector<1x128xf32> to vector<1x1x128xf32>
    tpu.vector_store %arg5[%507, %c0_125, %c768_126], %510 {strides = array<i32>} : memref<8x1x1536xf32, #tpu.memory_space<vmem>>, vector<1x1x128xf32>,
    %511 = arith.index_cast %c3_i32 : i32 to index
    %c0_127 = arith.constant 0 : index
    %c896_128 = arith.constant 896 : index
    %512 = vector.load %arg5[%511, %c0_127, %c896_128] : memref<8x1x1536xf32, #tpu.memory_space<vmem>>, vector<1x1x128xf32>
    %513 = vector.shape_cast %512 : vector<1x1x128xf32> to vector<1x128xf32>
    %514 = vector.shape_cast %460 : vector<1x128xf32> to vector<1x1x128xf32>
    tpu.vector_store %arg5[%511, %c0_127, %c896_128], %514 {strides = array<i32>} : memref<8x1x1536xf32, #tpu.memory_space<vmem>>, vector<1x1x128xf32>,
    %515 = arith.index_cast %c3_i32 : i32 to index
    %c0_129 = arith.constant 0 : index
    %c1024_130 = arith.constant 1024 : index
    %516 = vector.load %arg5[%515, %c0_129, %c1024_130] : memref<8x1x1536xf32, #tpu.memory_space<vmem>>, vector<1x1x128xf32>
    %517 = vector.shape_cast %516 : vector<1x1x128xf32> to vector<1x128xf32>
    %518 = vector.shape_cast %472 : vector<1x128xf32> to vector<1x1x128xf32>
    tpu.vector_store %arg5[%515, %c0_129, %c1024_130], %518 {strides = array<i32>} : memref<8x1x1536xf32, #tpu.memory_space<vmem>>, vector<1x1x128xf32>,
    %519 = arith.index_cast %c3_i32 : i32 to index
    %c0_131 = arith.constant 0 : index
    %c1152_132 = arith.constant 1152 : index
    %520 = vector.load %arg5[%519, %c0_131, %c1152_132] : memref<8x1x1536xf32, #tpu.memory_space<vmem>>, vector<1x1x128xf32>
    %521 = vector.shape_cast %520 : vector<1x1x128xf32> to vector<1x128xf32>
    %522 = vector.shape_cast %482 : vector<1x128xf32> to vector<1x1x128xf32>
    tpu.vector_store %arg5[%519, %c0_131, %c1152_132], %522 {strides = array<i32>} : memref<8x1x1536xf32, #tpu.memory_space<vmem>>, vector<1x1x128xf32>,
    %523 = arith.index_cast %c3_i32 : i32 to index
    %c0_133 = arith.constant 0 : index
    %c1280_134 = arith.constant 1280 : index
    %524 = vector.load %arg5[%523, %c0_133, %c1280_134] : memref<8x1x1536xf32, #tpu.memory_space<vmem>>, vector<1x1x128xf32>
    %525 = vector.shape_cast %524 : vector<1x1x128xf32> to vector<1x128xf32>
    %526 = vector.shape_cast %413 : vector<1x128xf32> to vector<1x1x128xf32>
    tpu.vector_store %arg5[%523, %c0_133, %c1280_134], %526 {strides = array<i32>} : memref<8x1x1536xf32, #tpu.memory_space<vmem>>, vector<1x1x128xf32>,
    %527 = arith.index_cast %c3_i32 : i32 to index
    %c0_135 = arith.constant 0 : index
    %c1408_136 = arith.constant 1408 : index
    %528 = vector.load %arg5[%527, %c0_135, %c1408_136] : memref<8x1x1536xf32, #tpu.memory_space<vmem>>, vector<1x1x128xf32>
    %529 = vector.shape_cast %528 : vector<1x1x128xf32> to vector<1x128xf32>
    %530 = vector.shape_cast %414 : vector<1x128xf32> to vector<1x1x128xf32>
    tpu.vector_store %arg5[%527, %c0_135, %c1408_136], %530 {strides = array<i32>} : memref<8x1x1536xf32, #tpu.memory_space<vmem>>, vector<1x1x128xf32>,
    %c4_i32 = arith.constant 4 : i32
    %531 = arith.index_cast %c4_i32 : i32 to index
    %c0_137 = arith.constant 0 : index
    %c0_138 = arith.constant 0 : index
    %532 = vector.load %arg2[%531, %c0_137, %c0_138] : memref<8x1x512xf32, #tpu.memory_space<vmem>>, vector<1x1x512xf32>
    %533 = vector.shape_cast %532 : vector<1x1x512xf32> to vector<1x512xf32>
    %534 = vector.extract_strided_slice %533 {offsets = [0, 0], sizes = [1, 128], strides = [1, 1]} : vector<1x512xf32> to vector<1x128xf32>
    %535 = vector.extract_strided_slice %533 {offsets = [0, 128], sizes = [1, 128], strides = [1, 1]} : vector<1x512xf32> to vector<1x128xf32>
    %536 = vector.extract_strided_slice %533 {offsets = [0, 256], sizes = [1, 128], strides = [1, 1]} : vector<1x512xf32> to vector<1x128xf32>
    %537 = vector.extract_strided_slice %533 {offsets = [0, 384], sizes = [1, 128], strides = [1, 1]} : vector<1x512xf32> to vector<1x128xf32>
    %cst_139 = arith.constant 5.000000e-01 : f32
    %538 = vector.broadcast %cst_139 : f32 to vector<1x128xf32>
    %539 = arith.cmpf ogt, %537, %538 : vector<1x128xf32>
    %540 = arith.addf %460, %535 : vector<1x128xf32>
    %541 = tpu.reciprocal %540 : vector<1x128xf32> -> vector<1x128xf32>
    %542 = arith.mulf %460, %541 : vector<1x128xf32>
    %543 = arith.mulf %482, %541 : vector<1x128xf32>
    %544 = arith.subf %534, %445 : vector<1x128xf32>
    %545 = arith.mulf %542, %544 : vector<1x128xf32>
    %546 = arith.addf %445, %545 : vector<1x128xf32>
    %547 = arith.select %539, %546, %445 : vector<1x128xi1>, vector<1x128xf32>
    %548 = arith.mulf %543, %544 : vector<1x128xf32>
    %549 = arith.addf %448, %548 : vector<1x128xf32>
    %550 = arith.select %539, %549, %448 : vector<1x128xi1>, vector<1x128xf32>
    %cst_140 = arith.constant 1.000000e+00 : f32
    %551 = vector.broadcast %cst_140 : f32 to vector<1x128xf32>
    %552 = arith.subf %551, %542 : vector<1x128xf32>
    %553 = arith.mulf %552, %460 : vector<1x128xf32>
    %554 = arith.select %539, %553, %460 : vector<1x128xi1>, vector<1x128xf32>
    %555 = arith.mulf %543, %482 : vector<1x128xf32>
    %556 = arith.subf %472, %555 : vector<1x128xf32>
    %557 = arith.select %539, %556, %472 : vector<1x128xi1>, vector<1x128xf32>
    %cst_141 = arith.constant 1.000000e+00 : f32
    %558 = vector.broadcast %cst_141 : f32 to vector<1x128xf32>
    %559 = arith.subf %558, %542 : vector<1x128xf32>
    %560 = arith.mulf %559, %482 : vector<1x128xf32>
    %561 = arith.select %539, %560, %482 : vector<1x128xi1>, vector<1x128xf32>
    %562 = arith.mulf %536, %4 : vector<1x128xf32>
    %cst_142 = arith.constant 1.000000e+00 : f32
    %563 = vector.broadcast %cst_142 : f32 to vector<1x128xf32>
    %564 = arith.subf %563, %562 : vector<1x128xf32>
    %565 = arith.mulf %536, %5 : vector<1x128xf32>
    %cst_143 = arith.constant 0.000000e+00 : f32
    %566 = vector.broadcast %cst_143 : f32 to vector<1x128xf32>
    %567 = arith.subf %566, %536 : vector<1x128xf32>
    %568 = arith.mulf %567, %6 : vector<1x128xf32>
    %569 = arith.mulf %536, %7 : vector<1x128xf32>
    %cst_144 = arith.constant 1.000000e+00 : f32
    %570 = vector.broadcast %cst_144 : f32 to vector<1x128xf32>
    %571 = arith.subf %570, %569 : vector<1x128xf32>
    %572 = arith.mulf %564, %547 : vector<1x128xf32>
    %573 = arith.mulf %565, %550 : vector<1x128xf32>
    %574 = arith.addf %572, %573 : vector<1x128xf32>
    %575 = arith.mulf %568, %547 : vector<1x128xf32>
    %576 = arith.mulf %571, %550 : vector<1x128xf32>
    %577 = arith.addf %575, %576 : vector<1x128xf32>
    %578 = arith.mulf %564, %564 : vector<1x128xf32>
    %579 = arith.mulf %578, %554 : vector<1x128xf32>
    %cst_145 = arith.constant 2.000000e+00 : f32
    %580 = vector.broadcast %cst_145 : f32 to vector<1x128xf32>
    %581 = arith.mulf %580, %564 : vector<1x128xf32>
    %582 = arith.mulf %581, %565 : vector<1x128xf32>
    %583 = arith.mulf %582, %561 : vector<1x128xf32>
    %584 = arith.addf %579, %583 : vector<1x128xf32>
    %585 = arith.mulf %565, %565 : vector<1x128xf32>
    %586 = arith.mulf %585, %557 : vector<1x128xf32>
    %587 = arith.addf %584, %586 : vector<1x128xf32>
    %588 = arith.mulf %536, %8 : vector<1x128xf32>
    %589 = arith.addf %587, %588 : vector<1x128xf32>
    %590 = arith.mulf %568, %568 : vector<1x128xf32>
    %591 = arith.mulf %590, %554 : vector<1x128xf32>
    %cst_146 = arith.constant 2.000000e+00 : f32
    %592 = vector.broadcast %cst_146 : f32 to vector<1x128xf32>
    %593 = arith.mulf %592, %568 : vector<1x128xf32>
    %594 = arith.mulf %593, %571 : vector<1x128xf32>
    %595 = arith.mulf %594, %561 : vector<1x128xf32>
    %596 = arith.addf %591, %595 : vector<1x128xf32>
    %597 = arith.mulf %571, %571 : vector<1x128xf32>
    %598 = arith.mulf %597, %557 : vector<1x128xf32>
    %599 = arith.addf %596, %598 : vector<1x128xf32>
    %600 = arith.mulf %536, %9 : vector<1x128xf32>
    %601 = arith.addf %599, %600 : vector<1x128xf32>
    %602 = arith.mulf %564, %568 : vector<1x128xf32>
    %603 = arith.mulf %602, %554 : vector<1x128xf32>
    %604 = arith.mulf %564, %571 : vector<1x128xf32>
    %605 = arith.mulf %565, %568 : vector<1x128xf32>
    %606 = arith.addf %604, %605 : vector<1x128xf32>
    %607 = arith.mulf %606, %561 : vector<1x128xf32>
    %608 = arith.addf %603, %607 : vector<1x128xf32>
    %609 = arith.mulf %565, %571 : vector<1x128xf32>
    %610 = arith.mulf %609, %557 : vector<1x128xf32>
    %611 = arith.addf %608, %610 : vector<1x128xf32>
    %612 = arith.index_cast %c4_i32 : i32 to index
    %c0_147 = arith.constant 0 : index
    %c0_148 = arith.constant 0 : index
    %613 = vector.load %arg5[%612, %c0_147, %c0_148] : memref<8x1x1536xf32, #tpu.memory_space<vmem>>, vector<1x1x128xf32>
    %614 = vector.shape_cast %613 : vector<1x1x128xf32> to vector<1x128xf32>
    %615 = vector.shape_cast %547 : vector<1x128xf32> to vector<1x1x128xf32>
    tpu.vector_store %arg5[%612, %c0_147, %c0_148], %615 {strides = array<i32>} : memref<8x1x1536xf32, #tpu.memory_space<vmem>>, vector<1x1x128xf32>,
    %616 = arith.index_cast %c4_i32 : i32 to index
    %c0_149 = arith.constant 0 : index
    %c128_150 = arith.constant 128 : index
    %617 = vector.load %arg5[%616, %c0_149, %c128_150] : memref<8x1x1536xf32, #tpu.memory_space<vmem>>, vector<1x1x128xf32>
    %618 = vector.shape_cast %617 : vector<1x1x128xf32> to vector<1x128xf32>
    %619 = vector.shape_cast %550 : vector<1x128xf32> to vector<1x1x128xf32>
    tpu.vector_store %arg5[%616, %c0_149, %c128_150], %619 {strides = array<i32>} : memref<8x1x1536xf32, #tpu.memory_space<vmem>>, vector<1x1x128xf32>,
    %620 = arith.index_cast %c4_i32 : i32 to index
    %c0_151 = arith.constant 0 : index
    %c256_152 = arith.constant 256 : index
    %621 = vector.load %arg5[%620, %c0_151, %c256_152] : memref<8x1x1536xf32, #tpu.memory_space<vmem>>, vector<1x1x128xf32>
    %622 = vector.shape_cast %621 : vector<1x1x128xf32> to vector<1x128xf32>
    %623 = vector.shape_cast %574 : vector<1x128xf32> to vector<1x1x128xf32>
    tpu.vector_store %arg5[%620, %c0_151, %c256_152], %623 {strides = array<i32>} : memref<8x1x1536xf32, #tpu.memory_space<vmem>>, vector<1x1x128xf32>,
    %624 = arith.index_cast %c4_i32 : i32 to index
    %c0_153 = arith.constant 0 : index
    %c384_154 = arith.constant 384 : index
    %625 = vector.load %arg5[%624, %c0_153, %c384_154] : memref<8x1x1536xf32, #tpu.memory_space<vmem>>, vector<1x1x128xf32>
    %626 = vector.shape_cast %625 : vector<1x1x128xf32> to vector<1x128xf32>
    %627 = vector.shape_cast %577 : vector<1x128xf32> to vector<1x1x128xf32>
    tpu.vector_store %arg5[%624, %c0_153, %c384_154], %627 {strides = array<i32>} : memref<8x1x1536xf32, #tpu.memory_space<vmem>>, vector<1x1x128xf32>,
    %628 = arith.index_cast %c4_i32 : i32 to index
    %c0_155 = arith.constant 0 : index
    %c512_156 = arith.constant 512 : index
    %629 = vector.load %arg5[%628, %c0_155, %c512_156] : memref<8x1x1536xf32, #tpu.memory_space<vmem>>, vector<1x1x128xf32>
    %630 = vector.shape_cast %629 : vector<1x1x128xf32> to vector<1x128xf32>
    %631 = vector.shape_cast %554 : vector<1x128xf32> to vector<1x1x128xf32>
    tpu.vector_store %arg5[%628, %c0_155, %c512_156], %631 {strides = array<i32>} : memref<8x1x1536xf32, #tpu.memory_space<vmem>>, vector<1x1x128xf32>,
    %632 = arith.index_cast %c4_i32 : i32 to index
    %c0_157 = arith.constant 0 : index
    %c640_158 = arith.constant 640 : index
    %633 = vector.load %arg5[%632, %c0_157, %c640_158] : memref<8x1x1536xf32, #tpu.memory_space<vmem>>, vector<1x1x128xf32>
    %634 = vector.shape_cast %633 : vector<1x1x128xf32> to vector<1x128xf32>
    %635 = vector.shape_cast %557 : vector<1x128xf32> to vector<1x1x128xf32>
    tpu.vector_store %arg5[%632, %c0_157, %c640_158], %635 {strides = array<i32>} : memref<8x1x1536xf32, #tpu.memory_space<vmem>>, vector<1x1x128xf32>,
    %636 = arith.index_cast %c4_i32 : i32 to index
    %c0_159 = arith.constant 0 : index
    %c768_160 = arith.constant 768 : index
    %637 = vector.load %arg5[%636, %c0_159, %c768_160] : memref<8x1x1536xf32, #tpu.memory_space<vmem>>, vector<1x1x128xf32>
    %638 = vector.shape_cast %637 : vector<1x1x128xf32> to vector<1x128xf32>
    %639 = vector.shape_cast %561 : vector<1x128xf32> to vector<1x1x128xf32>
    tpu.vector_store %arg5[%636, %c0_159, %c768_160], %639 {strides = array<i32>} : memref<8x1x1536xf32, #tpu.memory_space<vmem>>, vector<1x1x128xf32>,
    %640 = arith.index_cast %c4_i32 : i32 to index
    %c0_161 = arith.constant 0 : index
    %c896_162 = arith.constant 896 : index
    %641 = vector.load %arg5[%640, %c0_161, %c896_162] : memref<8x1x1536xf32, #tpu.memory_space<vmem>>, vector<1x1x128xf32>
    %642 = vector.shape_cast %641 : vector<1x1x128xf32> to vector<1x128xf32>
    %643 = vector.shape_cast %589 : vector<1x128xf32> to vector<1x1x128xf32>
    tpu.vector_store %arg5[%640, %c0_161, %c896_162], %643 {strides = array<i32>} : memref<8x1x1536xf32, #tpu.memory_space<vmem>>, vector<1x1x128xf32>,
    %644 = arith.index_cast %c4_i32 : i32 to index
    %c0_163 = arith.constant 0 : index
    %c1024_164 = arith.constant 1024 : index
    %645 = vector.load %arg5[%644, %c0_163, %c1024_164] : memref<8x1x1536xf32, #tpu.memory_space<vmem>>, vector<1x1x128xf32>
    %646 = vector.shape_cast %645 : vector<1x1x128xf32> to vector<1x128xf32>
    %647 = vector.shape_cast %601 : vector<1x128xf32> to vector<1x1x128xf32>
    tpu.vector_store %arg5[%644, %c0_163, %c1024_164], %647 {strides = array<i32>} : memref<8x1x1536xf32, #tpu.memory_space<vmem>>, vector<1x1x128xf32>,
    %648 = arith.index_cast %c4_i32 : i32 to index
    %c0_165 = arith.constant 0 : index
    %c1152_166 = arith.constant 1152 : index
    %649 = vector.load %arg5[%648, %c0_165, %c1152_166] : memref<8x1x1536xf32, #tpu.memory_space<vmem>>, vector<1x1x128xf32>
    %650 = vector.shape_cast %649 : vector<1x1x128xf32> to vector<1x128xf32>
    %651 = vector.shape_cast %611 : vector<1x128xf32> to vector<1x1x128xf32>
    tpu.vector_store %arg5[%648, %c0_165, %c1152_166], %651 {strides = array<i32>} : memref<8x1x1536xf32, #tpu.memory_space<vmem>>, vector<1x1x128xf32>,
    %652 = arith.index_cast %c4_i32 : i32 to index
    %c0_167 = arith.constant 0 : index
    %c1280_168 = arith.constant 1280 : index
    %653 = vector.load %arg5[%652, %c0_167, %c1280_168] : memref<8x1x1536xf32, #tpu.memory_space<vmem>>, vector<1x1x128xf32>
    %654 = vector.shape_cast %653 : vector<1x1x128xf32> to vector<1x128xf32>
    %655 = vector.shape_cast %542 : vector<1x128xf32> to vector<1x1x128xf32>
    tpu.vector_store %arg5[%652, %c0_167, %c1280_168], %655 {strides = array<i32>} : memref<8x1x1536xf32, #tpu.memory_space<vmem>>, vector<1x1x128xf32>,
    %656 = arith.index_cast %c4_i32 : i32 to index
    %c0_169 = arith.constant 0 : index
    %c1408_170 = arith.constant 1408 : index
    %657 = vector.load %arg5[%656, %c0_169, %c1408_170] : memref<8x1x1536xf32, #tpu.memory_space<vmem>>, vector<1x1x128xf32>
    %658 = vector.shape_cast %657 : vector<1x1x128xf32> to vector<1x128xf32>
    %659 = vector.shape_cast %543 : vector<1x128xf32> to vector<1x1x128xf32>
    tpu.vector_store %arg5[%656, %c0_169, %c1408_170], %659 {strides = array<i32>} : memref<8x1x1536xf32, #tpu.memory_space<vmem>>, vector<1x1x128xf32>,
    %c5_i32 = arith.constant 5 : i32
    %660 = arith.index_cast %c5_i32 : i32 to index
    %c0_171 = arith.constant 0 : index
    %c0_172 = arith.constant 0 : index
    %661 = vector.load %arg2[%660, %c0_171, %c0_172] : memref<8x1x512xf32, #tpu.memory_space<vmem>>, vector<1x1x512xf32>
    %662 = vector.shape_cast %661 : vector<1x1x512xf32> to vector<1x512xf32>
    %663 = vector.extract_strided_slice %662 {offsets = [0, 0], sizes = [1, 128], strides = [1, 1]} : vector<1x512xf32> to vector<1x128xf32>
    %664 = vector.extract_strided_slice %662 {offsets = [0, 128], sizes = [1, 128], strides = [1, 1]} : vector<1x512xf32> to vector<1x128xf32>
    %665 = vector.extract_strided_slice %662 {offsets = [0, 256], sizes = [1, 128], strides = [1, 1]} : vector<1x512xf32> to vector<1x128xf32>
    %666 = vector.extract_strided_slice %662 {offsets = [0, 384], sizes = [1, 128], strides = [1, 1]} : vector<1x512xf32> to vector<1x128xf32>
    %cst_173 = arith.constant 5.000000e-01 : f32
    %667 = vector.broadcast %cst_173 : f32 to vector<1x128xf32>
    %668 = arith.cmpf ogt, %666, %667 : vector<1x128xf32>
    %669 = arith.addf %589, %664 : vector<1x128xf32>
    %670 = tpu.reciprocal %669 : vector<1x128xf32> -> vector<1x128xf32>
    %671 = arith.mulf %589, %670 : vector<1x128xf32>
    %672 = arith.mulf %611, %670 : vector<1x128xf32>
    %673 = arith.subf %663, %574 : vector<1x128xf32>
    %674 = arith.mulf %671, %673 : vector<1x128xf32>
    %675 = arith.addf %574, %674 : vector<1x128xf32>
    %676 = arith.select %668, %675, %574 : vector<1x128xi1>, vector<1x128xf32>
    %677 = arith.mulf %672, %673 : vector<1x128xf32>
    %678 = arith.addf %577, %677 : vector<1x128xf32>
    %679 = arith.select %668, %678, %577 : vector<1x128xi1>, vector<1x128xf32>
    %cst_174 = arith.constant 1.000000e+00 : f32
    %680 = vector.broadcast %cst_174 : f32 to vector<1x128xf32>
    %681 = arith.subf %680, %671 : vector<1x128xf32>
    %682 = arith.mulf %681, %589 : vector<1x128xf32>
    %683 = arith.select %668, %682, %589 : vector<1x128xi1>, vector<1x128xf32>
    %684 = arith.mulf %672, %611 : vector<1x128xf32>
    %685 = arith.subf %601, %684 : vector<1x128xf32>
    %686 = arith.select %668, %685, %601 : vector<1x128xi1>, vector<1x128xf32>
    %cst_175 = arith.constant 1.000000e+00 : f32
    %687 = vector.broadcast %cst_175 : f32 to vector<1x128xf32>
    %688 = arith.subf %687, %671 : vector<1x128xf32>
    %689 = arith.mulf %688, %611 : vector<1x128xf32>
    %690 = arith.select %668, %689, %611 : vector<1x128xi1>, vector<1x128xf32>
    %691 = arith.mulf %665, %4 : vector<1x128xf32>
    %cst_176 = arith.constant 1.000000e+00 : f32
    %692 = vector.broadcast %cst_176 : f32 to vector<1x128xf32>
    %693 = arith.subf %692, %691 : vector<1x128xf32>
    %694 = arith.mulf %665, %5 : vector<1x128xf32>
    %cst_177 = arith.constant 0.000000e+00 : f32
    %695 = vector.broadcast %cst_177 : f32 to vector<1x128xf32>
    %696 = arith.subf %695, %665 : vector<1x128xf32>
    %697 = arith.mulf %696, %6 : vector<1x128xf32>
    %698 = arith.mulf %665, %7 : vector<1x128xf32>
    %cst_178 = arith.constant 1.000000e+00 : f32
    %699 = vector.broadcast %cst_178 : f32 to vector<1x128xf32>
    %700 = arith.subf %699, %698 : vector<1x128xf32>
    %701 = arith.mulf %693, %676 : vector<1x128xf32>
    %702 = arith.mulf %694, %679 : vector<1x128xf32>
    %703 = arith.addf %701, %702 : vector<1x128xf32>
    %704 = arith.mulf %697, %676 : vector<1x128xf32>
    %705 = arith.mulf %700, %679 : vector<1x128xf32>
    %706 = arith.addf %704, %705 : vector<1x128xf32>
    %707 = arith.mulf %693, %693 : vector<1x128xf32>
    %708 = arith.mulf %707, %683 : vector<1x128xf32>
    %cst_179 = arith.constant 2.000000e+00 : f32
    %709 = vector.broadcast %cst_179 : f32 to vector<1x128xf32>
    %710 = arith.mulf %709, %693 : vector<1x128xf32>
    %711 = arith.mulf %710, %694 : vector<1x128xf32>
    %712 = arith.mulf %711, %690 : vector<1x128xf32>
    %713 = arith.addf %708, %712 : vector<1x128xf32>
    %714 = arith.mulf %694, %694 : vector<1x128xf32>
    %715 = arith.mulf %714, %686 : vector<1x128xf32>
    %716 = arith.addf %713, %715 : vector<1x128xf32>
    %717 = arith.mulf %665, %8 : vector<1x128xf32>
    %718 = arith.addf %716, %717 : vector<1x128xf32>
    %719 = arith.mulf %697, %697 : vector<1x128xf32>
    %720 = arith.mulf %719, %683 : vector<1x128xf32>
    %cst_180 = arith.constant 2.000000e+00 : f32
    %721 = vector.broadcast %cst_180 : f32 to vector<1x128xf32>
    %722 = arith.mulf %721, %697 : vector<1x128xf32>
    %723 = arith.mulf %722, %700 : vector<1x128xf32>
    %724 = arith.mulf %723, %690 : vector<1x128xf32>
    %725 = arith.addf %720, %724 : vector<1x128xf32>
    %726 = arith.mulf %700, %700 : vector<1x128xf32>
    %727 = arith.mulf %726, %686 : vector<1x128xf32>
    %728 = arith.addf %725, %727 : vector<1x128xf32>
    %729 = arith.mulf %665, %9 : vector<1x128xf32>
    %730 = arith.addf %728, %729 : vector<1x128xf32>
    %731 = arith.mulf %693, %697 : vector<1x128xf32>
    %732 = arith.mulf %731, %683 : vector<1x128xf32>
    %733 = arith.mulf %693, %700 : vector<1x128xf32>
    %734 = arith.mulf %694, %697 : vector<1x128xf32>
    %735 = arith.addf %733, %734 : vector<1x128xf32>
    %736 = arith.mulf %735, %690 : vector<1x128xf32>
    %737 = arith.addf %732, %736 : vector<1x128xf32>
    %738 = arith.mulf %694, %700 : vector<1x128xf32>
    %739 = arith.mulf %738, %686 : vector<1x128xf32>
    %740 = arith.addf %737, %739 : vector<1x128xf32>
    %741 = arith.index_cast %c5_i32 : i32 to index
    %c0_181 = arith.constant 0 : index
    %c0_182 = arith.constant 0 : index
    %742 = vector.load %arg5[%741, %c0_181, %c0_182] : memref<8x1x1536xf32, #tpu.memory_space<vmem>>, vector<1x1x128xf32>
    %743 = vector.shape_cast %742 : vector<1x1x128xf32> to vector<1x128xf32>
    %744 = vector.shape_cast %676 : vector<1x128xf32> to vector<1x1x128xf32>
    tpu.vector_store %arg5[%741, %c0_181, %c0_182], %744 {strides = array<i32>} : memref<8x1x1536xf32, #tpu.memory_space<vmem>>, vector<1x1x128xf32>,
    %745 = arith.index_cast %c5_i32 : i32 to index
    %c0_183 = arith.constant 0 : index
    %c128_184 = arith.constant 128 : index
    %746 = vector.load %arg5[%745, %c0_183, %c128_184] : memref<8x1x1536xf32, #tpu.memory_space<vmem>>, vector<1x1x128xf32>
    %747 = vector.shape_cast %746 : vector<1x1x128xf32> to vector<1x128xf32>
    %748 = vector.shape_cast %679 : vector<1x128xf32> to vector<1x1x128xf32>
    tpu.vector_store %arg5[%745, %c0_183, %c128_184], %748 {strides = array<i32>} : memref<8x1x1536xf32, #tpu.memory_space<vmem>>, vector<1x1x128xf32>,
    %749 = arith.index_cast %c5_i32 : i32 to index
    %c0_185 = arith.constant 0 : index
    %c256_186 = arith.constant 256 : index
    %750 = vector.load %arg5[%749, %c0_185, %c256_186] : memref<8x1x1536xf32, #tpu.memory_space<vmem>>, vector<1x1x128xf32>
    %751 = vector.shape_cast %750 : vector<1x1x128xf32> to vector<1x128xf32>
    %752 = vector.shape_cast %703 : vector<1x128xf32> to vector<1x1x128xf32>
    tpu.vector_store %arg5[%749, %c0_185, %c256_186], %752 {strides = array<i32>} : memref<8x1x1536xf32, #tpu.memory_space<vmem>>, vector<1x1x128xf32>,
    %753 = arith.index_cast %c5_i32 : i32 to index
    %c0_187 = arith.constant 0 : index
    %c384_188 = arith.constant 384 : index
    %754 = vector.load %arg5[%753, %c0_187, %c384_188] : memref<8x1x1536xf32, #tpu.memory_space<vmem>>, vector<1x1x128xf32>
    %755 = vector.shape_cast %754 : vector<1x1x128xf32> to vector<1x128xf32>
    %756 = vector.shape_cast %706 : vector<1x128xf32> to vector<1x1x128xf32>
    tpu.vector_store %arg5[%753, %c0_187, %c384_188], %756 {strides = array<i32>} : memref<8x1x1536xf32, #tpu.memory_space<vmem>>, vector<1x1x128xf32>,
    %757 = arith.index_cast %c5_i32 : i32 to index
    %c0_189 = arith.constant 0 : index
    %c512_190 = arith.constant 512 : index
    %758 = vector.load %arg5[%757, %c0_189, %c512_190] : memref<8x1x1536xf32, #tpu.memory_space<vmem>>, vector<1x1x128xf32>
    %759 = vector.shape_cast %758 : vector<1x1x128xf32> to vector<1x128xf32>
    %760 = vector.shape_cast %683 : vector<1x128xf32> to vector<1x1x128xf32>
    tpu.vector_store %arg5[%757, %c0_189, %c512_190], %760 {strides = array<i32>} : memref<8x1x1536xf32, #tpu.memory_space<vmem>>, vector<1x1x128xf32>,
    %761 = arith.index_cast %c5_i32 : i32 to index
    %c0_191 = arith.constant 0 : index
    %c640_192 = arith.constant 640 : index
    %762 = vector.load %arg5[%761, %c0_191, %c640_192] : memref<8x1x1536xf32, #tpu.memory_space<vmem>>, vector<1x1x128xf32>
    %763 = vector.shape_cast %762 : vector<1x1x128xf32> to vector<1x128xf32>
    %764 = vector.shape_cast %686 : vector<1x128xf32> to vector<1x1x128xf32>
    tpu.vector_store %arg5[%761, %c0_191, %c640_192], %764 {strides = array<i32>} : memref<8x1x1536xf32, #tpu.memory_space<vmem>>, vector<1x1x128xf32>,
    %765 = arith.index_cast %c5_i32 : i32 to index
    %c0_193 = arith.constant 0 : index
    %c768_194 = arith.constant 768 : index
    %766 = vector.load %arg5[%765, %c0_193, %c768_194] : memref<8x1x1536xf32, #tpu.memory_space<vmem>>, vector<1x1x128xf32>
    %767 = vector.shape_cast %766 : vector<1x1x128xf32> to vector<1x128xf32>
    %768 = vector.shape_cast %690 : vector<1x128xf32> to vector<1x1x128xf32>
    tpu.vector_store %arg5[%765, %c0_193, %c768_194], %768 {strides = array<i32>} : memref<8x1x1536xf32, #tpu.memory_space<vmem>>, vector<1x1x128xf32>,
    %769 = arith.index_cast %c5_i32 : i32 to index
    %c0_195 = arith.constant 0 : index
    %c896_196 = arith.constant 896 : index
    %770 = vector.load %arg5[%769, %c0_195, %c896_196] : memref<8x1x1536xf32, #tpu.memory_space<vmem>>, vector<1x1x128xf32>
    %771 = vector.shape_cast %770 : vector<1x1x128xf32> to vector<1x128xf32>
    %772 = vector.shape_cast %718 : vector<1x128xf32> to vector<1x1x128xf32>
    tpu.vector_store %arg5[%769, %c0_195, %c896_196], %772 {strides = array<i32>} : memref<8x1x1536xf32, #tpu.memory_space<vmem>>, vector<1x1x128xf32>,
    %773 = arith.index_cast %c5_i32 : i32 to index
    %c0_197 = arith.constant 0 : index
    %c1024_198 = arith.constant 1024 : index
    %774 = vector.load %arg5[%773, %c0_197, %c1024_198] : memref<8x1x1536xf32, #tpu.memory_space<vmem>>, vector<1x1x128xf32>
    %775 = vector.shape_cast %774 : vector<1x1x128xf32> to vector<1x128xf32>
    %776 = vector.shape_cast %730 : vector<1x128xf32> to vector<1x1x128xf32>
    tpu.vector_store %arg5[%773, %c0_197, %c1024_198], %776 {strides = array<i32>} : memref<8x1x1536xf32, #tpu.memory_space<vmem>>, vector<1x1x128xf32>,
    %777 = arith.index_cast %c5_i32 : i32 to index
    %c0_199 = arith.constant 0 : index
    %c1152_200 = arith.constant 1152 : index
    %778 = vector.load %arg5[%777, %c0_199, %c1152_200] : memref<8x1x1536xf32, #tpu.memory_space<vmem>>, vector<1x1x128xf32>
    %779 = vector.shape_cast %778 : vector<1x1x128xf32> to vector<1x128xf32>
    %780 = vector.shape_cast %740 : vector<1x128xf32> to vector<1x1x128xf32>
    tpu.vector_store %arg5[%777, %c0_199, %c1152_200], %780 {strides = array<i32>} : memref<8x1x1536xf32, #tpu.memory_space<vmem>>, vector<1x1x128xf32>,
    %781 = arith.index_cast %c5_i32 : i32 to index
    %c0_201 = arith.constant 0 : index
    %c1280_202 = arith.constant 1280 : index
    %782 = vector.load %arg5[%781, %c0_201, %c1280_202] : memref<8x1x1536xf32, #tpu.memory_space<vmem>>, vector<1x1x128xf32>
    %783 = vector.shape_cast %782 : vector<1x1x128xf32> to vector<1x128xf32>
    %784 = vector.shape_cast %671 : vector<1x128xf32> to vector<1x1x128xf32>
    tpu.vector_store %arg5[%781, %c0_201, %c1280_202], %784 {strides = array<i32>} : memref<8x1x1536xf32, #tpu.memory_space<vmem>>, vector<1x1x128xf32>,
    %785 = arith.index_cast %c5_i32 : i32 to index
    %c0_203 = arith.constant 0 : index
    %c1408_204 = arith.constant 1408 : index
    %786 = vector.load %arg5[%785, %c0_203, %c1408_204] : memref<8x1x1536xf32, #tpu.memory_space<vmem>>, vector<1x1x128xf32>
    %787 = vector.shape_cast %786 : vector<1x1x128xf32> to vector<1x128xf32>
    %788 = vector.shape_cast %672 : vector<1x128xf32> to vector<1x1x128xf32>
    tpu.vector_store %arg5[%785, %c0_203, %c1408_204], %788 {strides = array<i32>} : memref<8x1x1536xf32, #tpu.memory_space<vmem>>, vector<1x1x128xf32>,
    %c6_i32 = arith.constant 6 : i32
    %789 = arith.index_cast %c6_i32 : i32 to index
    %c0_205 = arith.constant 0 : index
    %c0_206 = arith.constant 0 : index
    %790 = vector.load %arg2[%789, %c0_205, %c0_206] : memref<8x1x512xf32, #tpu.memory_space<vmem>>, vector<1x1x512xf32>
    %791 = vector.shape_cast %790 : vector<1x1x512xf32> to vector<1x512xf32>
    %792 = vector.extract_strided_slice %791 {offsets = [0, 0], sizes = [1, 128], strides = [1, 1]} : vector<1x512xf32> to vector<1x128xf32>
    %793 = vector.extract_strided_slice %791 {offsets = [0, 128], sizes = [1, 128], strides = [1, 1]} : vector<1x512xf32> to vector<1x128xf32>
    %794 = vector.extract_strided_slice %791 {offsets = [0, 256], sizes = [1, 128], strides = [1, 1]} : vector<1x512xf32> to vector<1x128xf32>
    %795 = vector.extract_strided_slice %791 {offsets = [0, 384], sizes = [1, 128], strides = [1, 1]} : vector<1x512xf32> to vector<1x128xf32>
    %cst_207 = arith.constant 5.000000e-01 : f32
    %796 = vector.broadcast %cst_207 : f32 to vector<1x128xf32>
    %797 = arith.cmpf ogt, %795, %796 : vector<1x128xf32>
    %798 = arith.addf %718, %793 : vector<1x128xf32>
    %799 = tpu.reciprocal %798 : vector<1x128xf32> -> vector<1x128xf32>
    %800 = arith.mulf %718, %799 : vector<1x128xf32>
    %801 = arith.mulf %740, %799 : vector<1x128xf32>
    %802 = arith.subf %792, %703 : vector<1x128xf32>
    %803 = arith.mulf %800, %802 : vector<1x128xf32>
    %804 = arith.addf %703, %803 : vector<1x128xf32>
    %805 = arith.select %797, %804, %703 : vector<1x128xi1>, vector<1x128xf32>
    %806 = arith.mulf %801, %802 : vector<1x128xf32>
    %807 = arith.addf %706, %806 : vector<1x128xf32>
    %808 = arith.select %797, %807, %706 : vector<1x128xi1>, vector<1x128xf32>
    %cst_208 = arith.constant 1.000000e+00 : f32
    %809 = vector.broadcast %cst_208 : f32 to vector<1x128xf32>
    %810 = arith.subf %809, %800 : vector<1x128xf32>
    %811 = arith.mulf %810, %718 : vector<1x128xf32>
    %812 = arith.select %797, %811, %718 : vector<1x128xi1>, vector<1x128xf32>
    %813 = arith.mulf %801, %740 : vector<1x128xf32>
    %814 = arith.subf %730, %813 : vector<1x128xf32>
    %815 = arith.select %797, %814, %730 : vector<1x128xi1>, vector<1x128xf32>
    %cst_209 = arith.constant 1.000000e+00 : f32
    %816 = vector.broadcast %cst_209 : f32 to vector<1x128xf32>
    %817 = arith.subf %816, %800 : vector<1x128xf32>
    %818 = arith.mulf %817, %740 : vector<1x128xf32>
    %819 = arith.select %797, %818, %740 : vector<1x128xi1>, vector<1x128xf32>
    %820 = arith.mulf %794, %4 : vector<1x128xf32>
    %cst_210 = arith.constant 1.000000e+00 : f32
    %821 = vector.broadcast %cst_210 : f32 to vector<1x128xf32>
    %822 = arith.subf %821, %820 : vector<1x128xf32>
    %823 = arith.mulf %794, %5 : vector<1x128xf32>
    %cst_211 = arith.constant 0.000000e+00 : f32
    %824 = vector.broadcast %cst_211 : f32 to vector<1x128xf32>
    %825 = arith.subf %824, %794 : vector<1x128xf32>
    %826 = arith.mulf %825, %6 : vector<1x128xf32>
    %827 = arith.mulf %794, %7 : vector<1x128xf32>
    %cst_212 = arith.constant 1.000000e+00 : f32
    %828 = vector.broadcast %cst_212 : f32 to vector<1x128xf32>
    %829 = arith.subf %828, %827 : vector<1x128xf32>
    %830 = arith.mulf %822, %805 : vector<1x128xf32>
    %831 = arith.mulf %823, %808 : vector<1x128xf32>
    %832 = arith.addf %830, %831 : vector<1x128xf32>
    %833 = arith.mulf %826, %805 : vector<1x128xf32>
    %834 = arith.mulf %829, %808 : vector<1x128xf32>
    %835 = arith.addf %833, %834 : vector<1x128xf32>
    %836 = arith.mulf %822, %822 : vector<1x128xf32>
    %837 = arith.mulf %836, %812 : vector<1x128xf32>
    %cst_213 = arith.constant 2.000000e+00 : f32
    %838 = vector.broadcast %cst_213 : f32 to vector<1x128xf32>
    %839 = arith.mulf %838, %822 : vector<1x128xf32>
    %840 = arith.mulf %839, %823 : vector<1x128xf32>
    %841 = arith.mulf %840, %819 : vector<1x128xf32>
    %842 = arith.addf %837, %841 : vector<1x128xf32>
    %843 = arith.mulf %823, %823 : vector<1x128xf32>
    %844 = arith.mulf %843, %815 : vector<1x128xf32>
    %845 = arith.addf %842, %844 : vector<1x128xf32>
    %846 = arith.mulf %794, %8 : vector<1x128xf32>
    %847 = arith.addf %845, %846 : vector<1x128xf32>
    %848 = arith.mulf %826, %826 : vector<1x128xf32>
    %849 = arith.mulf %848, %812 : vector<1x128xf32>
    %cst_214 = arith.constant 2.000000e+00 : f32
    %850 = vector.broadcast %cst_214 : f32 to vector<1x128xf32>
    %851 = arith.mulf %850, %826 : vector<1x128xf32>
    %852 = arith.mulf %851, %829 : vector<1x128xf32>
    %853 = arith.mulf %852, %819 : vector<1x128xf32>
    %854 = arith.addf %849, %853 : vector<1x128xf32>
    %855 = arith.mulf %829, %829 : vector<1x128xf32>
    %856 = arith.mulf %855, %815 : vector<1x128xf32>
    %857 = arith.addf %854, %856 : vector<1x128xf32>
    %858 = arith.mulf %794, %9 : vector<1x128xf32>
    %859 = arith.addf %857, %858 : vector<1x128xf32>
    %860 = arith.mulf %822, %826 : vector<1x128xf32>
    %861 = arith.mulf %860, %812 : vector<1x128xf32>
    %862 = arith.mulf %822, %829 : vector<1x128xf32>
    %863 = arith.mulf %823, %826 : vector<1x128xf32>
    %864 = arith.addf %862, %863 : vector<1x128xf32>
    %865 = arith.mulf %864, %819 : vector<1x128xf32>
    %866 = arith.addf %861, %865 : vector<1x128xf32>
    %867 = arith.mulf %823, %829 : vector<1x128xf32>
    %868 = arith.mulf %867, %815 : vector<1x128xf32>
    %869 = arith.addf %866, %868 : vector<1x128xf32>
    %870 = arith.index_cast %c6_i32 : i32 to index
    %c0_215 = arith.constant 0 : index
    %c0_216 = arith.constant 0 : index
    %871 = vector.load %arg5[%870, %c0_215, %c0_216] : memref<8x1x1536xf32, #tpu.memory_space<vmem>>, vector<1x1x128xf32>
    %872 = vector.shape_cast %871 : vector<1x1x128xf32> to vector<1x128xf32>
    %873 = vector.shape_cast %805 : vector<1x128xf32> to vector<1x1x128xf32>
    tpu.vector_store %arg5[%870, %c0_215, %c0_216], %873 {strides = array<i32>} : memref<8x1x1536xf32, #tpu.memory_space<vmem>>, vector<1x1x128xf32>,
    %874 = arith.index_cast %c6_i32 : i32 to index
    %c0_217 = arith.constant 0 : index
    %c128_218 = arith.constant 128 : index
    %875 = vector.load %arg5[%874, %c0_217, %c128_218] : memref<8x1x1536xf32, #tpu.memory_space<vmem>>, vector<1x1x128xf32>
    %876 = vector.shape_cast %875 : vector<1x1x128xf32> to vector<1x128xf32>
    %877 = vector.shape_cast %808 : vector<1x128xf32> to vector<1x1x128xf32>
    tpu.vector_store %arg5[%874, %c0_217, %c128_218], %877 {strides = array<i32>} : memref<8x1x1536xf32, #tpu.memory_space<vmem>>, vector<1x1x128xf32>,
    %878 = arith.index_cast %c6_i32 : i32 to index
    %c0_219 = arith.constant 0 : index
    %c256_220 = arith.constant 256 : index
    %879 = vector.load %arg5[%878, %c0_219, %c256_220] : memref<8x1x1536xf32, #tpu.memory_space<vmem>>, vector<1x1x128xf32>
    %880 = vector.shape_cast %879 : vector<1x1x128xf32> to vector<1x128xf32>
    %881 = vector.shape_cast %832 : vector<1x128xf32> to vector<1x1x128xf32>
    tpu.vector_store %arg5[%878, %c0_219, %c256_220], %881 {strides = array<i32>} : memref<8x1x1536xf32, #tpu.memory_space<vmem>>, vector<1x1x128xf32>,
    %882 = arith.index_cast %c6_i32 : i32 to index
    %c0_221 = arith.constant 0 : index
    %c384_222 = arith.constant 384 : index
    %883 = vector.load %arg5[%882, %c0_221, %c384_222] : memref<8x1x1536xf32, #tpu.memory_space<vmem>>, vector<1x1x128xf32>
    %884 = vector.shape_cast %883 : vector<1x1x128xf32> to vector<1x128xf32>
    %885 = vector.shape_cast %835 : vector<1x128xf32> to vector<1x1x128xf32>
    tpu.vector_store %arg5[%882, %c0_221, %c384_222], %885 {strides = array<i32>} : memref<8x1x1536xf32, #tpu.memory_space<vmem>>, vector<1x1x128xf32>,
    %886 = arith.index_cast %c6_i32 : i32 to index
    %c0_223 = arith.constant 0 : index
    %c512_224 = arith.constant 512 : index
    %887 = vector.load %arg5[%886, %c0_223, %c512_224] : memref<8x1x1536xf32, #tpu.memory_space<vmem>>, vector<1x1x128xf32>
    %888 = vector.shape_cast %887 : vector<1x1x128xf32> to vector<1x128xf32>
    %889 = vector.shape_cast %812 : vector<1x128xf32> to vector<1x1x128xf32>
    tpu.vector_store %arg5[%886, %c0_223, %c512_224], %889 {strides = array<i32>} : memref<8x1x1536xf32, #tpu.memory_space<vmem>>, vector<1x1x128xf32>,
    %890 = arith.index_cast %c6_i32 : i32 to index
    %c0_225 = arith.constant 0 : index
    %c640_226 = arith.constant 640 : index
    %891 = vector.load %arg5[%890, %c0_225, %c640_226] : memref<8x1x1536xf32, #tpu.memory_space<vmem>>, vector<1x1x128xf32>
    %892 = vector.shape_cast %891 : vector<1x1x128xf32> to vector<1x128xf32>
    %893 = vector.shape_cast %815 : vector<1x128xf32> to vector<1x1x128xf32>
    tpu.vector_store %arg5[%890, %c0_225, %c640_226], %893 {strides = array<i32>} : memref<8x1x1536xf32, #tpu.memory_space<vmem>>, vector<1x1x128xf32>,
    %894 = arith.index_cast %c6_i32 : i32 to index
    %c0_227 = arith.constant 0 : index
    %c768_228 = arith.constant 768 : index
    %895 = vector.load %arg5[%894, %c0_227, %c768_228] : memref<8x1x1536xf32, #tpu.memory_space<vmem>>, vector<1x1x128xf32>
    %896 = vector.shape_cast %895 : vector<1x1x128xf32> to vector<1x128xf32>
    %897 = vector.shape_cast %819 : vector<1x128xf32> to vector<1x1x128xf32>
    tpu.vector_store %arg5[%894, %c0_227, %c768_228], %897 {strides = array<i32>} : memref<8x1x1536xf32, #tpu.memory_space<vmem>>, vector<1x1x128xf32>,
    %898 = arith.index_cast %c6_i32 : i32 to index
    %c0_229 = arith.constant 0 : index
    %c896_230 = arith.constant 896 : index
    %899 = vector.load %arg5[%898, %c0_229, %c896_230] : memref<8x1x1536xf32, #tpu.memory_space<vmem>>, vector<1x1x128xf32>
    %900 = vector.shape_cast %899 : vector<1x1x128xf32> to vector<1x128xf32>
    %901 = vector.shape_cast %847 : vector<1x128xf32> to vector<1x1x128xf32>
    tpu.vector_store %arg5[%898, %c0_229, %c896_230], %901 {strides = array<i32>} : memref<8x1x1536xf32, #tpu.memory_space<vmem>>, vector<1x1x128xf32>,
    %902 = arith.index_cast %c6_i32 : i32 to index
    %c0_231 = arith.constant 0 : index
    %c1024_232 = arith.constant 1024 : index
    %903 = vector.load %arg5[%902, %c0_231, %c1024_232] : memref<8x1x1536xf32, #tpu.memory_space<vmem>>, vector<1x1x128xf32>
    %904 = vector.shape_cast %903 : vector<1x1x128xf32> to vector<1x128xf32>
    %905 = vector.shape_cast %859 : vector<1x128xf32> to vector<1x1x128xf32>
    tpu.vector_store %arg5[%902, %c0_231, %c1024_232], %905 {strides = array<i32>} : memref<8x1x1536xf32, #tpu.memory_space<vmem>>, vector<1x1x128xf32>,
    %906 = arith.index_cast %c6_i32 : i32 to index
    %c0_233 = arith.constant 0 : index
    %c1152_234 = arith.constant 1152 : index
    %907 = vector.load %arg5[%906, %c0_233, %c1152_234] : memref<8x1x1536xf32, #tpu.memory_space<vmem>>, vector<1x1x128xf32>
    %908 = vector.shape_cast %907 : vector<1x1x128xf32> to vector<1x128xf32>
    %909 = vector.shape_cast %869 : vector<1x128xf32> to vector<1x1x128xf32>
    tpu.vector_store %arg5[%906, %c0_233, %c1152_234], %909 {strides = array<i32>} : memref<8x1x1536xf32, #tpu.memory_space<vmem>>, vector<1x1x128xf32>,
    %910 = arith.index_cast %c6_i32 : i32 to index
    %c0_235 = arith.constant 0 : index
    %c1280_236 = arith.constant 1280 : index
    %911 = vector.load %arg5[%910, %c0_235, %c1280_236] : memref<8x1x1536xf32, #tpu.memory_space<vmem>>, vector<1x1x128xf32>
    %912 = vector.shape_cast %911 : vector<1x1x128xf32> to vector<1x128xf32>
    %913 = vector.shape_cast %800 : vector<1x128xf32> to vector<1x1x128xf32>
    tpu.vector_store %arg5[%910, %c0_235, %c1280_236], %913 {strides = array<i32>} : memref<8x1x1536xf32, #tpu.memory_space<vmem>>, vector<1x1x128xf32>,
    %914 = arith.index_cast %c6_i32 : i32 to index
    %c0_237 = arith.constant 0 : index
    %c1408_238 = arith.constant 1408 : index
    %915 = vector.load %arg5[%914, %c0_237, %c1408_238] : memref<8x1x1536xf32, #tpu.memory_space<vmem>>, vector<1x1x128xf32>
    %916 = vector.shape_cast %915 : vector<1x1x128xf32> to vector<1x128xf32>
    %917 = vector.shape_cast %801 : vector<1x128xf32> to vector<1x1x128xf32>
    tpu.vector_store %arg5[%914, %c0_237, %c1408_238], %917 {strides = array<i32>} : memref<8x1x1536xf32, #tpu.memory_space<vmem>>, vector<1x1x128xf32>,
    %c7_i32 = arith.constant 7 : i32
    %918 = arith.index_cast %c7_i32 : i32 to index
    %c0_239 = arith.constant 0 : index
    %c0_240 = arith.constant 0 : index
    %919 = vector.load %arg2[%918, %c0_239, %c0_240] : memref<8x1x512xf32, #tpu.memory_space<vmem>>, vector<1x1x512xf32>
    %920 = vector.shape_cast %919 : vector<1x1x512xf32> to vector<1x512xf32>
    %921 = vector.extract_strided_slice %920 {offsets = [0, 0], sizes = [1, 128], strides = [1, 1]} : vector<1x512xf32> to vector<1x128xf32>
    %922 = vector.extract_strided_slice %920 {offsets = [0, 128], sizes = [1, 128], strides = [1, 1]} : vector<1x512xf32> to vector<1x128xf32>
    %923 = vector.extract_strided_slice %920 {offsets = [0, 256], sizes = [1, 128], strides = [1, 1]} : vector<1x512xf32> to vector<1x128xf32>
    %924 = vector.extract_strided_slice %920 {offsets = [0, 384], sizes = [1, 128], strides = [1, 1]} : vector<1x512xf32> to vector<1x128xf32>
    %cst_241 = arith.constant 5.000000e-01 : f32
    %925 = vector.broadcast %cst_241 : f32 to vector<1x128xf32>
    %926 = arith.cmpf ogt, %924, %925 : vector<1x128xf32>
    %927 = arith.addf %847, %922 : vector<1x128xf32>
    %928 = tpu.reciprocal %927 : vector<1x128xf32> -> vector<1x128xf32>
    %929 = arith.mulf %847, %928 : vector<1x128xf32>
    %930 = arith.mulf %869, %928 : vector<1x128xf32>
    %931 = arith.subf %921, %832 : vector<1x128xf32>
    %932 = arith.mulf %929, %931 : vector<1x128xf32>
    %933 = arith.addf %832, %932 : vector<1x128xf32>
    %934 = arith.select %926, %933, %832 : vector<1x128xi1>, vector<1x128xf32>
    %935 = arith.mulf %930, %931 : vector<1x128xf32>
    %936 = arith.addf %835, %935 : vector<1x128xf32>
    %937 = arith.select %926, %936, %835 : vector<1x128xi1>, vector<1x128xf32>
    %cst_242 = arith.constant 1.000000e+00 : f32
    %938 = vector.broadcast %cst_242 : f32 to vector<1x128xf32>
    %939 = arith.subf %938, %929 : vector<1x128xf32>
    %940 = arith.mulf %939, %847 : vector<1x128xf32>
    %941 = arith.select %926, %940, %847 : vector<1x128xi1>, vector<1x128xf32>
    %942 = arith.mulf %930, %869 : vector<1x128xf32>
    %943 = arith.subf %859, %942 : vector<1x128xf32>
    %944 = arith.select %926, %943, %859 : vector<1x128xi1>, vector<1x128xf32>
    %cst_243 = arith.constant 1.000000e+00 : f32
    %945 = vector.broadcast %cst_243 : f32 to vector<1x128xf32>
    %946 = arith.subf %945, %929 : vector<1x128xf32>
    %947 = arith.mulf %946, %869 : vector<1x128xf32>
    %948 = arith.select %926, %947, %869 : vector<1x128xi1>, vector<1x128xf32>
    %949 = arith.mulf %923, %4 : vector<1x128xf32>
    %cst_244 = arith.constant 1.000000e+00 : f32
    %950 = vector.broadcast %cst_244 : f32 to vector<1x128xf32>
    %951 = arith.subf %950, %949 : vector<1x128xf32>
    %952 = arith.mulf %923, %5 : vector<1x128xf32>
    %cst_245 = arith.constant 0.000000e+00 : f32
    %953 = vector.broadcast %cst_245 : f32 to vector<1x128xf32>
    %954 = arith.subf %953, %923 : vector<1x128xf32>
    %955 = arith.mulf %954, %6 : vector<1x128xf32>
    %956 = arith.mulf %923, %7 : vector<1x128xf32>
    %cst_246 = arith.constant 1.000000e+00 : f32
    %957 = vector.broadcast %cst_246 : f32 to vector<1x128xf32>
    %958 = arith.subf %957, %956 : vector<1x128xf32>
    %959 = arith.mulf %951, %934 : vector<1x128xf32>
    %960 = arith.mulf %952, %937 : vector<1x128xf32>
    %961 = arith.addf %959, %960 : vector<1x128xf32>
    %962 = arith.mulf %955, %934 : vector<1x128xf32>
    %963 = arith.mulf %958, %937 : vector<1x128xf32>
    %964 = arith.addf %962, %963 : vector<1x128xf32>
    %965 = arith.mulf %951, %951 : vector<1x128xf32>
    %966 = arith.mulf %965, %941 : vector<1x128xf32>
    %cst_247 = arith.constant 2.000000e+00 : f32
    %967 = vector.broadcast %cst_247 : f32 to vector<1x128xf32>
    %968 = arith.mulf %967, %951 : vector<1x128xf32>
    %969 = arith.mulf %968, %952 : vector<1x128xf32>
    %970 = arith.mulf %969, %948 : vector<1x128xf32>
    %971 = arith.addf %966, %970 : vector<1x128xf32>
    %972 = arith.mulf %952, %952 : vector<1x128xf32>
    %973 = arith.mulf %972, %944 : vector<1x128xf32>
    %974 = arith.addf %971, %973 : vector<1x128xf32>
    %975 = arith.mulf %923, %8 : vector<1x128xf32>
    %976 = arith.addf %974, %975 : vector<1x128xf32>
    %977 = arith.mulf %955, %955 : vector<1x128xf32>
    %978 = arith.mulf %977, %941 : vector<1x128xf32>
    %cst_248 = arith.constant 2.000000e+00 : f32
    %979 = vector.broadcast %cst_248 : f32 to vector<1x128xf32>
    %980 = arith.mulf %979, %955 : vector<1x128xf32>
    %981 = arith.mulf %980, %958 : vector<1x128xf32>
    %982 = arith.mulf %981, %948 : vector<1x128xf32>
    %983 = arith.addf %978, %982 : vector<1x128xf32>
    %984 = arith.mulf %958, %958 : vector<1x128xf32>
    %985 = arith.mulf %984, %944 : vector<1x128xf32>
    %986 = arith.addf %983, %985 : vector<1x128xf32>
    %987 = arith.mulf %923, %9 : vector<1x128xf32>
    %988 = arith.addf %986, %987 : vector<1x128xf32>
    %989 = arith.mulf %951, %955 : vector<1x128xf32>
    %990 = arith.mulf %989, %941 : vector<1x128xf32>
    %991 = arith.mulf %951, %958 : vector<1x128xf32>
    %992 = arith.mulf %952, %955 : vector<1x128xf32>
    %993 = arith.addf %991, %992 : vector<1x128xf32>
    %994 = arith.mulf %993, %948 : vector<1x128xf32>
    %995 = arith.addf %990, %994 : vector<1x128xf32>
    %996 = arith.mulf %952, %958 : vector<1x128xf32>
    %997 = arith.mulf %996, %944 : vector<1x128xf32>
    %998 = arith.addf %995, %997 : vector<1x128xf32>
    %999 = arith.index_cast %c7_i32 : i32 to index
    %c0_249 = arith.constant 0 : index
    %c0_250 = arith.constant 0 : index
    %1000 = vector.load %arg5[%999, %c0_249, %c0_250] : memref<8x1x1536xf32, #tpu.memory_space<vmem>>, vector<1x1x128xf32>
    %1001 = vector.shape_cast %1000 : vector<1x1x128xf32> to vector<1x128xf32>
    %1002 = vector.shape_cast %934 : vector<1x128xf32> to vector<1x1x128xf32>
    tpu.vector_store %arg5[%999, %c0_249, %c0_250], %1002 {strides = array<i32>} : memref<8x1x1536xf32, #tpu.memory_space<vmem>>, vector<1x1x128xf32>,
    %1003 = arith.index_cast %c7_i32 : i32 to index
    %c0_251 = arith.constant 0 : index
    %c128_252 = arith.constant 128 : index
    %1004 = vector.load %arg5[%1003, %c0_251, %c128_252] : memref<8x1x1536xf32, #tpu.memory_space<vmem>>, vector<1x1x128xf32>
    %1005 = vector.shape_cast %1004 : vector<1x1x128xf32> to vector<1x128xf32>
    %1006 = vector.shape_cast %937 : vector<1x128xf32> to vector<1x1x128xf32>
    tpu.vector_store %arg5[%1003, %c0_251, %c128_252], %1006 {strides = array<i32>} : memref<8x1x1536xf32, #tpu.memory_space<vmem>>, vector<1x1x128xf32>,
    %1007 = arith.index_cast %c7_i32 : i32 to index
    %c0_253 = arith.constant 0 : index
    %c256_254 = arith.constant 256 : index
    %1008 = vector.load %arg5[%1007, %c0_253, %c256_254] : memref<8x1x1536xf32, #tpu.memory_space<vmem>>, vector<1x1x128xf32>
    %1009 = vector.shape_cast %1008 : vector<1x1x128xf32> to vector<1x128xf32>
    %1010 = vector.shape_cast %961 : vector<1x128xf32> to vector<1x1x128xf32>
    tpu.vector_store %arg5[%1007, %c0_253, %c256_254], %1010 {strides = array<i32>} : memref<8x1x1536xf32, #tpu.memory_space<vmem>>, vector<1x1x128xf32>,
    %1011 = arith.index_cast %c7_i32 : i32 to index
    %c0_255 = arith.constant 0 : index
    %c384_256 = arith.constant 384 : index
    %1012 = vector.load %arg5[%1011, %c0_255, %c384_256] : memref<8x1x1536xf32, #tpu.memory_space<vmem>>, vector<1x1x128xf32>
    %1013 = vector.shape_cast %1012 : vector<1x1x128xf32> to vector<1x128xf32>
    %1014 = vector.shape_cast %964 : vector<1x128xf32> to vector<1x1x128xf32>
    tpu.vector_store %arg5[%1011, %c0_255, %c384_256], %1014 {strides = array<i32>} : memref<8x1x1536xf32, #tpu.memory_space<vmem>>, vector<1x1x128xf32>,
    %1015 = arith.index_cast %c7_i32 : i32 to index
    %c0_257 = arith.constant 0 : index
    %c512_258 = arith.constant 512 : index
    %1016 = vector.load %arg5[%1015, %c0_257, %c512_258] : memref<8x1x1536xf32, #tpu.memory_space<vmem>>, vector<1x1x128xf32>
    %1017 = vector.shape_cast %1016 : vector<1x1x128xf32> to vector<1x128xf32>
    %1018 = vector.shape_cast %941 : vector<1x128xf32> to vector<1x1x128xf32>
    tpu.vector_store %arg5[%1015, %c0_257, %c512_258], %1018 {strides = array<i32>} : memref<8x1x1536xf32, #tpu.memory_space<vmem>>, vector<1x1x128xf32>,
    %1019 = arith.index_cast %c7_i32 : i32 to index
    %c0_259 = arith.constant 0 : index
    %c640_260 = arith.constant 640 : index
    %1020 = vector.load %arg5[%1019, %c0_259, %c640_260] : memref<8x1x1536xf32, #tpu.memory_space<vmem>>, vector<1x1x128xf32>
    %1021 = vector.shape_cast %1020 : vector<1x1x128xf32> to vector<1x128xf32>
    %1022 = vector.shape_cast %944 : vector<1x128xf32> to vector<1x1x128xf32>
    tpu.vector_store %arg5[%1019, %c0_259, %c640_260], %1022 {strides = array<i32>} : memref<8x1x1536xf32, #tpu.memory_space<vmem>>, vector<1x1x128xf32>,
    %1023 = arith.index_cast %c7_i32 : i32 to index
    %c0_261 = arith.constant 0 : index
    %c768_262 = arith.constant 768 : index
    %1024 = vector.load %arg5[%1023, %c0_261, %c768_262] : memref<8x1x1536xf32, #tpu.memory_space<vmem>>, vector<1x1x128xf32>
    %1025 = vector.shape_cast %1024 : vector<1x1x128xf32> to vector<1x128xf32>
    %1026 = vector.shape_cast %948 : vector<1x128xf32> to vector<1x1x128xf32>
    tpu.vector_store %arg5[%1023, %c0_261, %c768_262], %1026 {strides = array<i32>} : memref<8x1x1536xf32, #tpu.memory_space<vmem>>, vector<1x1x128xf32>,
    %1027 = arith.index_cast %c7_i32 : i32 to index
    %c0_263 = arith.constant 0 : index
    %c896_264 = arith.constant 896 : index
    %1028 = vector.load %arg5[%1027, %c0_263, %c896_264] : memref<8x1x1536xf32, #tpu.memory_space<vmem>>, vector<1x1x128xf32>
    %1029 = vector.shape_cast %1028 : vector<1x1x128xf32> to vector<1x128xf32>
    %1030 = vector.shape_cast %976 : vector<1x128xf32> to vector<1x1x128xf32>
    tpu.vector_store %arg5[%1027, %c0_263, %c896_264], %1030 {strides = array<i32>} : memref<8x1x1536xf32, #tpu.memory_space<vmem>>, vector<1x1x128xf32>,
    %1031 = arith.index_cast %c7_i32 : i32 to index
    %c0_265 = arith.constant 0 : index
    %c1024_266 = arith.constant 1024 : index
    %1032 = vector.load %arg5[%1031, %c0_265, %c1024_266] : memref<8x1x1536xf32, #tpu.memory_space<vmem>>, vector<1x1x128xf32>
    %1033 = vector.shape_cast %1032 : vector<1x1x128xf32> to vector<1x128xf32>
    %1034 = vector.shape_cast %988 : vector<1x128xf32> to vector<1x1x128xf32>
    tpu.vector_store %arg5[%1031, %c0_265, %c1024_266], %1034 {strides = array<i32>} : memref<8x1x1536xf32, #tpu.memory_space<vmem>>, vector<1x1x128xf32>,
    %1035 = arith.index_cast %c7_i32 : i32 to index
    %c0_267 = arith.constant 0 : index
    %c1152_268 = arith.constant 1152 : index
    %1036 = vector.load %arg5[%1035, %c0_267, %c1152_268] : memref<8x1x1536xf32, #tpu.memory_space<vmem>>, vector<1x1x128xf32>
    %1037 = vector.shape_cast %1036 : vector<1x1x128xf32> to vector<1x128xf32>
    %1038 = vector.shape_cast %998 : vector<1x128xf32> to vector<1x1x128xf32>
    tpu.vector_store %arg5[%1035, %c0_267, %c1152_268], %1038 {strides = array<i32>} : memref<8x1x1536xf32, #tpu.memory_space<vmem>>, vector<1x1x128xf32>,
    %1039 = arith.index_cast %c7_i32 : i32 to index
    %c0_269 = arith.constant 0 : index
    %c1280_270 = arith.constant 1280 : index
    %1040 = vector.load %arg5[%1039, %c0_269, %c1280_270] : memref<8x1x1536xf32, #tpu.memory_space<vmem>>, vector<1x1x128xf32>
    %1041 = vector.shape_cast %1040 : vector<1x1x128xf32> to vector<1x128xf32>
    %1042 = vector.shape_cast %929 : vector<1x128xf32> to vector<1x1x128xf32>
    tpu.vector_store %arg5[%1039, %c0_269, %c1280_270], %1042 {strides = array<i32>} : memref<8x1x1536xf32, #tpu.memory_space<vmem>>, vector<1x1x128xf32>,
    %1043 = arith.index_cast %c7_i32 : i32 to index
    %c0_271 = arith.constant 0 : index
    %c1408_272 = arith.constant 1408 : index
    %1044 = vector.load %arg5[%1043, %c0_271, %c1408_272] : memref<8x1x1536xf32, #tpu.memory_space<vmem>>, vector<1x1x128xf32>
    %1045 = vector.shape_cast %1044 : vector<1x1x128xf32> to vector<1x128xf32>
    %1046 = vector.shape_cast %930 : vector<1x128xf32> to vector<1x1x128xf32>
    tpu.vector_store %arg5[%1043, %c0_271, %c1408_272], %1046 {strides = array<i32>} : memref<8x1x1536xf32, #tpu.memory_space<vmem>>, vector<1x1x128xf32>,
    %c8_i32 = arith.constant 8 : i32
    %c0_273 = arith.constant 0 : index
    %c0_274 = arith.constant 0 : index
    %1047 = vector.load %arg6[%c0_273, %c0_274] : memref<1x128xf32, #tpu.memory_space<vmem>>, vector<1x128xf32>
    tpu.vector_store %arg6[%c0_273, %c0_274], %961 {strides = array<i32>} : memref<1x128xf32, #tpu.memory_space<vmem>>, vector<1x128xf32>,
    %c0_275 = arith.constant 0 : index
    %c0_276 = arith.constant 0 : index
    %1048 = vector.load %arg7[%c0_275, %c0_276] : memref<1x128xf32, #tpu.memory_space<vmem>>, vector<1x128xf32>
    tpu.vector_store %arg7[%c0_275, %c0_276], %964 {strides = array<i32>} : memref<1x128xf32, #tpu.memory_space<vmem>>, vector<1x128xf32>,
    %c0_277 = arith.constant 0 : index
    %c0_278 = arith.constant 0 : index
    %1049 = vector.load %arg8[%c0_277, %c0_278] : memref<1x128xf32, #tpu.memory_space<vmem>>, vector<1x128xf32>
    tpu.vector_store %arg8[%c0_277, %c0_278], %976 {strides = array<i32>} : memref<1x128xf32, #tpu.memory_space<vmem>>, vector<1x128xf32>,
    %c0_279 = arith.constant 0 : index
    %c0_280 = arith.constant 0 : index
    %1050 = vector.load %arg9[%c0_279, %c0_280] : memref<1x128xf32, #tpu.memory_space<vmem>>, vector<1x128xf32>
    tpu.vector_store %arg9[%c0_279, %c0_280], %988 {strides = array<i32>} : memref<1x128xf32, #tpu.memory_space<vmem>>, vector<1x128xf32>,
    %c0_281 = arith.constant 0 : index
    %c0_282 = arith.constant 0 : index
    %1051 = vector.load %arg10[%c0_281, %c0_282] : memref<1x128xf32, #tpu.memory_space<vmem>>, vector<1x128xf32>
    tpu.vector_store %arg10[%c0_281, %c0_282], %998 {strides = array<i32>} : memref<1x128xf32, #tpu.memory_space<vmem>>, vector<1x128xf32>,
    return
  }
  func.func @transform_0(%arg0: i32, %arg1: i32) -> (i32, i32, i32) {
    %c0_i32 = arith.constant 0 : i32
    %c0_i32_0 = arith.constant 0 : i32
    return %arg1, %arg0, %c0_i32 : i32, i32, i32
  }
  func.func @transform_1(%arg0: i32, %arg1: i32) -> (i32, i32) {
    %c0_i32 = arith.constant 0 : i32
    %c0_i32_0 = arith.constant 0 : i32
    return %arg0, %c0_i32 : i32, i32
  }
  func.func @transform_2(%arg0: i32, %arg1: i32) -> (i32, i32) {
    %c0_i32 = arith.constant 0 : i32
    %c0_i32_0 = arith.constant 0 : i32
    %c0_i32_1 = arith.constant 0 : i32
    return %c0_i32, %c0_i32_0 : i32, i32
  }
  func.func @transform_3(%arg0: i32, %arg1: i32) -> (i32, i32, i32) {
    %c0_i32 = arith.constant 0 : i32
    %c0_i32_0 = arith.constant 0 : i32
    return %arg1, %arg0, %c0_i32 : i32, i32, i32
  }
}

</mosaic_0001>

<bundles_post_ra>
// kernel: tpu_custom_call.1
= control target key start
LH: loop header
LB: loop body
LE: loop exit
PB: predicated region body
PF: predicated region fallthrough
CT: control target
= control target key end

     0   :  { %8 = vsyncpa [#allocation8], 0  ;;  %s1826_s0 = inlined_call_operand.hbm [shape: f32[8,1,512], index: 0, kind: input, shape index: {}]   ;;  %s1827_s1 = inlined_call_operand.hbm [shape: f32[1,640], index: 1, kind: input, shape index: {}]   ;;  %s1828_s2 = inlined_call_operand.hbm [shape: f32[6,128], index: 2, kind: input, shape index: {}]   ;;  %s1829_s3 = inlined_call_operand.hbm [shape: f32[8,1,1536], index: 3, kind: output, shape index: {}]  }
   0x1   :  { %9 = vsyncpa [#allocation11], 0  ;;  %s29_s14 = sshll.u32 %s1827_s1, 4  ;;  %s30_s14 = int_to_ptr.hbm [resolvable:$true] %s29_s14 }
   0x2   :  { %10 = vsyncpa [#allocation9], 0  ;;  %s1197_s15 = smov [#allocation10]   ;;  %s15_s19 = sshll.u32 %s1826_s0, 4  ;;  %s16_s19 = int_to_ptr.hbm [resolvable:$true] %s15_s19 }
   0x3   :  { %s31_s16 = sshll.u32 %s1197_s15, 4  ;;  %s1198_s20 = smov [#allocation7]   ;;  %s32_s16 = int_to_ptr.vmem [resolvable:$true] %s31_s16 }
   0x4   :  { %34 = dma.hbm_to_vmem [thread:$0]  %s30_s14, 80, %s32_s16, [#allocation11]  }
   0x5   :  { %s17_s21 = sshll.u32 %s1198_s20, 4  ;;  %s1199_s22 = smov 64   ;;  %s18_s21 = int_to_ptr.vmem [resolvable:$true] %s17_s21 }
   0x6   :  { %s1200_s23 = smov 4   ;;  %s40_s1 = sshll.u32 %s1828_s2, 4  ;;  %s41_s1 = int_to_ptr.hbm [resolvable:$true] %s40_s1 }
   0x7   :  { %23 = dma.hbm_to_vmem [thread:$0]  %s16_s19, 512, %s18_s21, [#allocation8], %s1199_s22, %s1199_s22, %s1200_s23  }
   0x8   :  { %s1201_s26 = smov [#allocation12]  }
   0x9   :  { %s42_s27 = sshll.u32 %s1201_s26, 4  ;;  %s43_s27 = int_to_ptr.vmem [resolvable:$true] %s42_s27 }
   0xa   :  { %45 = dma.hbm_to_vmem [thread:$0]  %s41_s1, 128, %s43_s27, [#allocation11]  }
   0xb   :  { %1191 = dma.done.wait [#allocation8], 512  }
   0xc   :  { %1192 = vsyncadd [#allocation8], 4294966784 }
   0xd   :  { %1193 = dma.done.wait [#allocation11], 208  }
   0xe   :  { %1194 = vsyncadd [#allocation11], 4294967088  ;;  %v1234_v0 = vld [vmem:[#allocation12] sm:$0x3f]  ;;  %v62_v1 = vld [vmem:[#allocation10] sm:$0x1f]  ;;  %v190_v30 = vlaneseq }
   0xf   :  { %127 = vst [vmem:[#allocation1] sm:$0xff] %v1234_v0  ;;  %v68_v2 = vperm.slane %v62_v1, 2  ;;  %v74_v3 = vperm.slane %v62_v1, 4  ;;  %v65_v4 = vperm.slane %v62_v1, 1  ;;  %v71_v5 = vperm.slane %v62_v1, 3  ;;  %s1202_s0 = smov [#allocation13]  }
  0x10   :  { %63 = vst [vmem:[#allocation2] sm:$0x1] %v62_v1  ;;  %v83_v6 = vld [vmem:[#allocation7] sm:$0xf]  ;;  %vm1255_vm5 = vcmp.lt.s32.totalorder %v190_v30, 128  ;;  %s1055_s2 = sshll.u32 %s1202_s0, 4  ;;  %s1056_s2 = int_to_ptr.vmem [resolvable:$true] %s1055_s2 }
  0x11   :  { %70 = vst [vmem:[#allocation4] sm:$0x1] %v68_v2  ;;  %v88_v7 = vrot.slane %v83_v6, 1  ;;  %v1241_v11 = vrot.slane %v83_v6, 2  ;;  %v85_v26 = vrot.slane %v83_v6, 3  ;;  %s1057_s30 = sshll.u32 %s1829_s3, 4  ;;  %s1058_s30 = int_to_ptr.hbm [resolvable:$true] %s1057_s30 }
  0x12   :  { %76 = vst [vmem:[#allocation6] sm:$0x1] %v74_v3  ;;  %s1203_s4 = smov 192   ;;  %s1204_s5 = smov 12  }
  0x13   :  { %67 = vst [vmem:[#allocation3] sm:$0x1] %v65_v4  ;;  %v124_v14 = vmul.f32 %v1241_v11, %v1234_v0  ;;  %v132_v24 = vsub.f32 0.0, %v1241_v11  ;;  %vm1250_vm4 = vcmp.gt.f32.partialorder %v85_v26, 0.5 }
  0x14   :  { %73 = vst [vmem:[#allocation5] sm:$0x1] %v71_v5 }
  0x15   :  { %v125_v19 = vsub.f32 1.0, %v124_v14 }
  0x16   :  { %v129_v8 = vld [vmem:[#allocation1 + $0x1] ss:$9 sm:$0xff] }
  0x17   :  { %133 = vst [vmem:[#allocation1] sm:$0xff] %v1234_v0  ;;  %v78_v22 = vld [vmem:[#allocation2] sm:$0x1]  ;;  %v131_v29 = vmul.f32 %v129_v8, %v1241_v11  ;;  %v152_v32 = vmul.f32 2.0, %v125_v19  ;;  %v150_v44 = vmul.f32 %v125_v19, %v125_v19 }
  0x18   :  { %v1238_v9 = vld [vmem:[#allocation4] sm:$0x1]  ;;  %v107_v34 = vsub.f32 %v83_v6, %v78_v22 }
  0x19   :  { %v90_v10 = vadd.f32 %v88_v7, %v1238_v9  ;;  %v82_v28 = vld [vmem:[#allocation6] sm:$0x1]  ;;  %v153_v45 = vmul.f32 %v152_v32, %v131_v29  ;;  %v156_v53 = vmul.f32 %v131_v29, %v131_v29 }
  0x1a   :  { %v79_v40 = vld [vmem:[#allocation3] sm:$0x1] }
  0x1b   :  { %1079 = vrcp.f32 %v90_v10  ;;  %v102_v16 = vand.u32 2147483648, %v90_v10  ;;  %vm96_vm0 = vweird.f32 %v90_v10  ;;  %v100_v18 = vand.u32 2147483647, %v90_v10  ;;  %v81_v42 = vld [vmem:[#allocation5] sm:$0x1] }
  0x1d   :  { %v103_v23 = vor.u32 1.1754944e-38, %v102_v16  ;;  %vm101_vm3 = vcmp.eq.f32.partialorder %v100_v18, 8.507059e+37 }
  0x1e   :  { %v135_v12 = vld [vmem:[#allocation1 + $0x2] ss:$9 sm:$0xff] }
  0x1f   :  { %138 = vst [vmem:[#allocation1] sm:$0xff] %v1234_v0  ;;  %v137_v36 = vmul.f32 %v135_v12, %v132_v24 }
  0x21   :  { %v1080_v13 = vpop.eup %1079  ;;  %v180_v51 = vmul.f32 %v137_v36, %v125_v19  ;;  %v183_v52 = vmul.f32 %v137_v36, %v131_v29  ;;  %v167_v54 = vmul.f32 2.0, %v137_v36  ;;  %v165_v61 = vmul.f32 %v137_v36, %v137_v36 }
  0x22   :  { %v92_v15 = vmul.f32 %v1080_v13, %v90_v10  ;;  %vm97_vm1 = vweird.f32 %v1080_v13 }
  0x23   :  { %vm98_vm2 = vmor %vm96_vm0, %vm97_vm1 }
  0x24   :  { %v93_v17 = vsub.f32 1.0, %v92_v15 }
  0x26   :  { %v140_v20 = vld [vmem:[#allocation1 + $0x3] ss:$9 sm:$0xff]  ;;  %v94_v21 = vmul.f32 %v1080_v13, %v93_v17 }
  0x27   :  { %159 = vst [vmem:[#allocation1] sm:$0xff] %v1234_v0  ;;  %v142_v25 = vmul.f32 %v140_v20, %v1241_v11 }
  0x28   :  { %v95_v27 = vadd.f32 %v1080_v13, %v94_v21 }
  0x29   :  { %v143_v31 = vsub.f32 1.0, %v142_v25 }
  0x2a   :  { %v99_v33 = vsel %vm98_vm2, %v1080_v13, %v95_v27 }
  0x2b   :  { %v104_v35 = vsel %vm101_vm3, %v103_v23, %v99_v33  ;;  %v182_v43 = vmul.f32 %v143_v31, %v125_v19  ;;  %v187_v60 = vmul.f32 %v143_v31, %v131_v29  ;;  %v168_v62 = vmul.f32 %v167_v54, %v143_v31 }
  0x2c   :  { %v105_v38 = vmul.f32 %v104_v35, %v1238_v9  ;;  %v106_v39 = vmul.f32 %v104_v35, %v82_v28  ;;  %v171_v20 = vmul.f32 %v143_v31, %v143_v31 }
  0x2d   :  { %v184_v3 = vadd.f32 %v183_v52, %v182_v43 }
  0x2e   :  { %v161_v46 = vld [vmem:[#allocation1 + $0x4] ss:$9 sm:$0xff]  ;;  %v108_v47 = vmul.f32 %v107_v34, %v105_v38  ;;  %v111_v48 = vmul.f32 %v107_v34, %v106_v39  ;;  %204 = vst.msk [vmem:[#allocation13 + $0xa] sm:$0x1] %vm1255_vm5, %v105_v38  ;;  %v114_v49 = vsub.f32 1.0, %v105_v38  ;;  %v117_v50 = vmul.f32 %v106_v39, %v82_v28 }
  0x2f   :  { %174 = vst [vmem:[#allocation1] sm:$0xff] %v1234_v0 }
  0x30   :  { %v109_v55 = vadd.f32 %v108_v47, %v78_v22  ;;  %v112_v56 = vadd.f32 %v111_v48, %v79_v40  ;;  %205 = vst.msk [vmem:[#allocation13 + $0xb] sm:$0x1] %vm1255_vm5, %v106_v39  ;;  %v115_v57 = vmul.f32 %v114_v49, %v1238_v9  ;;  %v118_v58 = vsub.f32 %v81_v42, %v117_v50 }
  0x31   :  { %v120_v59 = vmul.f32 %v114_v49, %v82_v28 }
  0x32   :  { %v110_v63 = vsel %vm1250_vm4, %v109_v55, %v78_v22  ;;  %v113_v1 = vsel %vm1250_vm4, %v112_v56, %v79_v40  ;;  %v116_v2 = vsel %vm1250_vm4, %v115_v57, %v1238_v9  ;;  %v119_v8 = vsel %vm1250_vm4, %v118_v58, %v81_v42 }
  0x33   :  { %v144_v4 = vmul.f32 %v125_v19, %v110_v63  ;;  %v145_v5 = vmul.f32 %v131_v29, %v113_v1  ;;  %194 = vst.msk [vmem:[#allocation13] sm:$0x1] %vm1255_vm5, %v110_v63  ;;  %v147_v6 = vmul.f32 %v137_v36, %v110_v63  ;;  %v148_v7 = vmul.f32 %v143_v31, %v113_v1 }
  0x34   :  { %195 = vst.msk [vmem:[#allocation13 + $0x1] sm:$0x1] %vm1255_vm5, %v113_v1  ;;  %v121_v10 = vsel %vm1250_vm4, %v120_v59, %v82_v28  ;;  %v181_v12 = vmul.f32 %v180_v51, %v116_v2  ;;  %v151_v13 = vmul.f32 %v150_v44, %v116_v2  ;;  %v166_v18 = vmul.f32 %v165_v61, %v116_v2  ;;  %v207_v28 = vld [vmem:[#allocation7 + $0x4] sm:$0xf] }
  0x35   :  { %v1280_v9 = vadd.f32 %v145_v5, %v144_v4  ;;  %v1282_v14 = vadd.f32 %v148_v7, %v147_v6  ;;  %v185_v15 = vmul.f32 %v184_v3, %v121_v10  ;;  %198 = vst.msk [vmem:[#allocation13 + $0x4] sm:$0x1] %vm1255_vm5, %v116_v2  ;;  %v154_v16 = vmul.f32 %v153_v45, %v121_v10 }
  0x36   :  { %v176_v17 = vld [vmem:[#allocation1 + $0x5] ss:$9 sm:$0xff]  ;;  %199 = vst.msk [vmem:[#allocation13 + $0x5] sm:$0x1] %vm1255_vm5, %v119_v8  ;;  %v169_v19 = vmul.f32 %v168_v62, %v121_v10  ;;  %v188_v22 = vmul.f32 %v187_v60, %v119_v8  ;;  %v157_v24 = vmul.f32 %v156_v53, %v119_v8  ;;  %v172_v26 = vmul.f32 %v171_v20, %v119_v8 }
  0x37   :  { %250 = vst [vmem:[#allocation1] sm:$0xff] %v1234_v0  ;;  %v186_v21 = vadd.f32 %v185_v15, %v181_v12  ;;  %v155_v23 = vadd.f32 %v154_v16, %v151_v13  ;;  %v178_v27 = vmul.f32 %v176_v17, %v1241_v11  ;;  %v163_v31 = vmul.f32 %v161_v46, %v1241_v11 }
  0x38   :  { %196 = vst.msk [vmem:[#allocation13 + $0x2] sm:$0x1] %vm1255_vm5, %v1280_v9  ;;  %v170_v25 = vadd.f32 %v169_v19, %v166_v18  ;;  %v212_v32 = vrot.slane %v207_v28, 1  ;;  %v1316_v37 = vrot.slane %v207_v28, 2  ;;  %v209_v51 = vrot.slane %v207_v28, 3 }
  0x39   :  { %197 = vst.msk [vmem:[#allocation13 + $0x3] sm:$0x1] %vm1255_vm5, %v1282_v14  ;;  %v1296_v29 = vadd.f32 %v188_v22, %v186_v21  ;;  %v158_v30 = vadd.f32 %v157_v24, %v155_v23  ;;  %v231_v61 = vsub.f32 %v207_v28, %v1280_v9 }
  0x3a   :  { %200 = vst.msk [vmem:[#allocation13 + $0x6] sm:$0x1] %vm1255_vm5, %v121_v10  ;;  %v173_v33 = vadd.f32 %v172_v26, %v170_v25  ;;  %v248_v42 = vmul.f32 %v1316_v37, %v1234_v0  ;;  %v255_v48 = vsub.f32 0.0, %v1316_v37  ;;  %vm1328_vm10 = vcmp.gt.f32.partialorder %v209_v51, 0.5 }
  0x3b   :  { %203 = vst.msk [vmem:[#allocation13 + $0x9] sm:$0x1] %vm1255_vm5, %v1296_v29  ;;  %v1304_v34 = vadd.f32 %v163_v31, %v158_v30 }
  0x3c   :  { %v1306_v35 = vadd.f32 %v178_v27, %v173_v33  ;;  %v249_v47 = vsub.f32 1.0, %v248_v42 }
  0x3d   :  { %201 = vst.msk [vmem:[#allocation13 + $0x7] sm:$0x1] %vm1255_vm5, %v1304_v34  ;;  %v214_v36 = vadd.f32 %v212_v32, %v1304_v34 }
  0x3e   :  { %v252_v11 = vld [vmem:[#allocation1 + $0x1] ss:$9 sm:$0xff]  ;;  %202 = vst.msk [vmem:[#allocation13 + $0x8] sm:$0x1] %vm1255_vm5, %v1306_v35  ;;  %v275_v58 = vmul.f32 2.0, %v249_v47  ;;  %v273_v1 = vmul.f32 %v249_v47, %v249_v47 }
  0x3f   :  { %256 = vst [vmem:[#allocation1] sm:$0xff] %v1234_v0  ;;  %1081 = vrcp.f32 %v214_v36  ;;  %v226_v44 = vand.u32 2147483648, %v214_v36  ;;  %v224_v46 = vand.u32 2147483647, %v214_v36  ;;  %vm220_vm7 = vweird.f32 %v214_v36 }
  0x40   :  { %v254_v52 = vmul.f32 %v252_v11, %v1316_v37 }
  0x41   :  { %v227_v50 = vor.u32 1.1754944e-38, %v226_v44  ;;  %vm225_vm9 = vcmp.eq.f32.partialorder %v224_v46, 8.507059e+37 }
  0x42   :  { %v279_v2 = vmul.f32 %v254_v52, %v254_v52  ;;  %v276_v7 = vmul.f32 %v275_v58, %v254_v52 }
  0x45   :  { %v1082_v38 = vpop.eup %1081 }
  0x46   :  { %v258_v39 = vld [vmem:[#allocation1 + $0x2] ss:$9 sm:$0xff]  ;;  %v216_v40 = vmul.f32 %v1082_v38, %v214_v36  ;;  %vm221_vm6 = vweird.f32 %v1082_v38 }
  0x47   :  { %261 = vst [vmem:[#allocation1] sm:$0xff] %v1234_v0  ;;  %vm222_vm8 = vmor %vm220_vm7, %vm221_vm6  ;;  %v260_v56 = vmul.f32 %v258_v39, %v255_v48  ;;  %v327_v48 = vld [vmem:[#allocation7 + $0x8] sm:$0xf] }
  0x48   :  { %v217_v43 = vsub.f32 1.0, %v216_v40 }
  0x49   :  { %v290_v8 = vmul.f32 2.0, %v260_v56  ;;  %v306_v12 = vmul.f32 %v260_v56, %v254_v52  ;;  %v288_v18 = vmul.f32 %v260_v56, %v260_v56  ;;  %v303_v19 = vmul.f32 %v260_v56, %v249_v47 }
  0x4a   :  { %v218_v45 = vmul.f32 %v1082_v38, %v217_v43 }
  0x4c   :  { %v219_v49 = vadd.f32 %v1082_v38, %v218_v45 }
  0x4e   :  { %v263_v53 = vld [vmem:[#allocation1 + $0x3] ss:$9 sm:$0xff]  ;;  %v223_v54 = vsel %vm222_vm8, %v1082_v38, %v219_v49 }
  0x4f   :  { %282 = vst [vmem:[#allocation1] sm:$0xff] %v1234_v0  ;;  %v228_v55 = vsel %vm225_vm9, %v227_v50, %v223_v54  ;;  %v265_v57 = vmul.f32 %v263_v53, %v1316_v37  ;;  %v332_v53 = vrot.slane %v327_v48, 1 }
  0x50   :  { %v229_v59 = vmul.f32 %v228_v55, %v1304_v34  ;;  %v230_v60 = vmul.f32 %v228_v55, %v1296_v29 }
  0x51   :  { %v266_v63 = vsub.f32 1.0, %v265_v57 }
  0x52   :  { %v238_v3 = vsub.f32 1.0, %v229_v59  ;;  %324 = vst.msk [vmem:[#allocation13 + $0x16] sm:$0x1] %vm1255_vm5, %v229_v59  ;;  %v241_v4 = vmul.f32 %v230_v60, %v1296_v29  ;;  %v232_v5 = vmul.f32 %v231_v61, %v229_v59  ;;  %v235_v6 = vmul.f32 %v231_v61, %v230_v60 }
  0x53   :  { %325 = vst.msk [vmem:[#allocation13 + $0x17] sm:$0x1] %vm1255_vm5, %v230_v60  ;;  %v305_v10 = vmul.f32 %v266_v63, %v249_v47  ;;  %v291_v21 = vmul.f32 %v290_v8, %v266_v63  ;;  %v310_v33 = vmul.f32 %v266_v63, %v254_v52  ;;  %v294_v11 = vmul.f32 %v266_v63, %v266_v63 }
  0x54   :  { %v233_v13 = vadd.f32 %v232_v5, %v1280_v9  ;;  %v236_v15 = vadd.f32 %v235_v6, %v1282_v14  ;;  %v239_v16 = vmul.f32 %v238_v3, %v1304_v34  ;;  %v242_v17 = vsub.f32 %v1306_v35, %v241_v4 }
  0x55   :  { %v244_v20 = vmul.f32 %v238_v3, %v1296_v29  ;;  %v307_v26 = vadd.f32 %v306_v12, %v305_v10  ;;  %v1394_v60 = vrot.slane %v327_v48, 2  ;;  %v329_v12 = vrot.slane %v327_v48, 3 }
  0x56   :  { %v284_v22 = vld [vmem:[#allocation1 + $0x4] ss:$9 sm:$0xff]  ;;  %v234_v23 = vsel %vm1328_vm10, %v233_v13, %v1280_v9  ;;  %v237_v24 = vsel %vm1328_vm10, %v236_v15, %v1282_v14  ;;  %v240_v25 = vsel %vm1328_vm10, %v239_v16, %v1304_v34  ;;  %v243_v14 = vsel %vm1328_vm10, %v242_v17, %v1306_v35 }
  0x57   :  { %297 = vst [vmem:[#allocation1] sm:$0xff] %v1234_v0  ;;  %v267_v27 = vmul.f32 %v249_v47, %v234_v23  ;;  %v270_v28 = vmul.f32 %v260_v56, %v234_v23  ;;  %v268_v30 = vmul.f32 %v254_v52, %v237_v24  ;;  %v271_v31 = vmul.f32 %v266_v63, %v237_v24 }
  0x58   :  { %314 = vst.msk [vmem:[#allocation13 + $0xc] sm:$0x1] %vm1255_vm5, %v234_v23  ;;  %v274_v32 = vmul.f32 %v273_v1, %v240_v25  ;;  %v289_v9 = vmul.f32 %v288_v18, %v240_v25  ;;  %v304_v34 = vmul.f32 %v303_v19, %v240_v25  ;;  %v245_v38 = vsel %vm1328_vm10, %v244_v20, %v1296_v29 }
  0x59   :  { %v1357_v36 = vadd.f32 %v268_v30, %v267_v27  ;;  %315 = vst.msk [vmem:[#allocation13 + $0xd] sm:$0x1] %vm1255_vm5, %v237_v24  ;;  %v277_v39 = vmul.f32 %v276_v7, %v245_v38  ;;  %v292_v40 = vmul.f32 %v291_v21, %v245_v38  ;;  %v308_v42 = vmul.f32 %v307_v26, %v245_v38 }
  0x5a   :  { %318 = vst.msk [vmem:[#allocation13 + $0x10] sm:$0x1] %vm1255_vm5, %v240_v25  ;;  %v1366_v43 = vadd.f32 %v271_v31, %v270_v28  ;;  %v280_v35 = vmul.f32 %v279_v2, %v243_v14  ;;  %v311_v44 = vmul.f32 %v310_v33, %v243_v14  ;;  %v295_v47 = vmul.f32 %v294_v11, %v243_v14 }
  0x5b   :  { %316 = vst.msk [vmem:[#allocation13 + $0xe] sm:$0x1] %vm1255_vm5, %v1357_v36  ;;  %v278_v45 = vadd.f32 %v277_v39, %v274_v32  ;;  %v309_v46 = vadd.f32 %v308_v42, %v304_v34  ;;  %v293_v29 = vadd.f32 %v292_v40, %v289_v9  ;;  %v286_v52 = vmul.f32 %v284_v22, %v1316_v37 }
  0x5c   :  { %319 = vst.msk [vmem:[#allocation13 + $0x11] sm:$0x1] %vm1255_vm5, %v243_v14  ;;  %v368_v2 = vmul.f32 %v1394_v60, %v1234_v0  ;;  %v375_v13 = vsub.f32 0.0, %v1394_v60  ;;  %v351_v17 = vsub.f32 %v327_v48, %v1357_v36  ;;  %vm1407_vm15 = vcmp.gt.f32.partialorder %v329_v12, 0.5 }
  0x5d   :  { %320 = vst.msk [vmem:[#allocation13 + $0x12] sm:$0x1] %vm1255_vm5, %v245_v38  ;;  %v281_v50 = vadd.f32 %v280_v35, %v278_v45  ;;  %v1375_v51 = vadd.f32 %v311_v44, %v309_v46  ;;  %v296_v54 = vadd.f32 %v295_v47, %v293_v29 }
  0x5e   :  { %v299_v49 = vld [vmem:[#allocation1 + $0x5] ss:$9 sm:$0xff]  ;;  %317 = vst.msk [vmem:[#allocation13 + $0xf] sm:$0x1] %vm1255_vm5, %v1366_v43  ;;  %v369_v7 = vsub.f32 1.0, %v368_v2 }
  0x5f   :  { %370 = vst [vmem:[#allocation1] sm:$0xff] %v1234_v0  ;;  %v301_v55 = vmul.f32 %v299_v49, %v1316_v37  ;;  %v287_v56 = vadd.f32 %v286_v52, %v281_v50 }
  0x60   :  { %323 = vst.msk [vmem:[#allocation13 + $0x15] sm:$0x1] %vm1255_vm5, %v1375_v51  ;;  %v395_v20 = vmul.f32 2.0, %v369_v7  ;;  %v393_v28 = vmul.f32 %v369_v7, %v369_v7 }
  0x61   :  { %v1386_v57 = vadd.f32 %v301_v55, %v296_v54  ;;  %321 = vst.msk [vmem:[#allocation13 + $0x13] sm:$0x1] %vm1255_vm5, %v287_v56  ;;  %v334_v58 = vadd.f32 %v332_v53, %v287_v56 }
  0x63   :  { %322 = vst.msk [vmem:[#allocation13 + $0x14] sm:$0x1] %vm1255_vm5, %v1386_v57  ;;  %1083 = vrcp.f32 %v334_v58  ;;  %v346_v1 = vand.u32 2147483648, %v334_v58  ;;  %v344_v4 = vand.u32 2147483647, %v334_v58  ;;  %vm340_vm12 = vweird.f32 %v334_v58 }
  0x65   :  { %v347_v6 = vor.u32 1.1754944e-38, %v346_v1  ;;  %vm345_vm14 = vcmp.eq.f32.partialorder %v344_v4, 8.507059e+37  ;;  %v447_v1 = vld [vmem:[#allocation7 + $0xc] sm:$0xf] }
  0x66   :  { %v372_v59 = vld [vmem:[#allocation1 + $0x1] ss:$9 sm:$0xff]  ;;  %v452_v2 = vrot.slane %v447_v1, 1 }
  0x67   :  { %376 = vst [vmem:[#allocation1] sm:$0xff] %v1234_v0  ;;  %v374_v19 = vmul.f32 %v372_v59, %v1394_v60 }
  0x69   :  { %v1084_v37 = vpop.eup %1083  ;;  %v399_v33 = vmul.f32 %v374_v19, %v374_v19  ;;  %v396_v40 = vmul.f32 %v395_v20, %v374_v19 }
  0x6a   :  { %v336_v61 = vmul.f32 %v1084_v37, %v334_v58  ;;  %vm341_vm11 = vweird.f32 %v1084_v37 }
  0x6b   :  { %vm342_vm13 = vmor %vm340_vm12, %vm341_vm11 }
  0x6c   :  { %v337_v62 = vsub.f32 1.0, %v336_v61 }
  0x6e   :  { %v378_v63 = vld [vmem:[#allocation1 + $0x2] ss:$9 sm:$0xff]  ;;  %v338_v3 = vmul.f32 %v1084_v37, %v337_v62 }
  0x6f   :  { %381 = vst [vmem:[#allocation1] sm:$0xff] %v1234_v0  ;;  %v380_v26 = vmul.f32 %v378_v63, %v375_v13 }
  0x70   :  { %v339_v5 = vadd.f32 %v1084_v37, %v338_v3 }
  0x71   :  { %v408_v45 = vmul.f32 %v380_v26, %v380_v26  ;;  %v410_v29 = vmul.f32 2.0, %v380_v26  ;;  %v423_v49 = vmul.f32 %v380_v26, %v369_v7  ;;  %v426_v52 = vmul.f32 %v380_v26, %v374_v19 }
  0x72   :  { %v343_v8 = vsel %vm342_vm13, %v1084_v37, %v339_v5 }
  0x73   :  { %v348_v10 = vsel %vm345_vm14, %v347_v6, %v343_v8 }
  0x74   :  { %v349_v15 = vmul.f32 %v348_v10, %v287_v56  ;;  %v350_v16 = vmul.f32 %v348_v10, %v1375_v51 }
  0x76   :  { %v383_v18 = vld [vmem:[#allocation1 + $0x3] ss:$9 sm:$0xff]  ;;  %v358_v21 = vsub.f32 1.0, %v349_v15  ;;  %v361_v22 = vmul.f32 %v350_v16, %v1375_v51  ;;  %v352_v23 = vmul.f32 %v351_v17, %v349_v15  ;;  %v355_v24 = vmul.f32 %v351_v17, %v350_v16  ;;  %444 = vst.msk [vmem:[#allocation13 + $0x22] sm:$0x1] %vm1255_vm5, %v349_v15 }
  0x77   :  { %402 = vst [vmem:[#allocation1] sm:$0xff] %v1234_v0  ;;  %v385_v27 = vmul.f32 %v383_v18, %v1394_v60 }
  0x78   :  { %445 = vst.msk [vmem:[#allocation13 + $0x23] sm:$0x1] %vm1255_vm5, %v350_v16  ;;  %v353_v30 = vadd.f32 %v352_v23, %v1357_v36  ;;  %v356_v31 = vadd.f32 %v355_v24, %v1366_v43  ;;  %v359_v32 = vmul.f32 %v358_v21, %v287_v56  ;;  %v362_v9 = vsub.f32 %v1386_v57, %v361_v22 }
  0x79   :  { %v386_v14 = vsub.f32 1.0, %v385_v27  ;;  %v364_v34 = vmul.f32 %v358_v21, %v1375_v51  ;;  %v1466_v23 = vrot.slane %v447_v1, 2 }
  0x7a   :  { %v354_v11 = vsel %vm1407_vm15, %v353_v30, %v1357_v36  ;;  %v357_v38 = vsel %vm1407_vm15, %v356_v31, %v1366_v43  ;;  %v360_v39 = vsel %vm1407_vm15, %v359_v32, %v287_v56  ;;  %v363_v43 = vsel %vm1407_vm15, %v362_v9, %v1386_v57 }
  0x7b   :  { %v387_v42 = vmul.f32 %v369_v7, %v354_v11  ;;  %434 = vst.msk [vmem:[#allocation13 + $0x18] sm:$0x1] %vm1255_vm5, %v354_v11  ;;  %v388_v35 = vmul.f32 %v374_v19, %v357_v38  ;;  %v391_v44 = vmul.f32 %v386_v14, %v357_v38  ;;  %v390_v46 = vmul.f32 %v380_v26, %v354_v11 }
  0x7c   :  { %435 = vst.msk [vmem:[#allocation13 + $0x19] sm:$0x1] %vm1255_vm5, %v357_v38  ;;  %v394_v36 = vmul.f32 %v393_v28, %v360_v39  ;;  %v365_v50 = vsel %vm1407_vm15, %v364_v34, %v1375_v51  ;;  %v411_v54 = vmul.f32 %v410_v29, %v386_v14  ;;  %v425_v55 = vmul.f32 %v386_v14, %v369_v7 }
  0x7d   :  { %v1433_v48 = vadd.f32 %v388_v35, %v387_v42  ;;  %438 = vst.msk [vmem:[#allocation13 + $0x1c] sm:$0x1] %vm1255_vm5, %v360_v39  ;;  %v397_v53 = vmul.f32 %v396_v40, %v365_v50  ;;  %v1441_v56 = vadd.f32 %v391_v44, %v390_v46  ;;  %v409_v57 = vmul.f32 %v408_v45, %v360_v39 }
  0x7e   :  { %v404_v47 = vld [vmem:[#allocation1 + $0x4] ss:$9 sm:$0xff]  ;;  %v400_v58 = vmul.f32 %v399_v33, %v363_v43  ;;  %v414_v59 = vmul.f32 %v386_v14, %v386_v14  ;;  %v430_v37 = vmul.f32 %v386_v14, %v374_v19  ;;  %439 = vst.msk [vmem:[#allocation13 + $0x1d] sm:$0x1] %vm1255_vm5, %v363_v43  ;;  %v412_v61 = vmul.f32 %v411_v54, %v365_v50 }
  0x7f   :  { %417 = vst [vmem:[#allocation1] sm:$0xff] %v1234_v0  ;;  %v398_v51 = vadd.f32 %v397_v53, %v394_v36  ;;  %v427_v62 = vadd.f32 %v426_v52, %v425_v55  ;;  %v406_v63 = vmul.f32 %v404_v47, %v1394_v60  ;;  %v424_v3 = vmul.f32 %v423_v49, %v360_v39 }
  0x80   :  { %436 = vst.msk [vmem:[#allocation13 + $0x1a] sm:$0x1] %vm1255_vm5, %v1433_v48  ;;  %v413_v6 = vadd.f32 %v412_v61, %v409_v57  ;;  %v415_v7 = vmul.f32 %v414_v59, %v363_v43  ;;  %v431_v8 = vmul.f32 %v430_v37, %v363_v43  ;;  %v488_v27 = vmul.f32 %v1466_v23, %v1234_v0 }
  0x81   :  { %440 = vst.msk [vmem:[#allocation13 + $0x1e] sm:$0x1] %vm1255_vm5, %v365_v50  ;;  %v401_v4 = vadd.f32 %v400_v58, %v398_v51  ;;  %v428_v5 = vmul.f32 %v427_v62, %v365_v50  ;;  %v449_v14 = vrot.slane %v447_v1, 3  ;;  %v495_v34 = vsub.f32 0.0, %v1466_v23 }
  0x82   :  { %437 = vst.msk [vmem:[#allocation13 + $0x1b] sm:$0x1] %vm1255_vm5, %v1441_v56  ;;  %v416_v16 = vadd.f32 %v415_v7, %v413_v6  ;;  %v489_v33 = vsub.f32 1.0, %v488_v27  ;;  %v471_v39 = vsub.f32 %v447_v1, %v1433_v48 }
  0x83   :  { %v429_v10 = vadd.f32 %v428_v5, %v424_v3  ;;  %v407_v12 = vadd.f32 %v406_v63, %v401_v4  ;;  %vm1479_vm4 = vcmp.gt.f32.partialorder %v449_v14, 0.5 }
  0x84   :  { %v515_v43 = vmul.f32 2.0, %v489_v33  ;;  %v513_v54 = vmul.f32 %v489_v33, %v489_v33 }
  0x85   :  { %v1455_v15 = vadd.f32 %v431_v8, %v429_v10  ;;  %v454_v18 = vadd.f32 %v452_v2, %v407_v12  ;;  %441 = vst.msk [vmem:[#allocation13 + $0x1f] sm:$0x1] %vm1255_vm5, %v407_v12 }
  0x86   :  { %v419_v13 = vld [vmem:[#allocation1 + $0x5] ss:$9 sm:$0xff] }
  0x87   :  { %490 = vst [vmem:[#allocation1] sm:$0xff] %v1234_v0  ;;  %v421_v17 = vmul.f32 %v419_v13, %v1394_v60  ;;  %1085 = vrcp.f32 %v454_v18  ;;  %v466_v24 = vand.u32 2147483648, %v454_v18  ;;  %v464_v26 = vand.u32 2147483647, %v454_v18 }
  0x88   :  { %443 = vst.msk [vmem:[#allocation13 + $0x21] sm:$0x1] %vm1255_vm5, %v1455_v15  ;;  %vm460_vm1 = vweird.f32 %v454_v18 }
  0x89   :  { %v422_v19 = vadd.f32 %v421_v17, %v416_v16  ;;  %v467_v31 = vor.u32 1.1754944e-38, %v466_v24  ;;  %vm465_vm3 = vcmp.eq.f32.partialorder %v464_v26, 8.507059e+37 }
  0x8b   :  { %442 = vst.msk [vmem:[#allocation13 + $0x20] sm:$0x1] %vm1255_vm5, %v422_v19 }
  0x8d   :  { %v1086_v21 = vpop.eup %1085 }
  0x8e   :  { %v492_v20 = vld [vmem:[#allocation1 + $0x1] ss:$9 sm:$0xff]  ;;  %v456_v22 = vmul.f32 %v1086_v21, %v454_v18  ;;  %vm461_vm0 = vweird.f32 %v1086_v21 }
  0x8f   :  { %496 = vst [vmem:[#allocation1] sm:$0xff] %v1234_v0  ;;  %vm462_vm2 = vmor %vm460_vm1, %vm461_vm0  ;;  %v494_v36 = vmul.f32 %v492_v20, %v1466_v23 }
  0x90   :  { %v457_v60 = vsub.f32 1.0, %v456_v22 }
  0x91   :  { %v519_v8 = vmul.f32 %v494_v36, %v494_v36 }
  0x92   :  { %v458_v25 = vmul.f32 %v1086_v21, %v457_v60 }
  0x94   :  { %v459_v30 = vadd.f32 %v1086_v21, %v458_v25  ;;  %v567_v25 = vld [vmem:[#allocation7 + $0x10] sm:$0xf] }
  0x96   :  { %v498_v28 = vld [vmem:[#allocation1 + $0x2] ss:$9 sm:$0xff]  ;;  %v463_v32 = vsel %vm462_vm2, %v1086_v21, %v459_v30  ;;  %v572_v30 = vrot.slane %v567_v25, 1 }
  0x97   :  { %501 = vst [vmem:[#allocation1] sm:$0xff] %v1234_v0  ;;  %v468_v9 = vsel %vm465_vm3, %v467_v31, %v463_v32  ;;  %v500_v46 = vmul.f32 %v498_v28, %v495_v34 }
  0x98   :  { %v469_v11 = vmul.f32 %v468_v9, %v407_v12  ;;  %v470_v38 = vmul.f32 %v468_v9, %v1455_v15 }
  0x99   :  { %v530_v63 = vmul.f32 2.0, %v500_v46  ;;  %v546_v7 = vmul.f32 %v500_v46, %v494_v36  ;;  %v528_v16 = vmul.f32 %v500_v46, %v500_v46  ;;  %v543_v17 = vmul.f32 %v500_v46, %v489_v33 }
  0x9a   :  { %v478_v40 = vsub.f32 1.0, %v469_v11  ;;  %564 = vst.msk [vmem:[#allocation13 + $0x2e] sm:$0x1] %vm1255_vm5, %v469_v11  ;;  %v481_v42 = vmul.f32 %v470_v38, %v1455_v15  ;;  %v472_v35 = vmul.f32 %v471_v39, %v469_v11  ;;  %v475_v44 = vmul.f32 %v471_v39, %v470_v38 }
  0x9b   :  { %565 = vst.msk [vmem:[#allocation13 + $0x2f] sm:$0x1] %vm1255_vm5, %v470_v38 }
  0x9c   :  { %v473_v47 = vadd.f32 %v472_v35, %v1433_v48  ;;  %v476_v49 = vadd.f32 %v475_v44, %v1441_v56  ;;  %v479_v50 = vmul.f32 %v478_v40, %v407_v12  ;;  %v482_v52 = vsub.f32 %v422_v19, %v481_v42 }
  0x9d   :  { %v484_v59 = vmul.f32 %v478_v40, %v1455_v15 }
  0x9e   :  { %v503_v29 = vld [vmem:[#allocation1 + $0x3] ss:$9 sm:$0xff]  ;;  %v474_v55 = vsel %vm1479_vm4, %v473_v47, %v1433_v48  ;;  %v477_v57 = vsel %vm1479_vm4, %v476_v49, %v1441_v56  ;;  %v480_v58 = vsel %vm1479_vm4, %v479_v50, %v407_v12  ;;  %v483_v62 = vsel %vm1479_vm4, %v482_v52, %v422_v19 }
  0x9f   :  { %522 = vst [vmem:[#allocation1] sm:$0xff] %v1234_v0  ;;  %v505_v53 = vmul.f32 %v503_v29, %v1466_v23  ;;  %v507_v37 = vmul.f32 %v489_v33, %v474_v55  ;;  %v508_v61 = vmul.f32 %v494_v36, %v477_v57  ;;  %v516_v48 = vmul.f32 %v515_v43, %v494_v36 }
  0xa0   :  { %554 = vst.msk [vmem:[#allocation13 + $0x24] sm:$0x1] %vm1255_vm5, %v474_v55  ;;  %v510_v56 = vmul.f32 %v500_v46, %v474_v55  ;;  %v514_v3 = vmul.f32 %v513_v54, %v480_v58  ;;  %v485_v4 = vsel %vm1479_vm4, %v484_v59, %v1455_v15  ;;  %v520_v15 = vmul.f32 %v519_v8, %v483_v62 }
  0xa1   :  { %v506_v51 = vsub.f32 1.0, %v505_v53  ;;  %555 = vst.msk [vmem:[#allocation13 + $0x25] sm:$0x1] %vm1255_vm5, %v477_v57  ;;  %v1503_v1 = vadd.f32 %v508_v61, %v507_v37  ;;  %v517_v10 = vmul.f32 %v516_v48, %v485_v4  ;;  %v544_v60 = vmul.f32 %v543_v17, %v480_v58 }
  0xa2   :  { %558 = vst.msk [vmem:[#allocation13 + $0x28] sm:$0x1] %vm1255_vm5, %v480_v58  ;;  %v529_v26 = vmul.f32 %v528_v16, %v480_v58  ;;  %v1536_v46 = vrot.slane %v567_v25, 2  ;;  %v569_v55 = vrot.slane %v567_v25, 3 }
  0xa3   :  { %v511_v2 = vmul.f32 %v506_v51, %v477_v57  ;;  %559 = vst.msk [vmem:[#allocation13 + $0x29] sm:$0x1] %vm1255_vm5, %v483_v62  ;;  %v531_v5 = vmul.f32 %v530_v63, %v506_v51  ;;  %v545_v6 = vmul.f32 %v506_v51, %v489_v33  ;;  %v550_v18 = vmul.f32 %v506_v51, %v494_v36 }
  0xa4   :  { %556 = vst.msk [vmem:[#allocation13 + $0x26] sm:$0x1] %vm1255_vm5, %v1503_v1  ;;  %v518_v20 = vadd.f32 %v517_v10, %v514_v3  ;;  %v534_v27 = vmul.f32 %v506_v51, %v506_v51  ;;  %v591_v37 = vsub.f32 %v567_v25, %v1503_v1  ;;  %v615_v51 = vsub.f32 0.0, %v1536_v46 }
  0xa5   :  { %v1515_v12 = vadd.f32 %v511_v2, %v510_v56  ;;  %v547_v19 = vadd.f32 %v546_v7, %v545_v6  ;;  %560 = vst.msk [vmem:[#allocation13 + $0x2a] sm:$0x1] %vm1255_vm5, %v485_v4  ;;  %v532_v21 = vmul.f32 %v531_v5, %v485_v4  ;;  %v551_v31 = vmul.f32 %v550_v18, %v483_v62 }
  0xa6   :  { %v524_v13 = vld [vmem:[#allocation1 + $0x4] ss:$9 sm:$0xff]  ;;  %v521_v28 = vadd.f32 %v520_v15, %v518_v20  ;;  %v535_v34 = vmul.f32 %v534_v27, %v483_v62  ;;  %vm1549_vm10 = vcmp.gt.f32.partialorder %v569_v55, 0.5 }
  0xa7   :  { %537 = vst [vmem:[#allocation1] sm:$0xff] %v1234_v0  ;;  %v526_v22 = vmul.f32 %v524_v13, %v1466_v23  ;;  %v548_v24 = vmul.f32 %v547_v19, %v485_v4  ;;  %v533_v14 = vadd.f32 %v532_v21, %v529_v26 }
  0xa8   :  { %557 = vst.msk [vmem:[#allocation13 + $0x27] sm:$0x1] %vm1255_vm5, %v1515_v12 }
  0xa9   :  { %v549_v32 = vadd.f32 %v548_v24, %v544_v60  ;;  %v527_v9 = vadd.f32 %v526_v22, %v521_v28  ;;  %v536_v39 = vadd.f32 %v535_v34, %v533_v14 }
  0xab   :  { %v1524_v33 = vadd.f32 %v551_v31, %v549_v32  ;;  %561 = vst.msk [vmem:[#allocation13 + $0x2b] sm:$0x1] %vm1255_vm5, %v527_v9  ;;  %v574_v11 = vadd.f32 %v572_v30, %v527_v9 }
  0xad   :  { %563 = vst.msk [vmem:[#allocation13 + $0x2d] sm:$0x1] %vm1255_vm5, %v1524_v33  ;;  %1087 = vrcp.f32 %v574_v11  ;;  %v586_v43 = vand.u32 2147483648, %v574_v11  ;;  %v584_v47 = vand.u32 2147483647, %v574_v11  ;;  %vm580_vm7 = vweird.f32 %v574_v11 }
  0xae   :  { %v539_v38 = vld [vmem:[#allocation1 + $0x5] ss:$9 sm:$0xff] }
  0xaf   :  { %610 = vst [vmem:[#allocation1] sm:$0xff] %v1234_v0  ;;  %v541_v40 = vmul.f32 %v539_v38, %v1466_v23  ;;  %v608_v23 = vmul.f32 %v1536_v46, %v1234_v0  ;;  %v587_v50 = vor.u32 1.1754944e-38, %v586_v43  ;;  %vm585_vm9 = vcmp.eq.f32.partialorder %v584_v47, 8.507059e+37  ;;  %v1589_v38 = vld [vmem:[#allocation7 + $0x14] sm:$0xf] }
  0xb0   :  { %v1609_v56 = vrot.slane %v1589_v38, 2 }
  0xb1   :  { %v542_v42 = vadd.f32 %v541_v40, %v536_v39  ;;  %v609_v57 = vsub.f32 1.0, %v608_v23 }
  0xb3   :  { %562 = vst.msk [vmem:[#allocation13 + $0x2c] sm:$0x1] %vm1255_vm5, %v542_v42  ;;  %v1088_v35 = vpop.eup %1087  ;;  %v633_v3 = vmul.f32 %v609_v57, %v609_v57  ;;  %v635_v4 = vmul.f32 2.0, %v609_v57 }
  0xb4   :  { %v576_v45 = vmul.f32 %v1088_v35, %v574_v11  ;;  %vm581_vm6 = vweird.f32 %v1088_v35 }
  0xb5   :  { %vm582_vm8 = vmor %vm580_vm7, %vm581_vm6 }
  0xb6   :  { %v612_v44 = vld [vmem:[#allocation1 + $0x1] ss:$9 sm:$0xff]  ;;  %v577_v36 = vsub.f32 1.0, %v576_v45 }
  0xb7   :  { %616 = vst [vmem:[#allocation1] sm:$0xff] %v1234_v0  ;;  %v614_v2 = vmul.f32 %v612_v44, %v1536_v46  ;;  %v692_v44 = vrot.slane %v1589_v38, 1 }
  0xb8   :  { %v578_v29 = vmul.f32 %v1088_v35, %v577_v36 }
  0xb9   :  { %v636_v60 = vmul.f32 %v635_v4, %v614_v2  ;;  %v639_v31 = vmul.f32 %v614_v2, %v614_v2 }
  0xba   :  { %v579_v49 = vadd.f32 %v1088_v35, %v578_v29 }
  0xbc   :  { %v583_v53 = vsel %vm582_vm8, %v1088_v35, %v579_v49 }
  0xbd   :  { %v588_v54 = vsel %vm585_vm9, %v587_v50, %v583_v53 }
  0xbe   :  { %v618_v52 = vld [vmem:[#allocation1 + $0x2] ss:$9 sm:$0xff]  ;;  %v589_v58 = vmul.f32 %v588_v54, %v527_v9  ;;  %v590_v59 = vmul.f32 %v588_v54, %v1524_v33 }
  0xbf   :  { %621 = vst [vmem:[#allocation1] sm:$0xff] %v1234_v0  ;;  %v620_v6 = vmul.f32 %v618_v52, %v615_v51 }
  0xc0   :  { %v598_v61 = vsub.f32 1.0, %v589_v58  ;;  %684 = vst.msk [vmem:[#allocation13 + $0x3a] sm:$0x1] %vm1255_vm5, %v589_v58  ;;  %v601_v62 = vmul.f32 %v590_v59, %v1524_v33  ;;  %v592_v48 = vmul.f32 %v591_v37, %v589_v58  ;;  %v595_v63 = vmul.f32 %v591_v37, %v590_v59 }
  0xc1   :  { %685 = vst.msk [vmem:[#allocation13 + $0x3b] sm:$0x1] %vm1255_vm5, %v590_v59  ;;  %v650_v24 = vmul.f32 2.0, %v620_v6  ;;  %v666_v34 = vmul.f32 %v620_v6, %v614_v2  ;;  %v663_v40 = vmul.f32 %v620_v6, %v609_v57  ;;  %v648_v45 = vmul.f32 %v620_v6, %v620_v6 }
  0xc2   :  { %v593_v5 = vadd.f32 %v592_v48, %v1503_v1  ;;  %v596_v7 = vadd.f32 %v595_v63, %v1515_v12  ;;  %v599_v8 = vmul.f32 %v598_v61, %v527_v9  ;;  %v602_v10 = vsub.f32 %v542_v42, %v601_v62 }
  0xc3   :  { %v604_v13 = vmul.f32 %v598_v61, %v1524_v33 }
  0xc4   :  { %v594_v17 = vsel %vm1549_vm10, %v593_v5, %v1503_v1  ;;  %v597_v18 = vsel %vm1549_vm10, %v596_v7, %v1515_v12  ;;  %v600_v19 = vsel %vm1549_vm10, %v599_v8, %v527_v9  ;;  %v603_v12 = vsel %vm1549_vm10, %v602_v10, %v542_v42 }
  0xc5   :  { %v627_v15 = vmul.f32 %v609_v57, %v594_v17  ;;  %v628_v21 = vmul.f32 %v614_v2, %v597_v18  ;;  %674 = vst.msk [vmem:[#allocation13 + $0x30] sm:$0x1] %vm1255_vm5, %v594_v17  ;;  %v634_v22 = vmul.f32 %v633_v3, %v600_v19  ;;  %v605_v26 = vsel %vm1549_vm10, %v604_v13, %v1524_v33 }
  0xc6   :  { %v623_v16 = vld [vmem:[#allocation1 + $0x3] ss:$9 sm:$0xff]  ;;  %675 = vst.msk [vmem:[#allocation13 + $0x31] sm:$0x1] %vm1255_vm5, %v597_v18  ;;  %v637_v27 = vmul.f32 %v636_v60, %v605_v26  ;;  %v630_v28 = vmul.f32 %v620_v6, %v594_v17  ;;  %v640_v11 = vmul.f32 %v639_v31, %v603_v12  ;;  %v664_v47 = vmul.f32 %v663_v40, %v600_v19 }
  0xc7   :  { %642 = vst [vmem:[#allocation1] sm:$0xff] %v1234_v0  ;;  %v625_v20 = vmul.f32 %v623_v16, %v1536_v46  ;;  %v1569_v25 = vadd.f32 %v628_v21, %v627_v15  ;;  %v649_v49 = vmul.f32 %v648_v45, %v600_v19  ;;  %v689_v16 = vrot.slane %v1589_v38, 3 }
  0xc8   :  { %678 = vst.msk [vmem:[#allocation13 + $0x34] sm:$0x1] %vm1255_vm5, %v600_v19  ;;  %v638_v9 = vadd.f32 %v637_v27, %v634_v22 }
  0xc9   :  { %v626_v1 = vsub.f32 1.0, %v625_v20  ;;  %676 = vst.msk [vmem:[#allocation13 + $0x32] sm:$0x1] %vm1255_vm5, %v1569_v25  ;;  %v711_v20 = vsub.f32 %v1589_v38, %v1569_v25  ;;  %vm1624_vm15 = vcmp.gt.f32.partialorder %v689_v16, 0.5 }
  0xca   :  { %679 = vst.msk [vmem:[#allocation13 + $0x35] sm:$0x1] %vm1255_vm5, %v603_v12  ;;  %v641_v36 = vadd.f32 %v640_v11, %v638_v9 }
  0xcb   :  { %v631_v30 = vmul.f32 %v626_v1, %v597_v18  ;;  %v651_v32 = vmul.f32 %v650_v24, %v626_v1  ;;  %v665_v14 = vmul.f32 %v626_v1, %v609_v57  ;;  %680 = vst.msk [vmem:[#allocation13 + $0x36] sm:$0x1] %vm1255_vm5, %v605_v26  ;;  %v670_v42 = vmul.f32 %v626_v1, %v614_v2 }
  0xcc   :  { %v654_v50 = vmul.f32 %v626_v1, %v626_v1 }
  0xcd   :  { %v1587_v33 = vadd.f32 %v631_v30, %v630_v28  ;;  %v667_v35 = vadd.f32 %v666_v34, %v665_v14  ;;  %v652_v43 = vmul.f32 %v651_v32, %v605_v26  ;;  %v671_v53 = vmul.f32 %v670_v42, %v603_v12 }
  0xce   :  { %v644_v39 = vld [vmem:[#allocation1 + $0x4] ss:$9 sm:$0xff]  ;;  %v655_v59 = vmul.f32 %v654_v50, %v603_v12  ;;  %v735_v12 = vsub.f32 0.0, %v1609_v56 }
  0xcf   :  { %657 = vst [vmem:[#allocation1] sm:$0xff] %v1234_v0  ;;  %v646_v29 = vmul.f32 %v644_v39, %v1536_v46  ;;  %v668_v23 = vmul.f32 %v667_v35, %v605_v26  ;;  %v653_v55 = vadd.f32 %v652_v43, %v649_v49 }
  0xd0   :  { %677 = vst.msk [vmem:[#allocation13 + $0x33] sm:$0x1] %vm1255_vm5, %v1587_v33 }
  0xd1   :  { %v647_v52 = vadd.f32 %v646_v29, %v641_v36  ;;  %v669_v54 = vadd.f32 %v668_v23, %v664_v47  ;;  %v656_v51 = vadd.f32 %v655_v59, %v653_v55 }
  0xd3   :  { %681 = vst.msk [vmem:[#allocation13 + $0x37] sm:$0x1] %vm1255_vm5, %v647_v52  ;;  %v694_v57 = vadd.f32 %v692_v44, %v647_v52  ;;  %v1599_v58 = vadd.f32 %v671_v53, %v669_v54 }
  0xd5   :  { %1089 = vrcp.f32 %v694_v57  ;;  %683 = vst.msk [vmem:[#allocation13 + $0x39] sm:$0x1] %vm1255_vm5, %v1599_v58  ;;  %v706_v4 = vand.u32 2147483648, %v694_v57  ;;  %v704_v6 = vand.u32 2147483647, %v694_v57  ;;  %vm700_vm12 = vweird.f32 %v694_v57 }
  0xd6   :  { %v659_v37 = vld [vmem:[#allocation1 + $0x5] ss:$9 sm:$0xff] }
  0xd7   :  { %730 = vst [vmem:[#allocation1] sm:$0xff] %v1234_v0  ;;  %v661_v61 = vmul.f32 %v659_v37, %v1536_v46  ;;  %v728_v46 = vmul.f32 %v1609_v56, %v1234_v0  ;;  %v707_v8 = vor.u32 1.1754944e-38, %v706_v4  ;;  %vm705_vm14 = vcmp.eq.f32.partialorder %v704_v6, 8.507059e+37  ;;  %v1665_v37 = vld [vmem:[#allocation7 + $0x18] sm:$0xf] }
  0xd9   :  { %v662_v62 = vadd.f32 %v661_v61, %v656_v51  ;;  %v729_v17 = vsub.f32 1.0, %v728_v46 }
  0xdb   :  { %v1090_v48 = vpop.eup %1089  ;;  %682 = vst.msk [vmem:[#allocation13 + $0x38] sm:$0x1] %vm1255_vm5, %v662_v62  ;;  %v755_v27 = vmul.f32 2.0, %v729_v17  ;;  %v753_v9 = vmul.f32 %v729_v17, %v729_v17 }
  0xdc   :  { %v696_v63 = vmul.f32 %v1090_v48, %v694_v57  ;;  %vm701_vm11 = vweird.f32 %v1090_v48 }
  0xdd   :  { %vm702_vm13 = vmor %vm700_vm12, %vm701_vm11 }
  0xde   :  { %v732_v2 = vld [vmem:[#allocation1 + $0x1] ss:$9 sm:$0xff]  ;;  %v697_v3 = vsub.f32 1.0, %v696_v63  ;;  %v812_v63 = vrot.slane %v1665_v37, 1 }
  0xdf   :  { %736 = vst [vmem:[#allocation1] sm:$0xff] %v1234_v0  ;;  %v734_v26 = vmul.f32 %v732_v2, %v1609_v56 }
  0xe0   :  { %v698_v5 = vmul.f32 %v1090_v48, %v697_v3 }
  0xe1   :  { %v756_v42 = vmul.f32 %v755_v27, %v734_v26 }
  0xe2   :  { %v699_v7 = vadd.f32 %v1090_v48, %v698_v5 }
  0xe4   :  { %v703_v10 = vsel %vm702_vm13, %v1090_v48, %v699_v7 }
  0xe5   :  { %v708_v13 = vsel %vm705_vm14, %v707_v8, %v703_v10 }
  0xe6   :  { %v738_v18 = vld [vmem:[#allocation1 + $0x2] ss:$9 sm:$0xff]  ;;  %v709_v19 = vmul.f32 %v708_v13, %v647_v52  ;;  %v710_v15 = vmul.f32 %v708_v13, %v1599_v58 }
  0xe7   :  { %741 = vst [vmem:[#allocation1] sm:$0xff] %v1234_v0  ;;  %v740_v44 = vmul.f32 %v738_v18, %v735_v12  ;;  %v1685_v12 = vrot.slane %v1665_v37, 2 }
  0xe8   :  { %v718_v21 = vsub.f32 1.0, %v709_v19  ;;  %804 = vst.msk [vmem:[#allocation13 + $0x46] sm:$0x1] %vm1255_vm5, %v709_v19  ;;  %v721_v22 = vmul.f32 %v710_v15, %v1599_v58  ;;  %v712_v60 = vmul.f32 %v711_v20, %v709_v19  ;;  %v715_v24 = vmul.f32 %v711_v20, %v710_v15 }
  0xe9   :  { %805 = vst.msk [vmem:[#allocation13 + $0x47] sm:$0x1] %vm1255_vm5, %v710_v15  ;;  %v770_v23 = vmul.f32 2.0, %v740_v44  ;;  %v786_v57 = vmul.f32 %v740_v44, %v734_v26  ;;  %v783_v61 = vmul.f32 %v740_v44, %v729_v17  ;;  %v768_v2 = vmul.f32 %v740_v44, %v740_v44 }
  0xea   :  { %v713_v28 = vadd.f32 %v712_v60, %v1569_v25  ;;  %v716_v30 = vadd.f32 %v715_v24, %v1587_v33  ;;  %v719_v31 = vmul.f32 %v718_v21, %v647_v52  ;;  %v722_v32 = vsub.f32 %v662_v62, %v721_v22 }
  0xeb   :  { %v724_v14 = vmul.f32 %v718_v21, %v1599_v58 }
  0xec   :  { %v714_v34 = vsel %vm1624_vm15, %v713_v28, %v1569_v25  ;;  %v717_v11 = vsel %vm1624_vm15, %v716_v30, %v1587_v33  ;;  %v720_v38 = vsel %vm1624_vm15, %v719_v31, %v647_v52  ;;  %v723_v25 = vsel %vm1624_vm15, %v722_v32, %v662_v62 }
  0xed   :  { %v747_v39 = vmul.f32 %v729_v17, %v714_v34  ;;  %794 = vst.msk [vmem:[#allocation13 + $0x3c] sm:$0x1] %vm1255_vm5, %v714_v34  ;;  %v748_v40 = vmul.f32 %v734_v26, %v717_v11  ;;  %v725_v33 = vsel %vm1624_vm15, %v724_v14, %v1599_v58  ;;  %v754_v43 = vmul.f32 %v753_v9, %v720_v38 }
  0xee   :  { %v743_v35 = vld [vmem:[#allocation1 + $0x3] ss:$9 sm:$0xff]  ;;  %795 = vst.msk [vmem:[#allocation13 + $0x3d] sm:$0x1] %vm1255_vm5, %v717_v11  ;;  %v757_v29 = vmul.f32 %v756_v42, %v725_v33  ;;  %v750_v49 = vmul.f32 %v740_v44, %v714_v34  ;;  %v759_v52 = vmul.f32 %v734_v26, %v734_v26  ;;  %v784_v6 = vmul.f32 %v783_v61, %v720_v38 }
  0xef   :  { %762 = vst [vmem:[#allocation1] sm:$0xff] %v1234_v0  ;;  %v745_v45 = vmul.f32 %v743_v35, %v1609_v56  ;;  %v1652_v36 = vadd.f32 %v748_v40, %v747_v39  ;;  %v769_v7 = vmul.f32 %v768_v2, %v720_v38 }
  0xf0   :  { %798 = vst.msk [vmem:[#allocation13 + $0x40] sm:$0x1] %vm1255_vm5, %v720_v38  ;;  %v758_v53 = vadd.f32 %v757_v29, %v754_v43  ;;  %v760_v58 = vmul.f32 %v759_v52, %v723_v25  ;;  %v855_v29 = vsub.f32 0.0, %v1685_v12 }
  0xf1   :  { %v746_v47 = vsub.f32 1.0, %v745_v45  ;;  %796 = vst.msk [vmem:[#allocation13 + $0x3e] sm:$0x1] %vm1255_vm5, %v1652_v36  ;;  %v831_v35 = vsub.f32 %v1665_v37, %v1652_v36 }
  0xf2   :  { %799 = vst.msk [vmem:[#allocation13 + $0x41] sm:$0x1] %vm1255_vm5, %v723_v25  ;;  %v761_v3 = vadd.f32 %v760_v58, %v758_v53 }
  0xf3   :  { %v751_v50 = vmul.f32 %v746_v47, %v717_v11  ;;  %800 = vst.msk [vmem:[#allocation13 + $0x42] sm:$0x1] %vm1255_vm5, %v725_v33  ;;  %v771_v54 = vmul.f32 %v770_v23, %v746_v47  ;;  %v785_v55 = vmul.f32 %v746_v47, %v729_v17  ;;  %v790_v62 = vmul.f32 %v746_v47, %v734_v26 }
  0xf4   :  { %v774_v8 = vmul.f32 %v746_v47, %v746_v47  ;;  %v809_v11 = vrot.slane %v1665_v37, 3 }
  0xf5   :  { %v1663_v59 = vadd.f32 %v751_v50, %v750_v49  ;;  %v787_v48 = vadd.f32 %v786_v57, %v785_v55  ;;  %v772_v4 = vmul.f32 %v771_v54, %v725_v33  ;;  %v791_v13 = vmul.f32 %v790_v62, %v723_v25 }
  0xf6   :  { %v764_v51 = vld [vmem:[#allocation1 + $0x4] ss:$9 sm:$0xff]  ;;  %v775_v15 = vmul.f32 %v774_v8, %v723_v25  ;;  %vm1700_vm4 = vcmp.gt.f32.partialorder %v809_v11, 0.5 }
  0xf7   :  { %777 = vst [vmem:[#allocation1] sm:$0xff] %v1234_v0  ;;  %v766_v5 = vmul.f32 %v764_v51, %v1609_v56  ;;  %v788_v46 = vmul.f32 %v787_v48, %v725_v33  ;;  %v773_v17 = vadd.f32 %v772_v4, %v769_v7 }
  0xf8   :  { %797 = vst.msk [vmem:[#allocation13 + $0x3f] sm:$0x1] %vm1255_vm5, %v1663_v59 }
  0xf9   :  { %v767_v10 = vadd.f32 %v766_v5, %v761_v3  ;;  %v789_v16 = vadd.f32 %v788_v46, %v784_v6  ;;  %v776_v21 = vadd.f32 %v775_v15, %v773_v17 }
  0xfb   :  { %801 = vst.msk [vmem:[#allocation13 + $0x43] sm:$0x1] %vm1255_vm5, %v767_v10  ;;  %v814_v18 = vadd.f32 %v812_v63, %v767_v10  ;;  %v1675_v19 = vadd.f32 %v791_v13, %v789_v16 }
  0xfd   :  { %1091 = vrcp.f32 %v814_v18  ;;  %803 = vst.msk [vmem:[#allocation13 + $0x45] sm:$0x1] %vm1255_vm5, %v1675_v19  ;;  %v826_v28 = vand.u32 2147483648, %v814_v18  ;;  %v824_v31 = vand.u32 2147483647, %v814_v18  ;;  %vm820_vm1 = vweird.f32 %v814_v18 }
  0xfe   :  { %v779_v20 = vld [vmem:[#allocation1 + $0x5] ss:$9 sm:$0xff] }
  0xff   :  { %850 = vst [vmem:[#allocation1] sm:$0xff] %v1234_v0  ;;  %v781_v22 = vmul.f32 %v779_v20, %v1609_v56  ;;  %v848_v56 = vmul.f32 %v1685_v12, %v1234_v0  ;;  %v827_v9 = vor.u32 1.1754944e-38, %v826_v28  ;;  %vm825_vm3 = vcmp.eq.f32.partialorder %v824_v31, 8.507059e+37  ;;  %v1741_v20 = vld [vmem:[#allocation7 + $0x1c] sm:$0xf] }
 0x101   :  { %v782_v60 = vadd.f32 %v781_v22, %v776_v21  ;;  %v849_v38 = vsub.f32 1.0, %v848_v56 }
 0x103   :  { %v1092_v24 = vpop.eup %1091  ;;  %802 = vst.msk [vmem:[#allocation13 + $0x44] sm:$0x1] %vm1255_vm5, %v782_v60  ;;  %v875_v23 = vmul.f32 2.0, %v849_v38  ;;  %v873_v54 = vmul.f32 %v849_v38, %v849_v38 }
 0x104   :  { %v816_v1 = vmul.f32 %v1092_v24, %v814_v18  ;;  %vm821_vm0 = vweird.f32 %v1092_v24 }
 0x105   :  { %vm822_vm2 = vmor %vm820_vm1, %vm821_vm0 }
 0x106   :  { %v852_v26 = vld [vmem:[#allocation1 + $0x1] ss:$9 sm:$0xff]  ;;  %v817_v27 = vsub.f32 1.0, %v816_v1  ;;  %v932_v1 = vrot.slane %v1741_v20, 1 }
 0x107   :  { %856 = vst [vmem:[#allocation1] sm:$0xff] %v1234_v0  ;;  %v854_v47 = vmul.f32 %v852_v26, %v1685_v12 }
 0x108   :  { %v818_v30 = vmul.f32 %v1092_v24, %v817_v27 }
 0x109   :  { %v876_v62 = vmul.f32 %v875_v23, %v854_v47 }
 0x10a   :  { %v819_v32 = vadd.f32 %v1092_v24, %v818_v30 }
 0x10c   :  { %v823_v14 = vsel %vm822_vm2, %v1092_v24, %v819_v32 }
 0x10d   :  { %v828_v34 = vsel %vm825_vm3, %v827_v9, %v823_v14 }
 0x10e   :  { %v858_v39 = vld [vmem:[#allocation1 + $0x2] ss:$9 sm:$0xff]  ;;  %v829_v40 = vmul.f32 %v828_v34, %v767_v10  ;;  %v830_v42 = vmul.f32 %v828_v34, %v1675_v19 }
 0x10f   :  { %861 = vst [vmem:[#allocation1] sm:$0xff] %v1234_v0  ;;  %v860_v63 = vmul.f32 %v858_v39, %v855_v29  ;;  %v1761_v29 = vrot.slane %v1741_v20, 2 }
 0x110   :  { %v838_v44 = vsub.f32 1.0, %v829_v40  ;;  %924 = vst.msk [vmem:[#allocation13 + $0x52] sm:$0x1] %vm1255_vm5, %v829_v40  ;;  %v841_v25 = vmul.f32 %v830_v42, %v1675_v19  ;;  %v832_v33 = vmul.f32 %v831_v35, %v829_v40  ;;  %v835_v45 = vmul.f32 %v831_v35, %v830_v42 }
 0x111   :  { %925 = vst.msk [vmem:[#allocation13 + $0x53] sm:$0x1] %vm1255_vm5, %v830_v42  ;;  %v890_v46 = vmul.f32 2.0, %v860_v63  ;;  %v906_v18 = vmul.f32 %v860_v63, %v854_v47  ;;  %v903_v22 = vmul.f32 %v860_v63, %v849_v38  ;;  %v888_v26 = vmul.f32 %v860_v63, %v860_v63 }
 0x112   :  { %v833_v49 = vadd.f32 %v832_v33, %v1652_v36  ;;  %v836_v50 = vadd.f32 %v835_v45, %v1663_v59  ;;  %v839_v52 = vmul.f32 %v838_v44, %v767_v10  ;;  %v842_v53 = vsub.f32 %v782_v60, %v841_v25 }
 0x113   :  { %v844_v55 = vmul.f32 %v838_v44, %v1675_v19 }
 0x114   :  { %v834_v57 = vsel %vm1700_vm4, %v833_v49, %v1652_v36  ;;  %v837_v58 = vsel %vm1700_vm4, %v836_v50, %v1663_v59  ;;  %v840_v37 = vsel %vm1700_vm4, %v839_v52, %v767_v10  ;;  %v843_v36 = vsel %vm1700_vm4, %v842_v53, %v782_v60 }
 0x115   :  { %v867_v51 = vmul.f32 %v849_v38, %v834_v57  ;;  %914 = vst.msk [vmem:[#allocation13 + $0x48] sm:$0x1] %vm1255_vm5, %v834_v57  ;;  %v868_v61 = vmul.f32 %v854_v47, %v837_v58  ;;  %v845_v59 = vsel %vm1700_vm4, %v844_v55, %v1675_v19  ;;  %v874_v4 = vmul.f32 %v873_v54, %v840_v37 }
 0x116   :  { %v863_v48 = vld [vmem:[#allocation1 + $0x3] ss:$9 sm:$0xff]  ;;  %915 = vst.msk [vmem:[#allocation13 + $0x49] sm:$0x1] %vm1255_vm5, %v837_v58  ;;  %v877_v5 = vmul.f32 %v876_v62, %v845_v59  ;;  %v870_v7 = vmul.f32 %v860_v63, %v834_v57  ;;  %v879_v10 = vmul.f32 %v854_v47, %v854_v47  ;;  %v904_v31 = vmul.f32 %v903_v22, %v840_v37 }
 0x117   :  { %882 = vst [vmem:[#allocation1] sm:$0xff] %v1234_v0  ;;  %v865_v2 = vmul.f32 %v863_v48, %v1685_v12  ;;  %v1728_v3 = vadd.f32 %v868_v61, %v867_v51  ;;  %v889_v32 = vmul.f32 %v888_v26, %v840_v37 }
 0x118   :  { %918 = vst.msk [vmem:[#allocation13 + $0x4c] sm:$0x1] %vm1255_vm5, %v840_v37  ;;  %v878_v13 = vadd.f32 %v877_v5, %v874_v4  ;;  %v880_v19 = vmul.f32 %v879_v10, %v843_v36  ;;  %v975_v5 = vsub.f32 0.0, %v1761_v29 }
 0x119   :  { %v866_v6 = vsub.f32 1.0, %v865_v2  ;;  %916 = vst.msk [vmem:[#allocation13 + $0x4a] sm:$0x1] %vm1255_vm5, %v1728_v3  ;;  %v951_v48 = vsub.f32 %v1741_v20, %v1728_v3 }
 0x11a   :  { %919 = vst.msk [vmem:[#allocation13 + $0x4d] sm:$0x1] %vm1255_vm5, %v843_v36  ;;  %v881_v27 = vadd.f32 %v880_v19, %v878_v13 }
 0x11b   :  { %v871_v8 = vmul.f32 %v866_v6, %v837_v58  ;;  %920 = vst.msk [vmem:[#allocation13 + $0x4e] sm:$0x1] %vm1255_vm5, %v845_v59  ;;  %v891_v16 = vmul.f32 %v890_v46, %v866_v6  ;;  %v905_v17 = vmul.f32 %v866_v6, %v849_v38  ;;  %v910_v60 = vmul.f32 %v866_v6, %v854_v47 }
 0x11c   :  { %v894_v9 = vmul.f32 %v866_v6, %v866_v6  ;;  %v929_v58 = vrot.slane %v1741_v20, 3 }
 0x11d   :  { %v1739_v15 = vadd.f32 %v871_v8, %v870_v7  ;;  %v907_v24 = vadd.f32 %v906_v18, %v905_v17  ;;  %v892_v28 = vmul.f32 %v891_v16, %v845_v59  ;;  %v911_v34 = vmul.f32 %v910_v60, %v843_v36 }
 0x11e   :  { %v884_v21 = vld [vmem:[#allocation1 + $0x4] ss:$9 sm:$0xff]  ;;  %v895_v42 = vmul.f32 %v894_v9, %v843_v36  ;;  %vm1776_vm10 = vcmp.gt.f32.partialorder %v929_v58, 0.5 }
 0x11f   :  { %897 = vst [vmem:[#allocation1] sm:$0xff] %v1234_v0  ;;  %v886_v30 = vmul.f32 %v884_v21, %v1685_v12  ;;  %v908_v56 = vmul.f32 %v907_v24, %v845_v59  ;;  %v893_v38 = vadd.f32 %v892_v28, %v889_v32 }
 0x120   :  { %917 = vst.msk [vmem:[#allocation13 + $0x4b] sm:$0x1] %vm1255_vm5, %v1739_v15 }
 0x121   :  { %v887_v14 = vadd.f32 %v886_v30, %v881_v27  ;;  %v909_v11 = vadd.f32 %v908_v56, %v904_v31  ;;  %v896_v44 = vadd.f32 %v895_v42, %v893_v38 }
 0x123   :  { %921 = vst.msk [vmem:[#allocation13 + $0x4f] sm:$0x1] %vm1255_vm5, %v887_v14  ;;  %v934_v39 = vadd.f32 %v932_v1, %v887_v14  ;;  %v1751_v40 = vadd.f32 %v911_v34, %v909_v11 }
 0x125   :  { %1093 = vrcp.f32 %v934_v39  ;;  %923 = vst.msk [vmem:[#allocation13 + $0x51] sm:$0x1] %vm1255_vm5, %v1751_v40  ;;  %v946_v49 = vand.u32 2147483648, %v934_v39  ;;  %v944_v52 = vand.u32 2147483647, %v934_v39  ;;  %vm940_vm7 = vweird.f32 %v934_v39 }
 0x126   :  { %v899_v35 = vld [vmem:[#allocation1 + $0x5] ss:$9 sm:$0xff] }
 0x127   :  { %970 = vst [vmem:[#allocation1] sm:$0xff] %v1234_v0  ;;  %v901_v25 = vmul.f32 %v899_v35, %v1685_v12  ;;  %v968_v12 = vmul.f32 %v1761_v29, %v1234_v0  ;;  %v947_v54 = vor.u32 1.1754944e-38, %v946_v49  ;;  %vm945_vm9 = vcmp.eq.f32.partialorder %v944_v52, 8.507059e+37 }
 0x129   :  { %v902_v33 = vadd.f32 %v901_v25, %v896_v44  ;;  %v969_v37 = vsub.f32 1.0, %v968_v12 }
 0x12b   :  { %v1094_v45 = vpop.eup %1093  ;;  %922 = vst.msk [vmem:[#allocation13 + $0x50] sm:$0x1] %vm1255_vm5, %v902_v33  ;;  %v995_v46 = vmul.f32 2.0, %v969_v37  ;;  %v993_v16 = vmul.f32 %v969_v37, %v969_v37 }
 0x12c   :  { %v936_v43 = vmul.f32 %v1094_v45, %v934_v39  ;;  %vm941_vm6 = vweird.f32 %v1094_v45 }
 0x12d   :  { %vm942_vm8 = vmor %vm940_vm7, %vm941_vm6 }
 0x12e   :  { %v972_v47 = vld [vmem:[#allocation1 + $0x1] ss:$9 sm:$0xff]  ;;  %v937_v23 = vsub.f32 1.0, %v936_v43 }
 0x12f   :  { %976 = vst [vmem:[#allocation1] sm:$0xff] %v1234_v0  ;;  %v974_v6 = vmul.f32 %v972_v47, %v1761_v29 }
 0x130   :  { %v938_v50 = vmul.f32 %v1094_v45, %v937_v23 }
 0x131   :  { %v996_v24 = vmul.f32 %v995_v46, %v974_v6  ;;  %v999_v9 = vmul.f32 %v974_v6, %v974_v6 }
 0x132   :  { %v939_v53 = vadd.f32 %v1094_v45, %v938_v50 }
 0x134   :  { %v943_v55 = vsel %vm942_vm8, %v1094_v45, %v939_v53 }
 0x135   :  { %v948_v57 = vsel %vm945_vm9, %v947_v54, %v943_v55 }
 0x136   :  { %v978_v51 = vld [vmem:[#allocation1 + $0x2] ss:$9 sm:$0xff]  ;;  %v949_v61 = vmul.f32 %v948_v57, %v887_v14  ;;  %v950_v62 = vmul.f32 %v948_v57, %v1751_v40 }
 0x137   :  { %981 = vst [vmem:[#allocation1] sm:$0xff] %v1234_v0  ;;  %v980_v21 = vmul.f32 %v978_v51, %v975_v5 }
 0x138   :  { %v958_v63 = vsub.f32 1.0, %v949_v61  ;;  %1044 = vst.msk [vmem:[#allocation13 + $0x5e] sm:$0x1] %vm1255_vm5, %v949_v61  ;;  %v961_v36 = vmul.f32 %v950_v62, %v1751_v40  ;;  %v952_v59 = vmul.f32 %v951_v48, %v949_v61  ;;  %v955_v2 = vmul.f32 %v951_v48, %v950_v62 }
 0x139   :  { %1045 = vst.msk [vmem:[#allocation13 + $0x5f] sm:$0x1] %vm1255_vm5, %v950_v62  ;;  %v1010_v56 = vmul.f32 2.0, %v980_v21 }
 0x13a   :  { %v953_v7 = vadd.f32 %v952_v59, %v1728_v3  ;;  %v956_v8 = vadd.f32 %v955_v2, %v1739_v15  ;;  %v959_v10 = vmul.f32 %v958_v63, %v887_v14  ;;  %v962_v13 = vsub.f32 %v902_v33, %v961_v36 }
 0x13b   :  { %v964_v17 = vmul.f32 %v958_v63, %v1751_v40 }
 0x13c   :  { %v954_v18 = vsel %vm1776_vm10, %v953_v7, %v1728_v3  ;;  %v957_v19 = vsel %vm1776_vm10, %v956_v8, %v1739_v15  ;;  %v960_v20 = vsel %vm1776_vm10, %v959_v10, %v887_v14  ;;  %v963_v3 = vsel %vm1776_vm10, %v962_v13, %v902_v33 }
 0x13d   :  { %v987_v22 = vmul.f32 %v969_v37, %v954_v18  ;;  %1034 = vst.msk [vmem:[#allocation13 + $0x54] sm:$0x1] %vm1255_vm5, %v954_v18  ;;  %v988_v60 = vmul.f32 %v974_v6, %v957_v19  ;;  %v965_v15 = vsel %vm1776_vm10, %v964_v17, %v1751_v40  ;;  %v994_v27 = vmul.f32 %v993_v16, %v960_v20 }
 0x13e   :  { %v983_v1 = vld [vmem:[#allocation1 + $0x3] ss:$9 sm:$0xff]  ;;  %1035 = vst.msk [vmem:[#allocation13 + $0x55] sm:$0x1] %vm1255_vm5, %v957_v19  ;;  %v997_v28 = vmul.f32 %v996_v24, %v965_v15  ;;  %v990_v32 = vmul.f32 %v980_v21, %v954_v18  ;;  %v1026_v14 = vmul.f32 %v980_v21, %v974_v6  ;;  %v1023_v40 = vmul.f32 %v980_v21, %v969_v37 }
 0x13f   :  { %v985_v26 = vmul.f32 %v983_v1, %v1761_v29  ;;  %1002 = vst [vmem:[#allocation1] sm:$0xff] %v1234_v0  ;;  %v989_v30 = vadd.f32 %v988_v60, %v987_v22  ;;  %v1000_v42 = vmul.f32 %v999_v9, %v963_v3  ;;  %v1008_v33 = vmul.f32 %v980_v21, %v980_v21 }
 0x140   :  { %1038 = vst.msk [vmem:[#allocation13 + $0x58] sm:$0x1] %vm1255_vm5, %v960_v20  ;;  %v998_v39 = vadd.f32 %v997_v28, %v994_v27  ;;  %v1024_v45 = vmul.f32 %v1023_v40, %v960_v20 }
 0x141   :  { %v986_v31 = vsub.f32 1.0, %v985_v26  ;;  %1039 = vst.msk [vmem:[#allocation13 + $0x59] sm:$0x1] %vm1255_vm5, %v963_v3  ;;  %v1009_v52 = vmul.f32 %v1008_v33, %v960_v20 }
 0x142   :  { %1040 = vst.msk [vmem:[#allocation13 + $0x5a] sm:$0x1] %vm1255_vm5, %v965_v15  ;;  %v1001_v49 = vadd.f32 %v1000_v42, %v998_v39 }
 0x143   :  { %v991_v34 = vmul.f32 %v986_v31, %v957_v19  ;;  %v1011_v11 = vmul.f32 %v1010_v56, %v986_v31  ;;  %v1025_v38 = vmul.f32 %v986_v31, %v969_v37  ;;  %1036 = vst.msk [vmem:[#allocation13 + $0x56] sm:$0x1] %vm1255_vm5, %v989_v30  ;;  %v1030_v25 = vmul.f32 %v986_v31, %v974_v6 }
 0x144   :  { %1046 = vst [vmem:[#allocation2] sm:$0x1] %v989_v30  ;;  %v1014_v12 = vmul.f32 %v986_v31, %v986_v31 }
 0x145   :  { %v1027_v35 = vadd.f32 %v1026_v14, %v1025_v38  ;;  %v992_v44 = vadd.f32 %v991_v34, %v990_v32  ;;  %v1012_v47 = vmul.f32 %v1011_v11, %v965_v15  ;;  %v1031_v55 = vmul.f32 %v1030_v25, %v963_v3 }
 0x146   :  { %v1004_v43 = vld [vmem:[#allocation1 + $0x4] ss:$9 sm:$0xff]  ;;  %v1015_v37 = vmul.f32 %v1014_v12, %v963_v3 }
 0x147   :  { %v1028_v23 = vmul.f32 %v1027_v35, %v965_v15  ;;  %1017 = vst [vmem:[#allocation1] sm:$0xff] %v1234_v0  ;;  %v1006_v50 = vmul.f32 %v1004_v43, %v1761_v29  ;;  %v1013_v58 = vadd.f32 %v1012_v47, %v1009_v52 }
 0x148   :  { %1037 = vst.msk [vmem:[#allocation13 + $0x57] sm:$0x1] %vm1255_vm5, %v992_v44 }
 0x149   :  { %1047 = vst [vmem:[#allocation3] sm:$0x1] %v992_v44  ;;  %v1007_v53 = vadd.f32 %v1006_v50, %v1001_v49  ;;  %v1029_v54 = vadd.f32 %v1028_v23, %v1024_v45  ;;  %v1016_v51 = vadd.f32 %v1015_v37, %v1013_v58 }
 0x14b   :  { %1041 = vst.msk [vmem:[#allocation13 + $0x5b] sm:$0x1] %vm1255_vm5, %v1007_v53  ;;  %v1032_v57 = vadd.f32 %v1031_v55, %v1029_v54 }
 0x14c   :  { %1048 = vst [vmem:[#allocation4] sm:$0x1] %v1007_v53 }
 0x14d   :  { %1043 = vst.msk [vmem:[#allocation13 + $0x5d] sm:$0x1] %vm1255_vm5, %v1032_v57 }
 0x14e   :  { %1050 = vst [vmem:[#allocation6] sm:$0x1] %v1032_v57  ;;  %v1019_v0 = vld [vmem:[#allocation1 + $0x5] ss:$9 sm:$0xff] }
 0x14f   :  { %v1021_v61 = vmul.f32 %v1019_v0, %v1761_v29 }
 0x151   :  { %v1022_v62 = vadd.f32 %v1021_v61, %v1016_v51 }
 0x153   :  { %1042 = vst.msk [vmem:[#allocation13 + $0x5c] sm:$0x1] %vm1255_vm5, %v1022_v62 }
 0x154   :  { %1049 = vst [vmem:[#allocation5] sm:$0x1] %v1022_v62  ;;  %1063 = dma.vmem_to_hbm [thread:$0]  %s1056_s2, 1536, %s1058_s30, [#allocation9], %s1203_s4, %s1203_s4, %s1204_s5  }
 0x155   :  { %1195 = dma.done.wait [#allocation9], 1536  }
 0x156   :  { %1196 = vsyncadd [#allocation9], 4294965760 }
 0x157   :  { %1068 = vsyncpa [#allocation8], 1 }
 0x158   :  { %1069 = vsyncpa [#allocation11], 1 }
 0x159   :  { %1070 = vsyncpa [#allocation9], 1 }

</bundles_post_ra>
